<compile_context>
chip_gen: v7x
topology: tpu7x:2x2x1
jax: 0.10.0
libtpu: 0.0.40
codegen_flags: <defaults>
</compile_context>

<pallas_src>
import functools

import jax
import jax.numpy as jnp
from jax import lax
from jax.experimental import pallas as pl
from jax.experimental.pallas import tpu as pltpu

BN_EPS = 1e-5
K1 = 7            # conv1 kernel size (taps padded to 8 lanes for the MXU)
FC_LANES = 128    # lane-dense width of the fc / log_softmax output block
NEG_BIG = -1e30   # bias value for padded fc lanes (exp() underflows to 0)


def _bn_relu(y, g, beta, m_rows):
    """Fused BatchNorm1d (training-mode batch stats, biased var) + ReLU.

    y: (M, C) f32 conv output.  One fused stats pass over [y | y*y], then one
    elementwise scale/shift/ReLU pass.
    """
    C = y.shape[-1]
    inv_m = 1.0 / m_rows
    stats = jnp.sum(jnp.concatenate([y, y * y], axis=-1),
                    axis=0, keepdims=True) * inv_m               # (1, 2C)
    mu = stats[:, :C]                                            # E[x]
    ex2 = stats[:, C:]                                           # E[x^2]
    var = ex2 - mu * mu                                          # biased var
    scale = g * lax.rsqrt(var + BN_EPS)
    shift = beta - mu * scale
    return jnp.maximum(y * scale + shift, 0.0)


def _im2col_bf16(h, *, N, L, K):
    """h: (N*L, C) f32 activation -> (N*L, K*C) bf16 im2col for 'same' conv.

    Built from one zero-padded (N, L+K-1, C) f32 buffer; tap k is the static
    slice [:, k:k+L, :], cast to bf16 BEFORE the lane-axis concatenate so the
    big (M, K*C) buffer is assembled directly in bf16.  Column ordering is
    tap-major then channel, matching weights flattened from (K, Cin, Cout).
    """
    C = h.shape[-1]
    pad = (K - 1) // 2
    h3 = h.reshape(N, L, C)
    z = jnp.zeros((N, pad, C), h.dtype)
    hp = jnp.concatenate([z, h3, z], axis=1)                     # (N, L+K-1, C) f32
    cols = jnp.concatenate(
        [hp[:, k:k + L, :].astype(jnp.bfloat16) for k in range(K)], axis=-1)
    return cols.reshape(N * L, K * C)                            # (M, K*C) bf16


def _convnet_kernel(xc_ref,
                    w1_ref, g1_ref, be1_ref,
                    w2_ref, g2_ref, be2_ref,
                    w3_ref, g3_ref, be3_ref,
                    wfc_ref, bfc_ref,
                    out_ref, *, N, L):
    M = N * L

    # ---- conv1 (Cin=1): im2col prebuilt in the wrapper, one bf16 MXU dot ----
    # (no conv bias: it is absorbed by the batch-stat BN that follows)
    y = jnp.dot(xc_ref[...], w1_ref[...], preferred_element_type=jnp.float32)
    h = _bn_relu(y, g1_ref[...], be1_ref[...], M)                # (M, 128) f32

    # ---- conv2: single im2col matmul, contraction 5*128 = 640 ----
    cols = _im2col_bf16(h, N=N, L=L, K=5)                        # (M, 640) bf16
    y = jnp.dot(cols, w2_ref[...], preferred_element_type=jnp.float32)
    h = _bn_relu(y, g2_ref[...], be2_ref[...], M)                # (M, 256) f32

    # ---- conv3: single im2col matmul, contraction 3*256 = 768 ----
    cols = _im2col_bf16(h, N=N, L=L, K=3)                        # (M, 768) bf16
    y = jnp.dot(cols, w3_ref[...], preferred_element_type=jnp.float32)
    h = _bn_relu(y, g3_ref[...], be3_ref[...], M)                # (M, 128) f32

    # ---- avg_pool1d(2) followed by mean over length ----
    # == mean over the first 2*(L//2) positions (pool drops a trailing odd elem).
    h3 = h.reshape(N, L, h.shape[-1])
    Lp = (L // 2) * 2
    pooled = jnp.mean(h3[:, :Lp, :], axis=1)                     # (N, 128) f32

    # ---- fc4 + log_softmax, lane-dense over FC_LANES=128 lanes ----
    # Padded lanes have zero weights and NEG_BIG bias -> exp() contributes 0.
    logits = jnp.dot(pooled.astype(jnp.bfloat16), wfc_ref[...],
                     preferred_element_type=jnp.float32) + bfc_ref[...]
    m = jnp.max(logits, axis=1, keepdims=True)
    z = logits - m
    lse = jnp.log(jnp.sum(jnp.exp(z), axis=1, keepdims=True))
    out_ref[...] = z - lse                                       # (N, 128) f32


def convnet_forward(x, params, n_classes):
    """x: (N, n_in) -> (N, n_classes) log-probabilities."""
    N, L = x.shape
    M = N * L
    pad = (K1 - 1) // 2
    xf = x.astype(jnp.float32)

    # im2col for conv1 (Cin=1): (N*L, 8) bf16, tap k at column k, column 7 = 0.
    zp = jnp.zeros((N, pad), jnp.float32)
    xp = jnp.concatenate([zp, xf, zp], axis=1)                   # (N, L + 6)
    cols = jnp.stack([xp[:, k:k + L] for k in range(K1)], axis=-1)  # (N, L, 7)
    cols = jnp.concatenate([cols, jnp.zeros((N, L, 1), jnp.float32)], axis=-1)
    x_cols = cols.reshape(M, K1 + 1).astype(jnp.bfloat16)        # (N*L, 8)

    args = (x_cols,) + tuple(params)

    # Advisory cost hint so XLA schedules the wrapper-side im2col / casts
    # around the custom call instead of serializing.
    flops = 2 * M * (8 * 128 + 5 * 128 * 256 + 3 * 256 * 128) \
        + 2 * N * 128 * FC_LANES
    bytes_accessed = sum(int(a.size) * a.dtype.itemsize for a in args) \
        + N * FC_LANES * 4
    cost = pl.CostEstimate(flops=flops,
                           transcendentals=N * FC_LANES + 3 * 256,
                           bytes_accessed=bytes_accessed)

    kernel = functools.partial(_convnet_kernel, N=N, L=L)
    out_padded = pl.pallas_call(
        kernel,
        out_shape=jax.ShapeDtypeStruct((N, FC_LANES), jnp.float32),
        in_specs=[pl.BlockSpec(memory_space=pltpu.MemorySpace.VMEM)
                  for _ in args],
        out_specs=pl.BlockSpec(memory_space=pltpu.MemorySpace.VMEM),
        cost_estimate=cost,
    )(*args)
    return out_padded[:, :n_classes]


def init_params(key, n_classes):
    """Deterministic synthetic parameters.

    Conv weights are stored tap-major and pre-flattened to (K*Cin, Cout) bf16
    (a transpose/reshape of PyTorch's (Cout, Cin, K) layout would be needed to
    load trained weights).  BN parameters stay f32.  Conv biases are omitted:
    they are exactly cancelled by the training-mode batch-stat BatchNorm.
    fc weights/bias are zero/-inf padded to 128 output lanes (lane-dense fc).
    """
    ks = jax.random.split(key, 16)

    def nrm(k, shape, scale=0.05):
        return scale * jax.random.normal(k, shape, jnp.float32)

    bf = lambda a: a.astype(jnp.bfloat16)

    # conv1: Conv1d(1, 128, 7) -> (8, 128), row 7 is the zero pad column.
    w1 = jnp.zeros((K1 + 1, 128), jnp.float32).at[:K1, :].set(nrm(ks[0], (K1, 128)))
    g1 = 1.0 + nrm(ks[2], (1, 128), 0.1)
    be1 = nrm(ks[3], (1, 128), 0.1)
    # conv2: Conv1d(128, 256, 5) -> (5*128, 256)
    w2 = nrm(ks[4], (5, 128, 256)).reshape(5 * 128, 256)
    g2 = 1.0 + nrm(ks[6], (1, 256), 0.1)
    be2 = nrm(ks[7], (1, 256), 0.1)
    # conv3: Conv1d(256, 128, 3) -> (3*256, 128)
    w3 = nrm(ks[8], (3, 256, 128)).reshape(3 * 256, 128)
    g3 = 1.0 + nrm(ks[10], (1, 128), 0.1)
    be3 = nrm(ks[11], (1, 128), 0.1)
    # fc4: Linear(128, n_classes), zero-padded to 128 output lanes.
    wfc = jnp.zeros((128, FC_LANES), jnp.float32)
    wfc = wfc.at[:, :n_classes].set(nrm(ks[12], (128, n_classes)))
    bfc = jnp.full((1, FC_LANES), NEG_BIG, jnp.float32)
    bfc = bfc.at[:, :n_classes].set(nrm(ks[13], (1, n_classes)))

    return (bf(w1), g1, be1,
            bf(w2), g2, be2,
            bf(w3), g3, be3,
            bf(wfc), bfc)


if __name__ == "__main__":
    N, n_in, n_classes = 4, 64, 10
    key = jax.random.PRNGKey(0)
    kx, kp = jax.random.split(key)
    x = jax.random.normal(kx, (N, n_in), jnp.float32)
    params = init_params(kp, n_classes)

    out = convnet_forward(x, params, n_classes)
    out = jax.block_until_ready(out)

    assert out.shape == (N, n_classes), out.shape
    # log_softmax rows must exponentiate-sum to ~1
    row_sums = jnp.exp(out).sum(axis=1)
    assert bool(jnp.all(jnp.abs(row_sums - 1.0) < 1e-2)), row_sums
    assert bool(jnp.all(jnp.isfinite(out))), out
    print("KERNEL_OK")
</pallas_src>

<mosaic_0001>
module attributes {stable_mosaic.version = 11 : i64} {
  func.func @_convnet_kernel(%arg0: memref<256x8xbf16, #tpu.memory_space<vmem>>, %arg1: memref<8x128xbf16, #tpu.memory_space<vmem>>, %arg2: memref<1x128xf32, #tpu.memory_space<vmem>>, %arg3: memref<1x128xf32, #tpu.memory_space<vmem>>, %arg4: memref<640x256xbf16, #tpu.memory_space<vmem>>, %arg5: memref<1x256xf32, #tpu.memory_space<vmem>>, %arg6: memref<1x256xf32, #tpu.memory_space<vmem>>, %arg7: memref<768x128xbf16, #tpu.memory_space<vmem>>, %arg8: memref<1x128xf32, #tpu.memory_space<vmem>>, %arg9: memref<1x128xf32, #tpu.memory_space<vmem>>, %arg10: memref<128x128xbf16, #tpu.memory_space<vmem>>, %arg11: memref<1x128xf32, #tpu.memory_space<vmem>>, %arg12: memref<4x128xf32, #tpu.memory_space<vmem>>) attributes {dimension_semantics = [], scalar_prefetch = 0 : i64, scratch_operands = 0 : i64, tpu.core_type = #tpu.core_type<tc>} {
    %c0 = arith.constant 0 : index
    %c0_0 = arith.constant 0 : index
    %0 = vector.load %arg0[%c0, %c0_0] : memref<256x8xbf16, #tpu.memory_space<vmem>>, vector<256x8xbf16>
    %c0_1 = arith.constant 0 : index
    %c0_2 = arith.constant 0 : index
    %1 = vector.load %arg1[%c0_1, %c0_2] : memref<8x128xbf16, #tpu.memory_space<vmem>>, vector<8x128xbf16>
    %cst = arith.constant dense<0.000000e+00> : vector<256x128xf32>
    %2 = tpu.matmul %0, %1, %cst {dimension_numbers = #tpu.dot_dimension_numbers<[1], [0], [0], [1], [0, 0, 1, 1], [], []>} : vector<256x8xbf16>, vector<8x128xbf16>, vector<256x128xf32> -> vector<256x128xf32>
    %c0_3 = arith.constant 0 : index
    %c0_4 = arith.constant 0 : index
    %3 = vector.load %arg2[%c0_3, %c0_4] : memref<1x128xf32, #tpu.memory_space<vmem>>, vector<1x128xf32>
    %c0_5 = arith.constant 0 : index
    %c0_6 = arith.constant 0 : index
    %4 = vector.load %arg3[%c0_5, %c0_6] : memref<1x128xf32, #tpu.memory_space<vmem>>, vector<1x128xf32>
    %5 = arith.mulf %2, %2 : vector<256x128xf32>
    %6 = tpu.concatenate %2, %5 in 1 : vector<256x128xf32>, vector<256x128xf32> -> vector<256x256xf32>
    %cst_7 = arith.constant dense<0.000000e+00> : vector<256xf32>
    %7 = vector.multi_reduction <add>, %6, %cst_7 [0] : vector<256x256xf32> to vector<256xf32>
    %8 = vector.shape_cast %7 : vector<256xf32> to vector<1x256xf32>
    %cst_8 = arith.constant 3.906250e-03 : f32
    %9 = vector.broadcast %cst_8 : f32 to vector<1x256xf32>
    %10 = arith.mulf %8, %9 : vector<1x256xf32>
    %11 = vector.extract_strided_slice %10 {offsets = [0, 0], sizes = [1, 128], strides = [1, 1]} : vector<1x256xf32> to vector<1x128xf32>
    %12 = vector.extract_strided_slice %10 {offsets = [0, 128], sizes = [1, 128], strides = [1, 1]} : vector<1x256xf32> to vector<1x128xf32>
    %13 = arith.mulf %11, %11 : vector<1x128xf32>
    %14 = arith.subf %12, %13 : vector<1x128xf32>
    %cst_9 = arith.constant 9.99999974E-6 : f32
    %15 = vector.broadcast %cst_9 : f32 to vector<1x128xf32>
    %16 = arith.addf %14, %15 : vector<1x128xf32>
    %17 = math.rsqrt %16 : vector<1x128xf32>
    %18 = arith.mulf %3, %17 : vector<1x128xf32>
    %19 = arith.mulf %11, %18 : vector<1x128xf32>
    %20 = arith.subf %4, %19 : vector<1x128xf32>
    %21 = vector.broadcast %18 : vector<1x128xf32> to vector<256x128xf32>
    %22 = arith.mulf %2, %21 : vector<256x128xf32>
    %23 = vector.broadcast %20 : vector<1x128xf32> to vector<256x128xf32>
    %24 = arith.addf %22, %23 : vector<256x128xf32>
    %cst_10 = arith.constant 0.000000e+00 : f32
    %25 = vector.broadcast %cst_10 : f32 to vector<256x128xf32>
    %26 = arith.maximumf %24, %25 : vector<256x128xf32>
    %27 = vector.shape_cast %26 : vector<256x128xf32> to vector<4x64x128xf32>
    %cst_11 = arith.constant 0.000000e+00 : f32
    %28 = vector.broadcast %cst_11 : f32 to vector<4x2x128xf32>
    %29 = tpu.concatenate %28, %27, %28 in 1 : vector<4x2x128xf32>, vector<4x64x128xf32>, vector<4x2x128xf32> -> vector<4x68x128xf32>
    %30 = vector.extract_strided_slice %29 {offsets = [0, 0, 0], sizes = [4, 64, 128], strides = [1, 1, 1]} : vector<4x68x128xf32> to vector<4x64x128xf32>
    %31 = arith.truncf %30 : vector<4x64x128xf32> to vector<4x64x128xbf16>
    %32 = vector.extract_strided_slice %29 {offsets = [0, 1, 0], sizes = [4, 64, 128], strides = [1, 1, 1]} : vector<4x68x128xf32> to vector<4x64x128xf32>
    %33 = arith.truncf %32 : vector<4x64x128xf32> to vector<4x64x128xbf16>
    %34 = vector.extract_strided_slice %29 {offsets = [0, 2, 0], sizes = [4, 64, 128], strides = [1, 1, 1]} : vector<4x68x128xf32> to vector<4x64x128xf32>
    %35 = arith.truncf %34 : vector<4x64x128xf32> to vector<4x64x128xbf16>
    %36 = vector.extract_strided_slice %29 {offsets = [0, 3, 0], sizes = [4, 64, 128], strides = [1, 1, 1]} : vector<4x68x128xf32> to vector<4x64x128xf32>
    %37 = arith.truncf %36 : vector<4x64x128xf32> to vector<4x64x128xbf16>
    %38 = vector.extract_strided_slice %29 {offsets = [0, 4, 0], sizes = [4, 64, 128], strides = [1, 1, 1]} : vector<4x68x128xf32> to vector<4x64x128xf32>
    %39 = arith.truncf %38 : vector<4x64x128xf32> to vector<4x64x128xbf16>
    %40 = tpu.concatenate %31, %33, %35, %37, %39 in 2 : vector<4x64x128xbf16>, vector<4x64x128xbf16>, vector<4x64x128xbf16>, vector<4x64x128xbf16>, vector<4x64x128xbf16> -> vector<4x64x640xbf16>
    %41 = vector.shape_cast %40 : vector<4x64x640xbf16> to vector<256x640xbf16>
    %c0_12 = arith.constant 0 : index
    %c0_13 = arith.constant 0 : index
    %42 = vector.load %arg4[%c0_12, %c0_13] : memref<640x256xbf16, #tpu.memory_space<vmem>>, vector<640x256xbf16>
    %cst_14 = arith.constant dense<0.000000e+00> : vector<256x256xf32>
    %43 = tpu.matmul %41, %42, %cst_14 {dimension_numbers = #tpu.dot_dimension_numbers<[1], [0], [0], [1], [0, 0, 1, 1], [], []>} : vector<256x640xbf16>, vector<640x256xbf16>, vector<256x256xf32> -> vector<256x256xf32>
    %c0_15 = arith.constant 0 : index
    %c0_16 = arith.constant 0 : index
    %44 = vector.load %arg5[%c0_15, %c0_16] : memref<1x256xf32, #tpu.memory_space<vmem>>, vector<1x256xf32>
    %c0_17 = arith.constant 0 : index
    %c0_18 = arith.constant 0 : index
    %45 = vector.load %arg6[%c0_17, %c0_18] : memref<1x256xf32, #tpu.memory_space<vmem>>, vector<1x256xf32>
    %46 = arith.mulf %43, %43 : vector<256x256xf32>
    %47 = tpu.concatenate %43, %46 in 1 : vector<256x256xf32>, vector<256x256xf32> -> vector<256x512xf32>
    %cst_19 = arith.constant dense<0.000000e+00> : vector<512xf32>
    %48 = vector.multi_reduction <add>, %47, %cst_19 [0] : vector<256x512xf32> to vector<512xf32>
    %49 = vector.shape_cast %48 : vector<512xf32> to vector<1x512xf32>
    %cst_20 = arith.constant 3.906250e-03 : f32
    %50 = vector.broadcast %cst_20 : f32 to vector<1x512xf32>
    %51 = arith.mulf %49, %50 : vector<1x512xf32>
    %52 = vector.extract_strided_slice %51 {offsets = [0, 0], sizes = [1, 256], strides = [1, 1]} : vector<1x512xf32> to vector<1x256xf32>
    %53 = vector.extract_strided_slice %51 {offsets = [0, 256], sizes = [1, 256], strides = [1, 1]} : vector<1x512xf32> to vector<1x256xf32>
    %54 = arith.mulf %52, %52 : vector<1x256xf32>
    %55 = arith.subf %53, %54 : vector<1x256xf32>
    %cst_21 = arith.constant 9.99999974E-6 : f32
    %56 = vector.broadcast %cst_21 : f32 to vector<1x256xf32>
    %57 = arith.addf %55, %56 : vector<1x256xf32>
    %58 = math.rsqrt %57 : vector<1x256xf32>
    %59 = arith.mulf %44, %58 : vector<1x256xf32>
    %60 = arith.mulf %52, %59 : vector<1x256xf32>
    %61 = arith.subf %45, %60 : vector<1x256xf32>
    %62 = vector.broadcast %59 : vector<1x256xf32> to vector<256x256xf32>
    %63 = arith.mulf %43, %62 : vector<256x256xf32>
    %64 = vector.broadcast %61 : vector<1x256xf32> to vector<256x256xf32>
    %65 = arith.addf %63, %64 : vector<256x256xf32>
    %cst_22 = arith.constant 0.000000e+00 : f32
    %66 = vector.broadcast %cst_22 : f32 to vector<256x256xf32>
    %67 = arith.maximumf %65, %66 : vector<256x256xf32>
    %68 = vector.shape_cast %67 : vector<256x256xf32> to vector<4x64x256xf32>
    %cst_23 = arith.constant 0.000000e+00 : f32
    %69 = vector.broadcast %cst_23 : f32 to vector<4x1x256xf32>
    %70 = tpu.concatenate %69, %68, %69 in 1 : vector<4x1x256xf32>, vector<4x64x256xf32>, vector<4x1x256xf32> -> vector<4x66x256xf32>
    %71 = vector.extract_strided_slice %70 {offsets = [0, 0, 0], sizes = [4, 64, 256], strides = [1, 1, 1]} : vector<4x66x256xf32> to vector<4x64x256xf32>
    %72 = arith.truncf %71 : vector<4x64x256xf32> to vector<4x64x256xbf16>
    %73 = vector.extract_strided_slice %70 {offsets = [0, 1, 0], sizes = [4, 64, 256], strides = [1, 1, 1]} : vector<4x66x256xf32> to vector<4x64x256xf32>
    %74 = arith.truncf %73 : vector<4x64x256xf32> to vector<4x64x256xbf16>
    %75 = vector.extract_strided_slice %70 {offsets = [0, 2, 0], sizes = [4, 64, 256], strides = [1, 1, 1]} : vector<4x66x256xf32> to vector<4x64x256xf32>
    %76 = arith.truncf %75 : vector<4x64x256xf32> to vector<4x64x256xbf16>
    %77 = tpu.concatenate %72, %74, %76 in 2 : vector<4x64x256xbf16>, vector<4x64x256xbf16>, vector<4x64x256xbf16> -> vector<4x64x768xbf16>
    %78 = vector.shape_cast %77 : vector<4x64x768xbf16> to vector<256x768xbf16>
    %c0_24 = arith.constant 0 : index
    %c0_25 = arith.constant 0 : index
    %79 = vector.load %arg7[%c0_24, %c0_25] : memref<768x128xbf16, #tpu.memory_space<vmem>>, vector<768x128xbf16>
    %cst_26 = arith.constant dense<0.000000e+00> : vector<256x128xf32>
    %80 = tpu.matmul %78, %79, %cst_26 {dimension_numbers = #tpu.dot_dimension_numbers<[1], [0], [0], [1], [0, 0, 1, 1], [], []>} : vector<256x768xbf16>, vector<768x128xbf16>, vector<256x128xf32> -> vector<256x128xf32>
    %c0_27 = arith.constant 0 : index
    %c0_28 = arith.constant 0 : index
    %81 = vector.load %arg8[%c0_27, %c0_28] : memref<1x128xf32, #tpu.memory_space<vmem>>, vector<1x128xf32>
    %c0_29 = arith.constant 0 : index
    %c0_30 = arith.constant 0 : index
    %82 = vector.load %arg9[%c0_29, %c0_30] : memref<1x128xf32, #tpu.memory_space<vmem>>, vector<1x128xf32>
    %83 = arith.mulf %80, %80 : vector<256x128xf32>
    %84 = tpu.concatenate %80, %83 in 1 : vector<256x128xf32>, vector<256x128xf32> -> vector<256x256xf32>
    %cst_31 = arith.constant dense<0.000000e+00> : vector<256xf32>
    %85 = vector.multi_reduction <add>, %84, %cst_31 [0] : vector<256x256xf32> to vector<256xf32>
    %86 = vector.shape_cast %85 : vector<256xf32> to vector<1x256xf32>
    %cst_32 = arith.constant 3.906250e-03 : f32
    %87 = vector.broadcast %cst_32 : f32 to vector<1x256xf32>
    %88 = arith.mulf %86, %87 : vector<1x256xf32>
    %89 = vector.extract_strided_slice %88 {offsets = [0, 0], sizes = [1, 128], strides = [1, 1]} : vector<1x256xf32> to vector<1x128xf32>
    %90 = vector.extract_strided_slice %88 {offsets = [0, 128], sizes = [1, 128], strides = [1, 1]} : vector<1x256xf32> to vector<1x128xf32>
    %91 = arith.mulf %89, %89 : vector<1x128xf32>
    %92 = arith.subf %90, %91 : vector<1x128xf32>
    %cst_33 = arith.constant 9.99999974E-6 : f32
    %93 = vector.broadcast %cst_33 : f32 to vector<1x128xf32>
    %94 = arith.addf %92, %93 : vector<1x128xf32>
    %95 = math.rsqrt %94 : vector<1x128xf32>
    %96 = arith.mulf %81, %95 : vector<1x128xf32>
    %97 = arith.mulf %89, %96 : vector<1x128xf32>
    %98 = arith.subf %82, %97 : vector<1x128xf32>
    %99 = vector.broadcast %96 : vector<1x128xf32> to vector<256x128xf32>
    %100 = arith.mulf %80, %99 : vector<256x128xf32>
    %101 = vector.broadcast %98 : vector<1x128xf32> to vector<256x128xf32>
    %102 = arith.addf %100, %101 : vector<256x128xf32>
    %cst_34 = arith.constant 0.000000e+00 : f32
    %103 = vector.broadcast %cst_34 : f32 to vector<256x128xf32>
    %104 = arith.maximumf %102, %103 : vector<256x128xf32>
    %105 = vector.shape_cast %104 : vector<256x128xf32> to vector<4x64x128xf32>
    %cst_35 = arith.constant dense<0.000000e+00> : vector<4x128xf32>
    %106 = vector.multi_reduction <add>, %105, %cst_35 [1] : vector<4x64x128xf32> to vector<4x128xf32>
    %cst_36 = arith.constant 6.400000e+01 : f32
    %107 = vector.broadcast %cst_36 : f32 to vector<4x128xf32>
    %108 = arith.divf %106, %107 : vector<4x128xf32>
    %109 = arith.truncf %108 : vector<4x128xf32> to vector<4x128xbf16>
    %c0_37 = arith.constant 0 : index
    %c0_38 = arith.constant 0 : index
    %110 = vector.load %arg10[%c0_37, %c0_38] : memref<128x128xbf16, #tpu.memory_space<vmem>>, vector<128x128xbf16>
    %cst_39 = arith.constant dense<0.000000e+00> : vector<4x128xf32>
    %111 = tpu.matmul %109, %110, %cst_39 {dimension_numbers = #tpu.dot_dimension_numbers<[1], [0], [0], [1], [0, 0, 1, 1], [], []>} : vector<4x128xbf16>, vector<128x128xbf16>, vector<4x128xf32> -> vector<4x128xf32>
    %c0_40 = arith.constant 0 : index
    %c0_41 = arith.constant 0 : index
    %112 = vector.load %arg11[%c0_40, %c0_41] : memref<1x128xf32, #tpu.memory_space<vmem>>, vector<1x128xf32>
    %113 = vector.broadcast %112 : vector<1x128xf32> to vector<4x128xf32>
    %114 = arith.addf %111, %113 : vector<4x128xf32>
    %cst_42 = arith.constant dense<0xFF800000> : vector<4xf32>
    %115 = vector.multi_reduction <maximumf>, %114, %cst_42 [1] : vector<4x128xf32> to vector<4xf32>
    %116 = vector.shape_cast %115 : vector<4xf32> to vector<4x1xf32>
    %117 = vector.broadcast %116 : vector<4x1xf32> to vector<4x128xf32>
    %118 = arith.subf %114, %117 : vector<4x128xf32>
    %119 = math.exp %118 : vector<4x128xf32>
    %cst_43 = arith.constant dense<0.000000e+00> : vector<4xf32>
    %120 = vector.multi_reduction <add>, %119, %cst_43 [1] : vector<4x128xf32> to vector<4xf32>
    %121 = vector.shape_cast %120 : vector<4xf32> to vector<4x1xf32>
    %122 = math.log %121 : vector<4x1xf32>
    %123 = vector.broadcast %122 : vector<4x1xf32> to vector<4x128xf32>
    %124 = arith.subf %118, %123 : vector<4x128xf32>
    %c0_44 = arith.constant 0 : index
    %c0_45 = arith.constant 0 : index
    %125 = vector.load %arg12[%c0_44, %c0_45] : memref<4x128xf32, #tpu.memory_space<vmem>>, vector<4x128xf32>
    tpu.vector_store %arg12[%c0_44, %c0_45], %124 {strides = array<i32>} : memref<4x128xf32, #tpu.memory_space<vmem>>, vector<4x128xf32>,
    return
  }
}

</mosaic_0001>

<bundles_post_ra>
// kernel: tpu_custom_call.1
= control target key start
LH: loop header
LB: loop body
LE: loop exit
PB: predicated region body
PF: predicated region fallthrough
CT: control target
= control target key end

     0   :  { %17 = vsyncpa [#allocation3], 0  ;;  %s9228_s0 = inlined_call_operand.vmem [shape: bf16[256,8], index: 0, kind: input, shape index: {}]   ;;  %s9229_s1 = inlined_call_operand.vmem [shape: bf16[8,128], index: 1, kind: input, shape index: {}]   ;;  %s9230_s2 = inlined_call_operand.vmem [shape: f32[1,128], index: 2, kind: input, shape index: {}]   ;;  %s9231_s3 = inlined_call_operand.vmem [shape: f32[1,128], index: 3, kind: input, shape index: {}]   ;;  %s9232_s4 = inlined_call_operand.hbm [shape: bf16[640,256], index: 4, kind: input, shape index: {}]   ;;  %s9233_s5 = inlined_call_operand.vmem [shape: f32[1,256], index: 5, kind: input, shape index: {}]   ;;  %s9234_s6 = inlined_call_operand.vmem [shape: f32[1,256], index: 6, kind: input, shape index: {}]   ;;  %s9235_s7 = inlined_call_operand.hbm [shape: bf16[768,128], index: 7, kind: input, shape index: {}]   ;;  %s9236_s8 = inlined_call_operand.vmem [shape: f32[1,128], index: 8, kind: input, shape index: {}]   ;;  %s9237_s9 = inlined_call_operand.vmem [shape: f32[1,128], index: 9, kind: input, shape index: {}]   ;;  %s9238_s10 = inlined_call_operand.vmem [shape: bf16[128,128], index: 10, kind: input, shape index: {}]   ;;  %s9239_s11 = inlined_call_operand.vmem [shape: f32[1,128], index: 11, kind: input, shape index: {}]   ;;  %s9240_s12 = inlined_call_operand.hbm [shape: f32[4,128], index: 12, kind: output, shape index: {}]  }
   0x1   :  { %18 = vsyncpa [#allocation6], 0 }
   0x2   :  { %19 = vsyncpa [#allocation4], 0  ;;  %s5843_s21 = smov [#allocation2]   ;;  %s5771_s25 = scalar_lea.hbm %s9232_s4, 10240 }
   0x3   :  { %s33_s22 = sshll.u32 %s5843_s21, 4  ;;  %p5772_p0 = scmp.ne.s32.totalorder %s9232_s4, %s5771_s25  ;;  %s34_s22 = int_to_ptr.vmem [resolvable:$true] %s33_s22 }
   0x4   :  { %p5775_p1 = scmp.lt.u32.totalorder %s5771_s25, %s9232_s4 }
   0x6   :  { %p5777_p2 = pnand %p5775_p1, %p5772_p0 }
   0x8   :  { %5780 = shalt.err (!%p5777_p2)
}
   0x9   :  { %s5781_s30 = scalar_lea.vmem %s34_s22, 10240  ;;  %p5786_p4 = scmp.lt.s32.totalorder %s34_s22, %s34_s22 }
   0xa   :  { %p5782_p3 = scmp.ne.s32.totalorder %s34_s22, %s5781_s30  ;;  %p5787_p5 = scmp.lt.s32.totalorder %s5781_s30, %s5781_s30 }
   0xc   :  { %p5788_p6 = por %p5787_p5, %p5786_p4 }
   0xe   :  { %p5789_p7 = pnand %p5788_p6, %p5782_p3 }
  0x10   :  { %5792 = shalt.err (!%p5789_p7)
}
  0x11   :  { %s5844_s13 = smov 128   ;;  %s5845_s14 = smov 8  }
  0x12   :  { %39 = dma.hbm_to_vmem [thread:$0]  %s9232_s4, 10240, %s34_s22, [#allocation3], %s5844_s13, %s5844_s13, %s5845_s14  }
  0x13   :  { %s5846_s17 = smov [#allocation5]   ;;  %s5793_s21 = scalar_lea.hbm %s9235_s7, 6144 }
  0x14   :  { %s49_s18 = sshll.u32 %s5846_s17, 4  ;;  %p5794_p8 = scmp.ne.s32.totalorder %s9235_s7, %s5793_s21  ;;  %s50_s18 = int_to_ptr.vmem [resolvable:$true] %s49_s18 }
  0x15   :  { %p5797_p9 = scmp.lt.u32.totalorder %s5793_s21, %s9235_s7 }
  0x17   :  { %p5799_p10 = pnand %p5797_p9, %p5794_p8 }
  0x19   :  { %5802 = shalt.err (!%p5799_p10)
}
  0x1a   :  { %s5803_s27 = scalar_lea.vmem %s50_s18, 6144  ;;  %p5808_p12 = scmp.lt.s32.totalorder %s50_s18, %s50_s18 }
  0x1b   :  { %p5804_p11 = scmp.ne.s32.totalorder %s50_s18, %s5803_s27  ;;  %p5809_p13 = scmp.lt.s32.totalorder %s5803_s27, %s5803_s27 }
  0x1d   :  { %p5810_p0 = por %p5809_p13, %p5808_p12 }
  0x1f   :  { %p5811_p1 = pnand %p5810_p0, %p5804_p11 }
  0x21   :  { %5814 = shalt.err (!%p5811_p1)
}
  0x22   :  { %s5847_s4 = smov 64   ;;  %s5848_s22 = smov 4  }
  0x23   :  { %55 = dma.hbm_to_vmem [thread:$0]  %s9235_s7, 6144, %s50_s18, [#allocation6], %s5847_s4, %s5847_s4, %s5848_s22  }
  0x24   :  { %5837 = dma.done.wait [#allocation3], 10240  }
  0x25   :  { %5838 = vsyncadd [#allocation3], 4294957056 }
  0x26   :  { %5839 = dma.done.wait [#allocation6], 6144  }
  0x27   :  { %5840 = vsyncadd [#allocation6], 4294961152  ;;  %vm233_vm0 = vcmask 1043456   ;;  %vm184_vm1 = vcmask 64512   ;;  %v103_v0 = vld [vmem:[%s9229_s1] sm:$0xf] }
  0x28   :  { %5554 = vmatprep.subr.msk.bf16.mxu0 %vm233_vm0, %v103_v0  ;;  %v235_v1 = vsel %vm233_vm0, %v103_v0, 0  ;;  %v5567_v2 = vld [vmem:[%s9228_s0] sm:$0xff]   ;;  %v5568_v3 = vld [vmem:[%s9228_s0 + $0x8] sm:$0xff]   ;;  %v5569_v4 = vld [vmem:[%s9228_s0 + $0x10] sm:$0xff]   ;;  %vm655_vm2 = vcmask 1041408   ;;  %vm5849_vm5 = vmmov 1  }
  0x29   :  { %5373 = vmatpush3.bf16.msra.mxu0 %v235_v1  ;;  %5374 = vmatprep.mubr.msk.bf16.mxu0 %vm184_vm1, %v5567_v2  ;;  %v5570_v5 = vld [vmem:[%s9228_s0 + $0x18] sm:$0xff]   ;;  %v5571_v6 = vld [vmem:[%s9228_s0 + $0x20] sm:$0xff]   ;;  %v5572_v7 = vld [vmem:[%s9228_s0 + $0x28] sm:$0xff]   ;;  %vm780_vm3 = vsmask.f32 7424  ;;  %vm961_vm8 = vcmask 1046528  }
  0x2a   :  { %v5573_v8 = vld [vmem:[%s9228_s0 + $0x30] sm:$0xff]   ;;  %v5574_v9 = vld [vmem:[%s9228_s0 + $0x38] sm:$0xff]   ;;  %v5575_v10 = vld [vmem:[%s9228_s0 + $0x40] sm:$0xff]   ;;  %vm1014_vm7 = vsmask.f32 6400  ;;  %vm1115_vm9 = vcmask 1045504  }
  0x2b   :  { %v5576_v11 = vld [vmem:[%s9228_s0 + $0x48] sm:$0xff]   ;;  %v5577_v12 = vld [vmem:[%s9228_s0 + $0x50] sm:$0xff]   ;;  %v5578_v13 = vld [vmem:[%s9228_s0 + $0x58] sm:$0xff]   ;;  %vm2771_vm10 = vcmask 1040384   ;;  %vm5853_vm13 = vmmov 0   ;;  %vm4668_vm14 = vcmask 1041409  }
  0x2c   :  { %5375 = vmatmul.mubr.msk.bf16.vlgmr.msra.gmra.mrb[0].mxu0 %vm184_vm1, %v5568_v3  ;;  %v5579_v14 = vld [vmem:[%s9228_s0 + $0x60] sm:$0xff]   ;;  %v5580_v15 = vld [vmem:[%s9228_s0 + $0x68] sm:$0xff]   ;;  %v5581_v16 = vld [vmem:[%s9228_s0 + $0x70] sm:$0xff]   ;;  %vm4670_vm15 = vcmask 1042434  }
  0x2d   :  { %5378 = vmatprep.mubr.msk.bf16.mxu0 %vm184_vm1, %v5569_v4  ;;  %v5582_v17 = vld [vmem:[%s9228_s0 + $0x78] sm:$0xff]   ;;  %v5583_v18 = vld [vmem:[#allocation2 + $0x4] ss:$8 sps:$4 sm:$0xff]   ;;  %v5585_v19 = vld [vmem:[#allocation2] ss:$8 sps:$4 sm:$0xff]  }
  0x2e   :  { %1648 = vmatprep.subr.bf16.mxu1 %v5583_v18  ;;  %v5586_v20 = vld [vmem:[#allocation2 + $0x14] ss:$8 sps:$4 sm:$0xff]   ;;  %v5588_v21 = vld [vmem:[#allocation2 + $0x10] ss:$8 sps:$4 sm:$0xff]   ;;  %v5589_v22 = vld [vmem:[#allocation2 + $0x24] ss:$8 sps:$4 sm:$0xff]  }
  0x2f   :  { %1649 = vmatpush1.bf16.msra.mxu1 %v5585_v19  ;;  %v5591_v23 = vld [vmem:[#allocation2 + $0x20] ss:$8 sps:$4 sm:$0xff]   ;;  %v5592_v24 = vld [vmem:[#allocation2 + $0x34] ss:$8 sps:$4 sm:$0xff]   ;;  %v5594_v25 = vld [vmem:[#allocation2 + $0x30] ss:$8 sps:$4 sm:$0xff]  }
  0x30   :  { %1650 = vmatprep.subr.bf16.mxu1 %v5586_v20  ;;  %v5595_v26 = vld [vmem:[#allocation2 + $0x44] ss:$8 sps:$4 sm:$0xff]   ;;  %v5597_v27 = vld [vmem:[#allocation2 + $0x40] ss:$8 sps:$4 sm:$0xff]   ;;  %v5598_v28 = vld [vmem:[#allocation2 + $0x54] ss:$8 sps:$4 sm:$0xff]  }
  0x31   :  { %v5600_v29 = vld [vmem:[#allocation2 + $0x50] ss:$8 sps:$4 sm:$0xff]   ;;  %v5601_v30 = vld [vmem:[#allocation2 + $0x64] ss:$8 sps:$4 sm:$0xff]   ;;  %v5603_v31 = vld [vmem:[#allocation2 + $0x60] ss:$8 sps:$4 sm:$0xff]  }
  0x32   :  { %v5604_v32 = vld [vmem:[#allocation2 + $0x74] ss:$8 sps:$4 sm:$0xff]   ;;  %v5606_v33 = vld [vmem:[#allocation2 + $0x70] ss:$8 sps:$4 sm:$0xff]   ;;  %v5607_v34 = vld [vmem:[#allocation2 + $0x84] ss:$8 sps:$4 sm:$0xff]  }
  0x33   :  { %1651 = vmatpush1.bf16.msra.mxu1 %v5588_v21  ;;  %v5609_v35 = vld [vmem:[#allocation2 + $0x80] ss:$8 sps:$4 sm:$0xff]   ;;  %v5610_v36 = vld [vmem:[#allocation2 + $0x94] ss:$8 sps:$4 sm:$0xff]   ;;  %v5612_v38 = vld [vmem:[#allocation2 + $0x90] ss:$8 sps:$4 sm:$0xff]  }
  0x34   :  { %5379 = vmatmul.mubr.msk.bf16.gmra.mrb[4].mxu0 %vm184_vm1, %v5570_v5  ;;  %1652 = vmatprep.subr.bf16.mxu1 %v5589_v22  ;;  %v5613_v42 = vld [vmem:[#allocation2 + $0xa4] ss:$8 sps:$4 sm:$0xff]   ;;  %v5615_v46 = vld [vmem:[#allocation2 + $0xa0] ss:$8 sps:$4 sm:$0xff]   ;;  %v5616_v50 = vld [vmem:[#allocation2 + $0xb4] ss:$8 sps:$4 sm:$0xff]  }
  0x35   :  { %5382 = vmatprep.mubr.msk.bf16.mxu0 %vm184_vm1, %v5571_v6  ;;  %v5618_v55 = vld [vmem:[#allocation2 + $0xb0] ss:$8 sps:$4 sm:$0xff]   ;;  %v5619_v62 = vld [vmem:[#allocation2 + $0xc4] ss:$8 sps:$4 sm:$0xff]   ;;  %v5621_v2 = vld [vmem:[#allocation2 + $0xc0] ss:$8 sps:$4 sm:$0xff]  }
  0x36   :  { %v5622_v6 = vld [vmem:[#allocation2 + $0xd4] ss:$8 sps:$4 sm:$0xff]   ;;  %v5625_v18 = vld [vmem:[#allocation2 + $0xe4] ss:$8 sps:$4 sm:$0xff]   ;;  %v5627_v19 = vld [vmem:[#allocation2 + $0xe0] ss:$8 sps:$4 sm:$0xff]  }
  0x37   :  { %1653 = vmatpush1.bf16.msra.mxu1 %v5591_v23  ;;  %v5628_v23 = vld [vmem:[#allocation2 + $0xf4] ss:$8 sps:$4 sm:$0xff]   ;;  %vm4905_vm4 = vmneg %vm655_vm2 }
  0x38   :  { %1654 = vmatprep.subr.bf16.mxu1 %v5592_v24  ;;  %vm6392_vm6 = vmpackc.low %vm5849_vm5, %vm4905_vm4 }
  0x39   :  { %vm4969_vm11 = vmneg %vm2771_vm10 }
  0x3a   :  { %vm8041_vm12 = vmpackc.low %vm5849_vm5, %vm4969_vm11 }
  0x3b   :  { %1655 = vmatpush1.bf16.msra.mxu1 %v5594_v25 }
  0x3c   :  { %5383 = vmatmul.mubr.msk.bf16.gmra.mrb[8].mxu0 %vm184_vm1, %v5572_v7  ;;  %1656 = vmatprep.subr.bf16.mxu1 %v5595_v26 }
  0x3d   :  { %5386 = vmatprep.mubr.msk.bf16.mxu0 %vm184_vm1, %v5573_v8 }
  0x3f   :  { %1657 = vmatpush1.bf16.msra.mxu1 %v5597_v27  ;;  %v5630_v27 = vld [vmem:[#allocation2 + $0xf0] ss:$8 sps:$4 sm:$0xff]  }
  0x40   :  { %1658 = vmatprep.subr.bf16.mxu1 %v5598_v28 }
  0x43   :  { %1659 = vmatpush1.bf16.msra.mxu1 %v5600_v29 }
  0x44   :  { %5387 = vmatmul.mubr.msk.bf16.gmra.mrb[12].mxu0 %vm184_vm1, %v5574_v9  ;;  %1660 = vmatprep.subr.bf16.mxu1 %v5601_v30 }
  0x45   :  { %5390 = vmatprep.mubr.msk.bf16.mxu0 %vm184_vm1, %v5575_v10 }
  0x47   :  { %1661 = vmatpush1.bf16.msra.mxu1 %v5603_v31 }
  0x48   :  { %1662 = vmatprep.subr.bf16.mxu1 %v5604_v32 }
  0x4b   :  { %1663 = vmatpush1.bf16.msra.mxu1 %v5606_v33 }
  0x4c   :  { %5391 = vmatmul.mubr.msk.bf16.gmra.mrb[16].mxu0 %vm184_vm1, %v5576_v11  ;;  %1664 = vmatprep.subr.bf16.mxu1 %v5607_v34  ;;  %v5624_v11 = vld [vmem:[#allocation2 + $0xd0] ss:$8 sps:$4 sm:$0xff]  }
  0x4d   :  { %5394 = vmatprep.mubr.msk.bf16.mxu0 %vm184_vm1, %v5577_v12 }
  0x4f   :  { %1665 = vmatpush1.bf16.msra.mxu1 %v5609_v35 }
  0x50   :  { %1666 = vmatprep.subr.bf16.mxu1 %v5610_v36 }
  0x53   :  { %1667 = vmatpush1.bf16.msra.mxu1 %v5612_v38  ;;  %v5633_v38 = vld [vmem:[#allocation2 + $0x104] ss:$8 sps:$4 sm:$0xff]  }
  0x54   :  { %5395 = vmatmul.mubr.msk.bf16.gmra.mrb[20].mxu0 %vm184_vm1, %v5578_v13  ;;  %1668 = vmatprep.subr.bf16.mxu1 %v5613_v42 }
  0x55   :  { %5398 = vmatprep.mubr.msk.bf16.mxu0 %vm184_vm1, %v5579_v14 }
  0x57   :  { %1669 = vmatpush1.bf16.msra.mxu1 %v5615_v46 }
  0x58   :  { %1670 = vmatprep.subr.bf16.mxu1 %v5616_v50 }
  0x5b   :  { %1671 = vmatpush1.bf16.msra.mxu1 %v5618_v55 }
  0x5c   :  { %5399 = vmatmul.mubr.msk.bf16.gmra.mrb[24].mxu0 %vm184_vm1, %v5580_v15  ;;  %1672 = vmatprep.subr.bf16.mxu1 %v5619_v62 }
  0x5d   :  { %5402 = vmatprep.mubr.msk.bf16.mxu0 %vm184_vm1, %v5581_v16 }
  0x5f   :  { %1673 = vmatpush1.bf16.msra.mxu1 %v5621_v2 }
  0x60   :  { %1674 = vmatprep.subr.bf16.mxu1 %v5622_v6 }
  0x63   :  { %1675 = vmatpush1.bf16.msra.mxu1 %v5624_v11 }
  0x64   :  { %5403 = vmatmul.mubr.msk.bf16.gmra.mrb[28].mxu0 %vm184_vm1, %v5582_v17  ;;  %1676 = vmatprep.subr.bf16.mxu1 %v5625_v18  ;;  %vm4672_vm1 = vcmask 1043459  }
  0x67   :  { %1677 = vmatpush1.bf16.msra.mxu1 %v5627_v19 }
  0x68   :  { %1678 = vmatprep.subr.bf16.mxu1 %v5628_v23 }
  0x6b   :  { %1679 = vmatpush1.bf16.msra.mxu1 %v5630_v27 }
  0x6c   :  { %1841 = vmatprep.subr.bf16.mxu1 %v5633_v38 }
  0xff   :  { %v6013_v37 = vpop.f32.mrb[0].mxu0 }
 0x100   :  { %v6015_v39 = vpop.f32.mrb[1].mxu0  ;;  %v402_v47 = vmul.f32 %v6013_v37, %v6013_v37 }
 0x101   :  { %v6017_v40 = vpop.f32.mrb[2].mxu0  ;;  %v400_v43 = vmul.f32 %v6015_v39, %v6015_v39 }
 0x102   :  { %v6019_v41 = vpop.f32.mrb[3].mxu0  ;;  %v403_v51 = vmul.f32 %v6017_v40, %v6017_v40 }
 0x103   :  { %v401_v44 = vmul.f32 %v6019_v41, %v6019_v41  ;;  %v432_v45 = vadd.f32 %v6019_v41, %v6015_v39 }
 0x105   :  { %v433_v48 = vadd.f32 %v6013_v37, %v432_v45  ;;  %v469_v49 = vadd.f32 %v401_v44, %v400_v43 }
 0x107   :  { %v470_v52 = vadd.f32 %v469_v49, %v402_v47  ;;  %v6032_v53 = vpop.f32.mrb[4].mxu0  ;;  %v434_v54 = vadd.f32 %v6017_v40, %v433_v48 }
 0x108   :  { %v6035_v56 = vpop.f32.mrb[5].mxu0  ;;  %v406_v3 = vmul.f32 %v6032_v53, %v6032_v53 }
 0x109   :  { %v404_v57 = vmul.f32 %v6035_v56, %v6035_v56  ;;  %v435_v58 = vadd.f32 %v434_v54, %v6035_v56  ;;  %v471_v59 = vadd.f32 %v470_v52, %v403_v51  ;;  %v6040_v60 = vpop.f32.mrb[6].mxu0 }
 0x10a   :  { %v6042_v61 = vpop.f32.mrb[7].mxu0  ;;  %v407_v7 = vmul.f32 %v6040_v60, %v6040_v60 }
 0x10b   :  { %v472_v63 = vadd.f32 %v471_v59, %v404_v57  ;;  %v405_v0 = vmul.f32 %v6042_v61, %v6042_v61  ;;  %v436_v1 = vadd.f32 %v435_v58, %v6042_v61 }
 0x10d   :  { %v437_v4 = vadd.f32 %v6032_v53, %v436_v1  ;;  %v473_v5 = vadd.f32 %v472_v63, %v405_v0 }
 0x10f   :  { %v474_v8 = vadd.f32 %v473_v5, %v406_v3  ;;  %v6052_v9 = vpop.f32.mrb[8].mxu0  ;;  %v438_v10 = vadd.f32 %v6040_v60, %v437_v4 }
 0x110   :  { %v6055_v12 = vpop.f32.mrb[9].mxu0  ;;  %v410_v24 = vmul.f32 %v6052_v9, %v6052_v9 }
 0x111   :  { %v408_v13 = vmul.f32 %v6055_v12, %v6055_v12  ;;  %v439_v14 = vadd.f32 %v438_v10, %v6055_v12  ;;  %v475_v15 = vadd.f32 %v474_v8, %v407_v7  ;;  %v6060_v16 = vpop.f32.mrb[10].mxu0 }
 0x112   :  { %v6062_v17 = vpop.f32.mrb[11].mxu0  ;;  %v411_v28 = vmul.f32 %v6060_v16, %v6060_v16 }
 0x113   :  { %v476_v20 = vadd.f32 %v475_v15, %v408_v13  ;;  %v409_v21 = vmul.f32 %v6062_v17, %v6062_v17  ;;  %v440_v22 = vadd.f32 %v439_v14, %v6062_v17 }
 0x115   :  { %v441_v25 = vadd.f32 %v6052_v9, %v440_v22  ;;  %v477_v26 = vadd.f32 %v476_v20, %v409_v21 }
 0x117   :  { %v478_v29 = vadd.f32 %v477_v26, %v410_v24  ;;  %v6072_v30 = vpop.f32.mrb[12].mxu0  ;;  %v442_v31 = vadd.f32 %v6060_v16, %v441_v25 }
 0x118   :  { %v6075_v32 = vpop.f32.mrb[13].mxu0  ;;  %v414_v46 = vmul.f32 %v6072_v30, %v6072_v30 }
 0x119   :  { %v412_v33 = vmul.f32 %v6075_v32, %v6075_v32  ;;  %v443_v34 = vadd.f32 %v442_v31, %v6075_v32  ;;  %v479_v35 = vadd.f32 %v478_v29, %v411_v28  ;;  %v6080_v36 = vpop.f32.mrb[14].mxu0 }
 0x11a   :  { %v6082_v42 = vpop.f32.mrb[15].mxu0  ;;  %v415_v49 = vmul.f32 %v6080_v36, %v6080_v36 }
 0x11b   :  { %v480_v43 = vadd.f32 %v479_v35, %v412_v33  ;;  %v413_v44 = vmul.f32 %v6082_v42, %v6082_v42  ;;  %v444_v45 = vadd.f32 %v443_v34, %v6082_v42 }
 0x11d   :  { %v445_v47 = vadd.f32 %v6072_v30, %v444_v45  ;;  %v481_v48 = vadd.f32 %v480_v43, %v413_v44 }
 0x11f   :  { %v482_v50 = vadd.f32 %v481_v48, %v414_v46  ;;  %v6092_v51 = vpop.f32.mrb[16].mxu0  ;;  %v446_v52 = vadd.f32 %v6080_v36, %v445_v47 }
 0x120   :  { %v6095_v54 = vpop.f32.mrb[17].mxu0  ;;  %v418_v2 = vmul.f32 %v6092_v51, %v6092_v51 }
 0x121   :  { %v416_v55 = vmul.f32 %v6095_v54, %v6095_v54  ;;  %v447_v57 = vadd.f32 %v446_v52, %v6095_v54  ;;  %v483_v58 = vadd.f32 %v482_v50, %v415_v49  ;;  %v6100_v59 = vpop.f32.mrb[18].mxu0 }
 0x122   :  { %v6102_v62 = vpop.f32.mrb[19].mxu0  ;;  %v419_v5 = vmul.f32 %v6100_v59, %v6100_v59 }
 0x123   :  { %v484_v63 = vadd.f32 %v483_v58, %v416_v55  ;;  %v417_v0 = vmul.f32 %v6102_v62, %v6102_v62  ;;  %v448_v1 = vadd.f32 %v447_v57, %v6102_v62 }
 0x125   :  { %v449_v3 = vadd.f32 %v6092_v51, %v448_v1  ;;  %v485_v4 = vadd.f32 %v484_v63, %v417_v0 }
 0x127   :  { %v486_v6 = vadd.f32 %v485_v4, %v418_v2  ;;  %v6112_v7 = vpop.f32.mrb[20].mxu0  ;;  %v450_v8 = vadd.f32 %v6100_v59, %v449_v3 }
 0x128   :  { %v6115_v10 = vpop.f32.mrb[21].mxu0  ;;  %v422_v22 = vmul.f32 %v6112_v7, %v6112_v7 }
 0x129   :  { %v420_v11 = vmul.f32 %v6115_v10, %v6115_v10  ;;  %v451_v13 = vadd.f32 %v450_v8, %v6115_v10  ;;  %v487_v14 = vadd.f32 %v486_v6, %v419_v5  ;;  %v6120_v15 = vpop.f32.mrb[22].mxu0 }
 0x12a   :  { %v6122_v18 = vpop.f32.mrb[23].mxu0  ;;  %v423_v25 = vmul.f32 %v6120_v15, %v6120_v15 }
 0x12b   :  { %v488_v19 = vadd.f32 %v487_v14, %v420_v11  ;;  %v421_v20 = vmul.f32 %v6122_v18, %v6122_v18  ;;  %v452_v21 = vadd.f32 %v451_v13, %v6122_v18 }
 0x12d   :  { %v453_v23 = vadd.f32 %v6112_v7, %v452_v21  ;;  %v489_v24 = vadd.f32 %v488_v19, %v421_v20 }
 0x12f   :  { %v490_v26 = vadd.f32 %v489_v24, %v422_v22  ;;  %v6132_v27 = vpop.f32.mrb[24].mxu0  ;;  %v454_v28 = vadd.f32 %v6120_v15, %v453_v23 }
 0x130   :  { %v6135_v29 = vpop.f32.mrb[25].mxu0  ;;  %v426_v46 = vmul.f32 %v6132_v27, %v6132_v27 }
 0x131   :  { %v424_v31 = vmul.f32 %v6135_v29, %v6135_v29  ;;  %v455_v33 = vadd.f32 %v454_v28, %v6135_v29  ;;  %v491_v34 = vadd.f32 %v490_v26, %v423_v25  ;;  %v5401_v35 = vpop.f32.mrb[26].mxu0 }
 0x132   :  { %v6140_v38 = vpop.f32.mrb[27].mxu0  ;;  %v427_v49 = vmul.f32 %v5401_v35, %v5401_v35 }
 0x133   :  { %v492_v43 = vadd.f32 %v491_v34, %v424_v31  ;;  %v425_v44 = vmul.f32 %v6140_v38, %v6140_v38  ;;  %v456_v45 = vadd.f32 %v455_v33, %v6140_v38 }
 0x135   :  { %v457_v47 = vadd.f32 %v6132_v27, %v456_v45  ;;  %v493_v48 = vadd.f32 %v492_v43, %v425_v44 }
 0x137   :  { %v494_v50 = vadd.f32 %v493_v48, %v426_v46  ;;  %v5404_v52 = vpop.f32.mrb[28].mxu0  ;;  %v458_v55 = vadd.f32 %v5401_v35, %v457_v47 }
 0x138   :  { %v383_v57 = vpop.f32.mrb[29].mxu0  ;;  %v430_v6 = vmul.f32 %v5404_v52, %v5404_v52 }
 0x139   :  { %v428_v58 = vmul.f32 %v383_v57, %v383_v57  ;;  %v459_v63 = vadd.f32 %v458_v55, %v383_v57  ;;  %v495_v0 = vadd.f32 %v494_v50, %v427_v49  ;;  %v5405_v1 = vpop.f32.mrb[30].mxu0  ;;  %v516_v50 = vlaneseq }
 0x13a   :  { %v386_v2 = vpop.f32.mrb[31].mxu0  ;;  %v431_v13 = vmul.f32 %v5405_v1, %v5405_v1 }
 0x13b   :  { %v496_v3 = vadd.f32 %v495_v0, %v428_v58  ;;  %v429_v4 = vmul.f32 %v386_v2, %v386_v2  ;;  %v460_v5 = vadd.f32 %v459_v63, %v386_v2  ;;  %v6148_v55 = vshrl.u32 %v516_v50, 7  ;;  %v398_v58 = vld [vmem:[%s9230_s2] sm:$0x1] }
 0x13d   :  { %v461_v8 = vadd.f32 %v5404_v52, %v460_v5  ;;  %v497_v11 = vadd.f32 %v496_v3, %v429_v4  ;;  %9312 = vst [vmem:[#allocation11_spill] sm:$0xff] %v6148_v55  ;;  %v6154_v63 = vsub.s32 0, %v6148_v55  ;;  %v399_v4 = vld [vmem:[%s9231_s3] sm:$0x1] }
 0x13f   :  { %v462_v14 = vadd.f32 %v5405_v1, %v461_v8  ;;  %v498_v19 = vadd.f32 %v497_v11, %v430_v6  ;;  %9313 = vst [vmem:[#allocation12_spill] sm:$0xff] %v6154_v63 }
 0x141   :  { %v463_v20 = vrot.slane %v462_v14, 4  ;;  %v499_v21 = vadd.f32 %v498_v19, %v431_v13 }
 0x143   :  { %v464_v22 = vadd.f32 %v463_v20, %v462_v14  ;;  %v500_v23 = vrot.slane %v499_v21, 4 }
 0x145   :  { %v465_v24 = vrot.slane %v464_v22, 2  ;;  %v501_v25 = vadd.f32 %v500_v23, %v499_v21 }
 0x147   :  { %v466_v26 = vadd.f32 %v465_v24, %v464_v22  ;;  %v502_v28 = vrot.slane %v501_v25, 2 }
 0x149   :  { %v467_v31 = vrot.slane %v466_v26, 1  ;;  %v503_v33 = vadd.f32 %v502_v28, %v501_v25 }
 0x14b   :  { %v468_v34 = vadd.f32 %v467_v31, %v466_v26  ;;  %v504_v43 = vrot.slane %v503_v33, 1 }
 0x14d   :  { %v505_v44 = vadd.f32 %v504_v43, %v503_v33  ;;  %v506_v45 = vmul.f32 0.00390625, %v468_v34 }
 0x14f   :  { %v507_v46 = vmul.f32 0.00390625, %v505_v44  ;;  %v508_v47 = vmul.f32 %v506_v45, %v506_v45 }
 0x151   :  { %v509_v48 = vsub.f32 %v507_v46, %v508_v47 }
 0x153   :  { %v510_v49 = vadd.f32 1e-05, %v509_v48 }
 0x155   :  { %5759 = vrsqrt.f32 %v510_v49 }
 0x15f   :  { %v5760_v0 = vpop.eup %5759 }
 0x160   :  { %v512_v3 = vmul.f32 %v5760_v0, %v398_v58 }
 0x162   :  { %v513_v5 = vmul.f32 %v512_v3, %v506_v45  ;;  %v519_v6 = vrot.slane %v512_v3, %v6154_v63 }
 0x164   :  { %v514_v8 = vsub.f32 %v399_v4, %v513_v5  ;;  %v548_v11 = vmul.f32 %v5401_v35, %v519_v6  ;;  %v549_v13 = vmul.f32 %v519_v6, %v383_v57  ;;  %v550_v14 = vmul.f32 %v519_v6, %v386_v2 }
 0x165   :  { %v551_v19 = vmul.f32 %v5404_v52, %v519_v6  ;;  %v552_v20 = vmul.f32 %v5405_v1, %v519_v6  ;;  %v521_v21 = vmul.f32 %v519_v6, %v6015_v39  ;;  %v522_v22 = vmul.f32 %v519_v6, %v6019_v41 }
 0x166   :  { %v6163_v23 = vrot.slane %v514_v8, %v6154_v63  ;;  %v523_v24 = vmul.f32 %v6013_v37, %v519_v6  ;;  %v524_v25 = vmul.f32 %v6017_v40, %v519_v6  ;;  %v525_v26 = vmul.f32 %v519_v6, %v6035_v56 }
 0x167   :  { %v526_v28 = vmul.f32 %v519_v6, %v6042_v61  ;;  %v527_v35 = vmul.f32 %v6032_v53, %v519_v6  ;;  %v528_v52 = vmul.f32 %v6040_v60, %v519_v6  ;;  %v529_v57 = vmul.f32 %v519_v6, %v6055_v12 }
 0x168   :  { %v586_v39 = vadd.f32 %v6163_v23, %v548_v11  ;;  %v587_v41 = vadd.f32 %v6163_v23, %v549_v13  ;;  %v588_v1 = vadd.f32 %v6163_v23, %v550_v14  ;;  %v589_v37 = vadd.f32 %v6163_v23, %v551_v19 }
 0x169   :  { %v590_v40 = vadd.f32 %v6163_v23, %v552_v20  ;;  %v530_v56 = vmul.f32 %v519_v6, %v6062_v17  ;;  %v531_v61 = vmul.f32 %v6052_v9, %v519_v6  ;;  %v532_v53 = vmul.f32 %v6060_v16, %v519_v6 }
 0x16a   :  { %v618_v2 = vmax.f32 %v586_v39, 0.0  ;;  %v619_v60 = vmax.f32 %v587_v41, 0.0  ;;  %v620_v31 = vmax.f32 %v588_v1, 0.0  ;;  %v621_v12 = vmax.f32 %v589_v37, 0.0 }
 0x16b   :  { %v622_v33 = vmax.f32 %v590_v40, 0.0  ;;  %v533_v34 = vmul.f32 %v519_v6, %v6075_v32  ;;  %v534_v43 = vmul.f32 %v519_v6, %v6082_v42  ;;  %v535_v44 = vmul.f32 %v6072_v30, %v519_v6 }
 0x16c   :  { %v6183_v45 = vrot.slane %v618_v2, 6  ;;  %v708_v46 = vrot.slane %v619_v60, 6  ;;  %v710_v47 = vrot.slane %v620_v31, 6  ;;  %v712_v17 = vrot.slane %v621_v12, 6 }
 0x16d   :  { %v6185_v48 = vrot.slane %v622_v33, 6  ;;  %v536_v9 = vmul.f32 %v6080_v36, %v519_v6  ;;  %v537_v16 = vmul.f32 %v519_v6, %v6095_v54  ;;  %v538_v49 = vmul.f32 %v519_v6, %v6102_v62 }
 0x16e   :  { %v709_v32 = vsel %vm655_vm2, %v6183_v45, %v708_v46  ;;  %v711_v42 = vsel %vm655_vm2, %v708_v46, %v710_v47  ;;  %v713_v30 = vsel %vm655_vm2, %v710_v47, %v712_v17  ;;  %v539_v50 = vmul.f32 %v6092_v51, %v519_v6 }
 0x16f   :  { %v715_v58 = vsel %vm655_vm2, %v712_v17, %v6185_v48  ;;  %v6197_v0 = vpack.c.bf16 %v711_v42, %v709_v32  ;;  %v540_v36 = vmul.f32 %v6100_v59, %v519_v6  ;;  %v541_v54 = vmul.f32 %v519_v6, %v6115_v10 }
 0x170   :  { %v6201_v3 = vpack.c.bf16 %v715_v58, %v713_v30  ;;  %v542_v62 = vmul.f32 %v519_v6, %v6122_v18  ;;  %v543_v4 = vmul.f32 %v6112_v7, %v519_v6  ;;  %v544_v5 = vmul.f32 %v6120_v15, %v519_v6 }
 0x171   :  { %v545_v8 = vmul.f32 %v519_v6, %v6135_v29  ;;  %v546_v51 = vmul.f32 %v519_v6, %v6140_v38  ;;  %v547_v11 = vmul.f32 %v6132_v27, %v519_v6  ;;  %v559_v13 = vadd.f32 %v6163_v23, %v521_v21 }
 0x172   :  { %v560_v59 = vadd.f32 %v6163_v23, %v522_v22  ;;  %v561_v10 = vadd.f32 %v6163_v23, %v523_v24  ;;  %v562_v14 = vadd.f32 %v6163_v23, %v524_v25  ;;  %v563_v18 = vadd.f32 %v6163_v23, %v525_v26 }
 0x173   :  { %v564_v7 = vadd.f32 %v6163_v23, %v526_v28  ;;  %v565_v15 = vadd.f32 %v6163_v23, %v527_v35  ;;  %v566_v29 = vadd.f32 %v6163_v23, %v528_v52  ;;  %v567_v38 = vadd.f32 %v6163_v23, %v529_v57 }
 0x174   :  { %v568_v27 = vadd.f32 %v6163_v23, %v530_v56  ;;  %v569_v6 = vadd.f32 %v6163_v23, %v531_v61  ;;  %v570_v19 = vadd.f32 %v6163_v23, %v532_v53  ;;  %v571_v20 = vadd.f32 %v6163_v23, %v533_v34 }
 0x175   :  { %v572_v21 = vadd.f32 %v6163_v23, %v534_v43  ;;  %v573_v22 = vadd.f32 %v6163_v23, %v535_v44  ;;  %v6225_v24 = vadd.f32 %v6163_v23, %v536_v9  ;;  %v6228_v25 = vadd.f32 %v6163_v23, %v537_v16 }
 0x176   :  { %v6231_v26 = vadd.f32 %v6163_v23, %v538_v49  ;;  %v6234_v28 = vadd.f32 %v6163_v23, %v539_v50  ;;  %v6237_v35 = vadd.f32 %v6163_v23, %v540_v36  ;;  %v6240_v52 = vadd.f32 %v6163_v23, %v541_v54 }
 0x177   :  { %v6243_v57 = vadd.f32 %v6163_v23, %v542_v62  ;;  %v6246_v39 = vadd.f32 %v6163_v23, %v543_v4  ;;  %v6249_v41 = vadd.f32 %v6163_v23, %v544_v5  ;;  %v6252_v1 = vadd.f32 %v6163_v23, %v545_v8 }
 0x178   :  { %v6255_v37 = vadd.f32 %v6163_v23, %v546_v51  ;;  %v6258_v40 = vadd.f32 %v6163_v23, %v547_v11  ;;  %v591_v56 = vmax.f32 %v559_v13, 0.0  ;;  %v592_v61 = vmax.f32 %v560_v59, 0.0 }
 0x179   :  { %v593_v53 = vmax.f32 %v561_v10, 0.0  ;;  %v594_v2 = vmax.f32 %v562_v14, 0.0  ;;  %v595_v60 = vmax.f32 %v563_v18, 0.0  ;;  %v596_v31 = vmax.f32 %v564_v7, 0.0 }
 0x17a   :  { %v597_v12 = vmax.f32 %v565_v15, 0.0  ;;  %v598_v33 = vmax.f32 %v566_v29, 0.0  ;;  %v599_v34 = vmax.f32 %v567_v38, 0.0  ;;  %v600_v43 = vmax.f32 %v568_v27, 0.0 }
 0x17b   :  { %v601_v44 = vmax.f32 %v569_v6, 0.0  ;;  %v602_v46 = vmax.f32 %v570_v19, 0.0  ;;  %v603_v47 = vmax.f32 %v571_v20, 0.0  ;;  %v604_v17 = vmax.f32 %v572_v21, 0.0 }
 0x17c   :  { %v605_v9 = vmax.f32 %v573_v22, 0.0  ;;  %v606_v16 = vmax.f32 %v6225_v24, 0.0  ;;  %v607_v23 = vmax.f32 %v6228_v25, 0.0  ;;  %v608_v49 = vmax.f32 %v6231_v26, 0.0 }
 0x17d   :  { %v609_v32 = vmax.f32 %v6234_v28, 0.0  ;;  %v610_v42 = vmax.f32 %v6237_v35, 0.0  ;;  %v611_v30 = vmax.f32 %v6240_v52, 0.0  ;;  %v612_v50 = vmax.f32 %v6243_v57, 0.0 }
 0x17e   :  { %v613_v58 = vmax.f32 %v6246_v39, 0.0  ;;  %v614_v36 = vmax.f32 %v6249_v41, 0.0  ;;  %v615_v54 = vmax.f32 %v6252_v1, 0.0  ;;  %v616_v62 = vmax.f32 %v6255_v37, 0.0 }
 0x17f   :  { %v617_v4 = vmax.f32 %v6258_v40, 0.0  ;;  %v6272_v5 = vrot.slane %v591_v56, 6  ;;  %v657_v8 = vrot.slane %v592_v61, 6  ;;  %v659_v51 = vrot.slane %v593_v53, 6 }
 0x180   :  { %v661_v11 = vrot.slane %v594_v2, 6  ;;  %v663_v13 = vrot.slane %v595_v60, 6  ;;  %v665_v59 = vrot.slane %v596_v31, 6  ;;  %v667_v14 = vrot.slane %v597_v12, 6 }
 0x181   :  { %v6276_v10 = vsel %vm655_vm2, %v6272_v5, %v657_v8  ;;  %v669_v18 = vrot.slane %v598_v33, 6  ;;  %v6278_v7 = vrot.slane %v599_v34, 6  ;;  %v660_v15 = vsel %vm655_vm2, %v657_v8, %v659_v51 }
 0x182   :  { %v662_v29 = vsel %vm655_vm2, %v659_v51, %v661_v11  ;;  %v664_v38 = vsel %vm655_vm2, %v661_v11, %v663_v13  ;;  %v666_v27 = vsel %vm655_vm2, %v663_v13, %v665_v59  ;;  %v668_v6 = vsel %vm655_vm2, %v665_v59, %v667_v14 }
 0x183   :  { %v670_v19 = vsel %vm655_vm2, %v667_v14, %v669_v18  ;;  %v672_v20 = vrot.slane %v600_v43, 6  ;;  %v674_v21 = vrot.slane %v601_v44, 6  ;;  %v676_v22 = vrot.slane %v602_v46, 6 }
 0x184   :  { %v678_v24 = vrot.slane %v603_v47, 6  ;;  %v680_v25 = vrot.slane %v604_v17, 6  ;;  %v682_v26 = vrot.slane %v605_v9, 6  ;;  %v684_v52 = vrot.slane %v606_v16, 6 }
 0x185   :  { %v6288_v28 = vsel %vm655_vm2, %v6278_v7, %v672_v20  ;;  %v675_v35 = vsel %vm655_vm2, %v672_v20, %v674_v21  ;;  %v6291_v57 = vrot.slane %v607_v23, 6  ;;  %v677_v39 = vsel %vm655_vm2, %v674_v21, %v676_v22 }
 0x186   :  { %v679_v41 = vsel %vm655_vm2, %v676_v22, %v678_v24  ;;  %v681_v1 = vsel %vm655_vm2, %v678_v24, %v680_v25  ;;  %v683_v37 = vsel %vm655_vm2, %v680_v25, %v682_v26  ;;  %v685_v40 = vsel %vm655_vm2, %v682_v26, %v684_v52 }
 0x187   :  { %v687_v56 = vrot.slane %v608_v49, 6  ;;  %v689_v61 = vrot.slane %v609_v32, 6  ;;  %v691_v53 = vrot.slane %v610_v42, 6  ;;  %v693_v2 = vrot.slane %v611_v30, 6 }
 0x188   :  { %v695_v60 = vrot.slane %v612_v50, 6  ;;  %v697_v31 = vrot.slane %v613_v58, 6  ;;  %v6298_v12 = vrot.slane %v614_v36, 6  ;;  %v6306_v44 = vrot.slane %v615_v54, 6 }
 0x189   :  { %v6302_v33 = vsel %vm655_vm2, %v6291_v57, %v687_v56  ;;  %v690_v34 = vsel %vm655_vm2, %v687_v56, %v689_v61  ;;  %v692_v43 = vsel %vm655_vm2, %v689_v61, %v691_v53  ;;  %v694_v46 = vsel %vm655_vm2, %v691_v53, %v693_v2 }
 0x18a   :  { %v696_v47 = vsel %vm655_vm2, %v693_v2, %v695_v60  ;;  %v698_v17 = vsel %vm655_vm2, %v695_v60, %v697_v31  ;;  %v700_v9 = vsel %vm655_vm2, %v697_v31, %v6298_v12  ;;  %v702_v16 = vrot.slane %v616_v62, 6  ;;  %v5631_v60 = vld [vmem:[#allocation2 + $0x100] ss:$8 sps:$4 sm:$0xff]  }
 0x18b   :  { %v704_v23 = vrot.slane %v617_v4, 6  ;;  %v752_v49 = vsel %vm655_vm2, 0.0, %v6272_v5  ;;  %v753_v32 = vsel %vm655_vm2, 0.0, %v6278_v7  ;;  %v754_v42 = vsel %vm655_vm2, 0.0, %v6291_v57 }
 0x18c   :  { %v755_v30 = vsel %vm655_vm2, 0.0, %v6306_v44  ;;  %v756_v50 = vsel %vm655_vm2, %v669_v18, 0.0  ;;  %v6324_v58 = vsel %vm655_vm2, %v6306_v44, %v702_v16  ;;  %v757_v62 = vsel %vm655_vm2, %v684_v52, 0.0 }
 0x18d   :  { %v705_v36 = vsel %vm655_vm2, %v702_v16, %v704_v23  ;;  %v707_v54 = vsel %vm655_vm2, %v704_v23, %v6183_v45  ;;  %v6331_v4 = vpack.c.bf16 %v6276_v10, %v752_v49  ;;  %v6333_v8 = vpack.c.bf16 %v662_v29, %v660_v15 }
 0x18e   :  { %v6335_v51 = vpack.c.bf16 %v666_v27, %v664_v38  ;;  %v6337_v11 = vpack.c.bf16 %v670_v19, %v668_v6  ;;  %v6340_v13 = vpack.c.bf16 %v6288_v28, %v753_v32  ;;  %v6342_v59 = vpack.c.bf16 %v677_v39, %v675_v35 }
 0x18f   :  { %v6344_v14 = vpack.c.bf16 %v681_v1, %v679_v41  ;;  %v6346_v18 = vpack.c.bf16 %v685_v40, %v683_v37  ;;  %v6349_v45 = vpack.c.bf16 %v6302_v33, %v754_v42  ;;  %v6351_v20 = vpack.c.bf16 %v692_v43, %v690_v34 }
 0x190   :  { %v6353_v15 = vpack.c.bf16 %v696_v47, %v694_v46  ;;  %v6355_v29 = vpack.c.bf16 %v700_v9, %v698_v17  ;;  %v6358_v38 = vpack.c.bf16 %v6324_v58, %v755_v30  ;;  %v6360_v27 = vpack.c.bf16 %v707_v54, %v705_v36  ;;  %v5636_v9 = vld [vmem:[#allocation2 + $0x114] ss:$8 sps:$4 sm:$0xff]   ;;  %v5640_v47 = vld [vmem:[#allocation2 + $0x130] ss:$8 sps:$4 sm:$0xff]  }
 0x191   :  { %v6362_v6 = vpack.c.bf16 %v756_v50, %v756_v50  ;;  %v6364_v19 = vpack.c.bf16 %v757_v62, %v757_v62  ;;  %v782_v21 = vshrl.u32 %v6331_v4, 16  ;;  %v784_v22 = vshll.u32 %v6331_v4, 16 }
 0x192   :  { %v789_v24 = vshll.u32 %v6333_v8, 16  ;;  %v4907_v25 = vpack.c.bf16 %v6276_v10, %v6272_v5  ;;  %v793_v26 = vshrl.u32 %v6333_v8, 16  ;;  %v797_v35 = vshll.u32 %v6335_v51, 16 }
 0x193   :  { %v786_v52 = vrot.slane %v784_v22, 1  ;;  %v801_v39 = vshrl.u32 %v6335_v51, 16  ;;  %v805_v41 = vshll.u32 %v6337_v11, 16  ;;  %v809_v1 = vshrl.u32 %v6337_v11, 16 }
 0x194   :  { %v791_v37 = vrot.slane %v789_v24, 1  ;;  %v799_v5 = vrot.slane %v797_v35, 1  ;;  %v813_v10 = vshll.u32 %v6362_v6, 16  ;;  %v818_v40 = vshrl.u32 %v6340_v13, 16 }
 0x195   :  { %v787_v56 = vor.u32 %v786_v52, %v782_v21  ;;  %v807_v61 = vrot.slane %v805_v41, 1  ;;  %v820_v53 = vshll.u32 %v6340_v13, 16  ;;  %v825_v2 = vshll.u32 %v6342_v59, 16  ;;  %v5634_v52 = vld [vmem:[#allocation2 + $0x110] ss:$8 sps:$4 sm:$0xff]  }
 0x196   :  { %v795_v34 = vor.u32 %v793_v26, %v791_v37  ;;  %v803_v43 = vor.u32 %v801_v39, %v799_v5  ;;  %v815_v46 = vrot.slane %v813_v10, 1  ;;  %v829_v30 = vshrl.u32 %v6342_v59, 16 }
 0x197   :  { %v792_v17 = vsel %vm780_vm3, %v787_v56, %v791_v37  ;;  %v811_v16 = vor.u32 %v809_v1, %v807_v61  ;;  %v822_v23 = vrot.slane %v820_v53, 1  ;;  %v827_v49 = vrot.slane %v825_v2, 1 }
 0x198   :  { %1680 = vmatprep.mubr.bf16.mxu1 %v792_v17  ;;  %v800_v32 = vsel %vm780_vm3, %v795_v34, %v799_v5  ;;  %v808_v42 = vsel %vm780_vm3, %v803_v43, %v807_v61  ;;  %v833_v50 = vshll.u32 %v6344_v14, 16  ;;  %v841_v62 = vshll.u32 %v6346_v18, 16  ;;  %v5639_v61 = vld [vmem:[#allocation2 + $0x124] ss:$8 sps:$4 sm:$0xff]  }
 0x199   :  { %4908 = vmatmul.mubr.msk.bf16.vlgmr.msra.gmra.mrb[0].mxu1 %vm6392_vm6, %v4907_v25  ;;  %v816_v36 = vsel %vm780_vm3, %v811_v16, %v815_v46  ;;  %v823_v54 = vor.u32 %v822_v23, %v818_v40  ;;  %v831_v37 = vor.u32 %v829_v30, %v827_v49  ;;  %v837_v56 = vshrl.u32 %v6344_v14, 16 }
 0x19a   :  { %1842 = vmatpush1.bf16.msra.mxu1 %v5631_v60  ;;  %1690 = vmatprep.mubr.bf16.mxu1 %v800_v32  ;;  %v835_v5 = vrot.slane %v833_v50, 1  ;;  %v9241_v25 = vshll.u32 %v6364_v19, 16  ;;  %v843_v60 = vrot.slane %v841_v62, 1  ;;  %v845_v43 = vshrl.u32 %v6346_v18, 16 }
 0x19b   :  { %1843 = vmatprep.subr.bf16.mxu1 %v5636_v9  ;;  %v6428_v34 = vsel %vm780_vm3, %v823_v54, %v827_v49  ;;  %v5637_v49 = vld [vmem:[#allocation2 + $0x120] ss:$8 sps:$4 sm:$0xff]   ;;  %v5642_v54 = vld [vmem:[#allocation2 + $0x134] ss:$8 sps:$4 sm:$0xff]   ;;  %v1022_v23 = vrot.slane %v801_v39, 1  ;;  %v1027_v39 = vrot.slane %v805_v41, 2 }
 0x19c   :  { %v6434_v46 = vsel %vm780_vm3, %v831_v37, %v835_v5  ;;  %v839_v17 = vor.u32 %v837_v56, %v835_v5  ;;  %v847_v16 = vor.u32 %v845_v43, %v843_v60  ;;  %v851_v9 = vrot.slane %v9241_v25, 1 }
 0x19d   :  { %v758_v5 = vsel %vm655_vm2, %v6298_v12, 0.0  ;;  %v963_v12 = vrot.slane %v6333_v8, 1  ;;  %v9320_v63 = vshrl.u32 %v6351_v20, 16  ;;  %v9322_v55 = vshrl.u32 %v6353_v15, 16 }
 0x19e   :  { %1844 = vmatpush1.bf16.msra.mxu1 %v5634_v52  ;;  %v6445_v32 = vsel %vm780_vm3, %v839_v17, %v843_v60  ;;  %v6448_v37 = vsel %vm780_vm3, %v847_v16, %v851_v9  ;;  %v759_v60 = vsel %vm655_vm2, %v6185_v48, 0.0  ;;  %v6457_v17 = vpack.c.bf16 %v758_v5, %v758_v5  ;;  %v5643_v9 = vld [vmem:[#allocation2 + $0x140] ss:$8 sps:$4 sm:$0xff]   ;;  %v5648_v52 = vld [vmem:[#allocation2 + $0x154] ss:$8 sps:$4 sm:$0xff]  }
 0x19f   :  { %1845 = vmatprep.subr.bf16.mxu1 %v5639_v61  ;;  %v5645_v61 = vld [vmem:[#allocation2 + $0x144] ss:$8 sps:$4 sm:$0xff]   ;;  %v6459_v16 = vpack.c.bf16 %v759_v60, %v759_v60  ;;  %v1018_v5 = vrot.slane %v793_v26, 1  ;;  %v5646_v26 = vld [vmem:[#allocation2 + $0x150] ss:$8 sps:$4 sm:$0xff]   ;;  %v967_v60 = vrot.slane %v6337_v11, 1 }
 0x1a1   :  { %1691 = vmatmul.mubr.bf16.gmra.mrb[4].mxu1 %v6333_v8 }
 0x1a2   :  { %1700 = vmatprep.mubr.bf16.mxu1 %v808_v42  ;;  %1846 = vmatpush1.bf16.msra.mxu1 %v5637_v49  ;;  %v1015_v49 = vrot.slane %v782_v21, 1  ;;  %v1023_v21 = vrot.slane %v797_v35, 2  ;;  %v1030_v35 = vshrl.u32 %v6362_v6, 16 }
 0x1a3   :  { %1847 = vmatprep.subr.bf16.mxu1 %v5642_v54  ;;  %v1016_v54 = vrot.slane %v784_v22, 2  ;;  %v962_v22 = vrot.slane %v6331_v4, 1 }
 0x1a4   :  { %v1032_v42 = vrot.slane %v1030_v35, 1  ;;  %v974_v35 = vrot.slane %v6344_v14, 1 }
 0x1a6   :  { %1848 = vmatpush1.bf16.msra.mxu1 %v5640_v47  ;;  %v1019_v47 = vrot.slane %v789_v24, 2  ;;  %v1036_v24 = vrot.slane %v818_v40, 1  ;;  %v1039_v40 = vrot.slane %v829_v30, 1  ;;  %v1044_v30 = vrot.slane %v833_v50, 2 }
 0x1a7   :  { %1849 = vmatprep.subr.bf16.mxu1 %v5645_v61  ;;  %v1017_v61 = vor.u32 %v1016_v54, %v1015_v49  ;;  %v5651_v49 = vld [vmem:[#allocation2 + $0x164] ss:$8 sps:$4 sm:$0xff]  }
 0x1a8   :  { %v1020_v48 = vor.u32 %v1019_v47, %v1018_v5  ;;  %v6489_v5 = vsel %vm961_vm8, %v962_v22, %v963_v12  ;;  %v1024_v47 = vor.u32 %v1023_v21, %v1022_v23  ;;  %v969_v22 = vrot.slane %v6362_v6, 1 }
 0x1a9   :  { %1701 = vmatmul.mubr.bf16.gmra.mrb[8].mxu1 %v6335_v51 }
 0x1aa   :  { %1710 = vmatprep.mubr.bf16.mxu1 %v816_v36  ;;  %1850 = vmatpush1.bf16.msra.mxu1 %v5643_v9  ;;  %v6486_v54 = vsel %vm1014_vm7, %v1017_v61, %v1020_v48  ;;  %v965_v36 = vrot.slane %v6335_v51, 1  ;;  %v1026_v9 = vrot.slane %v809_v1, 1  ;;  %v1033_v61 = vrot.slane %v813_v10, 2  ;;  %v5649_v1 = vld [vmem:[#allocation2 + $0x160] ss:$8 sps:$4 sm:$0xff]  }
 0x1ab   :  { %1851 = vmatprep.subr.bf16.mxu1 %v5648_v52  ;;  %v6507_v23 = vsel %vm1014_vm7, %v1020_v48, %v1024_v47  ;;  %v6513_v25 = vsel %vm961_vm8, %v967_v60, %v969_v22  ;;  %v1037_v10 = vrot.slane %v820_v53, 2  ;;  %v1040_v48 = vrot.slane %v825_v2, 2  ;;  %v5652_v2 = vld [vmem:[#allocation2 + $0x170] ss:$8 sps:$4 sm:$0xff]  }
 0x1ac   :  { %v6499_v52 = vsel %vm961_vm8, %v963_v12, %v965_v36  ;;  %v1028_v41 = vor.u32 %v1027_v39, %v1026_v9  ;;  %v6510_v21 = vsel %vm961_vm8, %v965_v36, %v967_v60  ;;  %v5654_v12 = vld [vmem:[#allocation2 + $0x174] ss:$8 sps:$4 sm:$0xff]   ;;  %v1034_v36 = vor.u32 %v1033_v61, %v1032_v42 }
 0x1ad   :  { %v971_v9 = vrot.slane %v6340_v13, 1  ;;  %v1038_v60 = vor.u32 %v1037_v10, %v1036_v24  ;;  %v1041_v39 = vor.u32 %v1040_v48, %v1039_v40  ;;  %v1043_v53 = vrot.slane %v837_v56, 1  ;;  %v5657_v56 = vld [vmem:[#allocation2 + $0x184] ss:$8 sps:$4 sm:$0xff]  }
 0x1ae   :  { %1852 = vmatpush1.bf16.msra.mxu1 %v5646_v26  ;;  %v6522_v26 = vsel %vm1014_vm7, %v1024_v47, %v1028_v41  ;;  %v6533_v42 = vsel %vm1014_vm7, %v1028_v41, %v1034_v36  ;;  %v1047_v24 = vrot.slane %v845_v43, 1  ;;  %v976_v22 = vrot.slane %v6346_v18, 1 }
 0x1af   :  { %1853 = vmatprep.subr.bf16.mxu1 %v5651_v49  ;;  %v972_v49 = vrot.slane %v6342_v59, 1  ;;  %v6542_v61 = vsel %vm1014_vm7, %v1038_v60, %v1041_v39  ;;  %v1045_v50 = vor.u32 %v1044_v30, %v1043_v53  ;;  %v1051_v41 = vshrl.u32 %v6364_v19, 16 }
 0x1b0   :  { %v9316_v10 = vshll.u32 %v6364_v19, 16  ;;  %v978_v43 = vrot.slane %v6364_v19, 1  ;;  %v6558_v36 = vsel %vm961_vm8, %v974_v35, %v976_v22  ;;  %v9319_v30 = vshll.u32 %v6349_v45, 16 }
 0x1b1   :  { %1711 = vmatmul.mubr.bf16.gmra.mrb[12].mxu1 %v6337_v11  ;;  %v6536_v47 = vsel %vm961_vm8, %v971_v9, %v972_v49  ;;  %v1053_v60 = vrot.slane %v1051_v41, 1 }
 0x1b2   :  { %1720 = vmatprep.mubr.bf16.mxu1 %v6428_v34  ;;  %1854 = vmatpush1.bf16.msra.mxu1 %v5649_v1  ;;  %v1048_v34 = vrot.slane %v841_v62, 2  ;;  %v6548_v1 = vsel %vm961_vm8, %v972_v49, %v974_v35  ;;  %v1054_v40 = vrot.slane %v9316_v10, 2  ;;  %v9317_v62 = vshrl.u32 %v6349_v45, 16  ;;  %v5655_v49 = vld [vmem:[#allocation2 + $0x180] ss:$8 sps:$4 sm:$0xff]  }
 0x1b3   :  { %1855 = vmatprep.subr.bf16.mxu1 %v5654_v12  ;;  %v6555_v12 = vsel %vm1014_vm7, %v1041_v39, %v1045_v50  ;;  %v6563_v53 = vsel %vm961_vm8, %v976_v22, %v978_v43  ;;  %v1058_v10 = vrot.slane %v9319_v30, 2  ;;  %v1060_v39 = vrot.slane %v9320_v63, 1 }
 0x1b4   :  { %v1049_v48 = vor.u32 %v1048_v34, %v1047_v24  ;;  %v1057_v9 = vrot.slane %v9317_v62, 1  ;;  %9318 = vst [vmem:[#allocation13_spill] sm:$0xff] %v6563_v53  ;;  %v5660_v24 = vld [vmem:[#allocation2 + $0x194] ss:$8 sps:$4 sm:$0xff]   ;;  %v1055_v22 = vor.u32 %v1054_v40, %v1053_v60  ;;  %v1064_v30 = vrot.slane %v9322_v55, 1 }
 0x1b5   :  { %v9323_v53 = vshll.u32 %v6353_v15, 16  ;;  %v9246_v34 = vshrl.u32 %v6360_v27, 16  ;;  %v9325_v40 = vshrl.u32 %v6355_v29, 16  ;;  %v5658_v55 = vld [vmem:[#allocation2 + $0x190] ss:$8 sps:$4 sm:$0xff]  }
 0x1b6   :  { %1856 = vmatpush1.bf16.msra.mxu1 %v5652_v2  ;;  %v6572_v62 = vsel %vm1014_vm7, %v1045_v50, %v1049_v48  ;;  %v9321_v2 = vshll.u32 %v6351_v20, 16  ;;  %v1059_v43 = vor.u32 %v1058_v10, %v1057_v9  ;;  %v9247_v50 = vshll.u32 %v6360_v27, 16 }
 0x1b7   :  { %1857 = vmatprep.subr.bf16.mxu1 %v5657_v56  ;;  %v1065_v63 = vrot.slane %v9323_v53, 2  ;;  %v9324_v56 = vpack.c.bf16 %v6288_v28, %v6278_v7  ;;  %v1068_v9 = vrot.slane %v9325_v40, 1  ;;  %v6592_v53 = vsel %vm1014_vm7, %v1049_v48, %v1055_v22 }
 0x1b8   :  { %v1061_v41 = vrot.slane %v9321_v2, 2  ;;  %v9326_v28 = vshll.u32 %v6355_v29, 16  ;;  %v5663_v2 = vld [vmem:[#allocation2 + $0x1a4] ss:$8 sps:$4 sm:$0xff]   ;;  %v9332_v48 = vshrl.u32 %v6197_v0, 16 }
 0x1b9   :  { %4912 = vmatmul.mubr.msk.bf16.gmra.mrb[16].mxu1 %vm6392_vm6, %v9324_v56  ;;  %v1066_v7 = vor.u32 %v1065_v63, %v1064_v30  ;;  %v9330_v63 = vshrl.u32 %v6358_v38, 16 }
 0x1ba   :  { %v1062_v35 = vor.u32 %v1061_v41, %v1060_v39  ;;  %1730 = vmatprep.mubr.bf16.mxu1 %v6434_v46  ;;  %1858 = vmatpush1.bf16.msra.mxu1 %v5655_v49  ;;  %v1069_v10 = vrot.slane %v9326_v28, 2  ;;  %v1072_v46 = vshrl.u32 %v6457_v17, 16  ;;  %v9328_v49 = vshll.u32 %v6457_v17, 16 }
 0x1bb   :  { %1859 = vmatprep.subr.bf16.mxu1 %v5660_v24  ;;  %v1078_v28 = vrot.slane %v9330_v63, 1  ;;  %v1081_v39 = vrot.slane %v9246_v34, 1  ;;  %v9333_v34 = vshll.u32 %v6197_v0, 16 }
 0x1bc   :  { %v6598_v41 = vsel %vm1014_vm7, %v1059_v43, %v1062_v35  ;;  %v1075_v56 = vrot.slane %v9328_v49, 2  ;;  %v6606_v22 = vsel %vm1014_vm7, %v1062_v35, %v1066_v7  ;;  %v1070_v30 = vor.u32 %v1069_v10, %v1068_v9  ;;  %v5661_v49 = vld [vmem:[#allocation2 + $0x1a0] ss:$8 sps:$4 sm:$0xff]   ;;  %v5666_v9 = vld [vmem:[#allocation2 + $0x1b4] ss:$8 sps:$4 sm:$0xff]  }
 0x1bd   :  { %9327 = vst [vmem:[#allocation14_spill] sm:$0xff] %v6598_v41  ;;  %9329 = vst [vmem:[#allocation15_spill] sm:$0xff] %v6606_v22  ;;  %v1074_v24 = vrot.slane %v1072_v46, 1  ;;  %v9331_v43 = vshll.u32 %v6358_v38, 16  ;;  %v1082_v35 = vrot.slane %v9247_v50, 2  ;;  %v9334_v41 = vshrl.u32 %v6201_v3, 16 }
 0x1be   :  { %1860 = vmatpush1.bf16.msra.mxu1 %v5658_v55  ;;  %v6615_v40 = vsel %vm1014_vm7, %v1066_v7, %v1070_v30  ;;  %v1086_v55 = vrot.slane %v9333_v34, 2  ;;  %v1093_v34 = vshrl.u32 %v6459_v16, 16 }
 0x1bf   :  { %v1079_v60 = vrot.slane %v9331_v43, 2  ;;  %1861 = vmatprep.subr.bf16.mxu1 %v5663_v2  ;;  %v1076_v46 = vor.u32 %v1075_v56, %v1074_v24  ;;  %v1085_v43 = vrot.slane %v9332_v48, 1  ;;  %v1083_v22 = vor.u32 %v1082_v35, %v1081_v39 }
 0x1c0   :  { %v1089_v7 = vrot.slane %v9334_v41, 1  ;;  %v9335_v2 = vshll.u32 %v6201_v3, 16  ;;  %v5669_v41 = vld [vmem:[#allocation2 + $0x1c4] ss:$8 sps:$4 sm:$0xff]   ;;  %v9336_v24 = vshll.u32 %v6459_v16, 16  ;;  %v1095_v35 = vrot.slane %v1093_v34, 1 }
 0x1c1   :  { %v1080_v63 = vor.u32 %v1079_v60, %v1078_v28  ;;  %1731 = vmatmul.mubr.bf16.gmra.mrb[20].mxu1 %v6342_v59  ;;  %v6628_v50 = vsel %vm1014_vm7, %v1070_v30, %v1076_v46  ;;  %v5664_v60 = vld [vmem:[#allocation2 + $0x1b0] ss:$8 sps:$4 sm:$0xff]   ;;  %v1087_v56 = vor.u32 %v1086_v55, %v1085_v43  ;;  %v9337_v46 = vshll.u32 %v6349_v45, 16  ;;  %v5667_v55 = vld [vmem:[#allocation2 + $0x1c0] ss:$8 sps:$4 sm:$0xff]  }
 0x1c2   :  { %v1090_v10 = vrot.slane %v9335_v2, 2  ;;  %1740 = vmatprep.mubr.bf16.mxu1 %v6445_v32  ;;  %1862 = vmatpush1.bf16.msra.mxu1 %v5661_v49  ;;  %v1096_v30 = vrot.slane %v9336_v24, 2  ;;  %v1116_v32 = vrot.slane %v6331_v4, 2  ;;  %v1117_v49 = vrot.slane %v6333_v8, 2  ;;  %v5672_v2 = vld [vmem:[#allocation2 + $0x1d4] ss:$8 sps:$4 sm:$0xff]  }
 0x1c3   :  { %v6634_v39 = vsel %vm1014_vm7, %v1080_v63, %v1083_v22  ;;  %1863 = vmatprep.subr.bf16.mxu1 %v5666_v9  ;;  %v6640_v28 = vsel %vm1014_vm7, %v1083_v22, %v1087_v56  ;;  %v858_v63 = vrot.slane %v9337_v46, 1  ;;  %v1119_v9 = vrot.slane %v6335_v51, 2 }
 0x1c4   :  { %v1091_v48 = vor.u32 %v1090_v10, %v1089_v7  ;;  %v1121_v10 = vrot.slane %v6337_v11, 2  ;;  %v1097_v7 = vor.u32 %v1096_v30, %v1095_v35  ;;  %v6652_v22 = vsel %vm1115_vm9, %v1116_v32, %v1117_v49  ;;  %v5670_v35 = vld [vmem:[#allocation2 + $0x1d0] ss:$8 sps:$4 sm:$0xff]  }
 0x1c5   :  { %v1123_v4 = vrot.slane %v6362_v6, 2  ;;  %v1125_v8 = vrot.slane %v6340_v13, 2  ;;  %v6657_v34 = vsel %vm1115_vm9, %v1117_v49, %v1119_v9  ;;  %v1126_v51 = vrot.slane %v6342_v59, 2  ;;  %v5675_v49 = vld [vmem:[#allocation2 + $0x1e4] ss:$8 sps:$4 sm:$0xff]  }
 0x1c6   :  { %v6647_v43 = vsel %vm1014_vm7, %v1087_v56, %v1091_v48  ;;  %1864 = vmatpush1.bf16.msra.mxu1 %v5664_v60  ;;  %v6660_v56 = vsel %vm1115_vm9, %v1119_v9, %v1121_v10  ;;  %v1128_v11 = vrot.slane %v6344_v14, 2  ;;  %v6665_v60 = vsel %vm1014_vm7, %v1091_v48, %v1097_v7 }
 0x1c7   :  { %1865 = vmatprep.subr.bf16.mxu1 %v5669_v41  ;;  %v6668_v24 = vsel %vm1115_vm9, %v1121_v10, %v1123_v4  ;;  %v1130_v13 = vrot.slane %v6346_v18, 2  ;;  %v1132_v6 = vrot.slane %v6364_v19, 2  ;;  %v6674_v41 = vsel %vm1115_vm9, %v1125_v8, %v1126_v51 }
 0x1c8   :  { %v6677_v30 = vsel %vm1115_vm9, %v1126_v51, %v1128_v11  ;;  %v1134_v59 = vrot.slane %v6349_v45, 2  ;;  %v1135_v48 = vrot.slane %v6351_v20, 2  ;;  %v1141_v9 = vrot.slane %v6457_v17, 2 }
 0x1c9   :  { %1741 = vmatmul.mubr.bf16.gmra.mrb[24].mxu1 %v6344_v14  ;;  %v6683_v32 = vsel %vm1115_vm9, %v1128_v11, %v1130_v13  ;;  %v6686_v19 = vsel %vm1115_vm9, %v1130_v13, %v1132_v6  ;;  %v1139_v14 = vrot.slane %v6355_v29, 2  ;;  %v9248_v10 = vrot.slane %v6360_v27, 2  ;;  %v5673_v11 = vld [vmem:[#allocation2 + $0x1e0] ss:$8 sps:$4 sm:$0xff]  }
 0x1ca   :  { %1750 = vmatprep.mubr.bf16.mxu1 %v6448_v37  ;;  %1866 = vmatpush1.bf16.msra.mxu1 %v5667_v55  ;;  %v6692_v46 = vsel %vm1115_vm9, %v1134_v59, %v1135_v48  ;;  %v1143_v37 = vrot.slane %v6358_v38, 2  ;;  %v1148_v55 = vrot.slane %v6201_v3, 2  ;;  %v9338_v7 = vshrl.u32 %v6349_v45, 16  ;;  %v5678_v59 = vld [vmem:[#allocation2 + $0x1f4] ss:$8 sps:$4 sm:$0xff]  }
 0x1cb   :  { %1867 = vmatprep.subr.bf16.mxu1 %v5672_v2  ;;  %v6703_v8 = vsel %vm1115_vm9, %v1139_v14, %v1141_v9  ;;  %v1150_v51 = vrot.slane %v6459_v16, 2  ;;  %v9339_v13 = vshll.u32 %v6351_v20, 16 }
 0x1cc   :  { %v859_v4 = vor.u32 %v858_v63, %v9338_v7  ;;  %v6708_v2 = vsel %vm1115_vm9, %v1143_v37, %v9248_v10  ;;  %v5676_v37 = vld [vmem:[#allocation2 + $0x1f0] ss:$8 sps:$4 sm:$0xff]   ;;  %v9340_v7 = vshrl.u32 %v6351_v20, 16 }
 0x1cd   :  { %v863_v6 = vrot.slane %v9339_v13, 1  ;;  %v6716_v63 = vsel %vm1115_vm9, %v1148_v55, %v1150_v51  ;;  %v9342_v51 = vpack.c.bf16 %v6302_v33, %v6291_v57  ;;  %v9346_v33 = vshll.u32 %v6457_v17, 16 }
 0x1ce   :  { %1868 = vmatpush1.bf16.msra.mxu1 %v5670_v35  ;;  %v5681_v35 = vld [vmem:[#allocation2 + $0x204] ss:$8 sps:$4 sm:$0xff]  }
 0x1cf   :  { %1869 = vmatprep.subr.bf16.mxu1 %v5675_v49  ;;  %v864_v9 = vsel %vm780_vm3, %v859_v4, %v863_v6  ;;  %v867_v10 = vor.u32 %v9340_v7, %v863_v6  ;;  %v9341_v49 = vshll.u32 %v6353_v15, 16  ;;  %v9343_v4 = vshrl.u32 %v6353_v15, 16 }
 0x1d0   :  { %v9347_v7 = vshll.u32 %v6358_v38, 16 }
 0x1d1   :  { %1751 = vmatmul.mubr.bf16.gmra.mrb[28].mxu1 %v6346_v18  ;;  %v871_v13 = vrot.slane %v9341_v49, 1 }
 0x1d2   :  { %1760 = vmatprep.mubr.bf16.mxu1 %v864_v9  ;;  %1870 = vmatpush1.bf16.msra.mxu1 %v5673_v11  ;;  %v894_v49 = vrot.slane %v9347_v7, 1  ;;  %v9354_v7 = vshll.u32 %v6201_v3, 16 }
 0x1d3   :  { %1871 = vmatprep.subr.bf16.mxu1 %v5678_v59  ;;  %v872_v18 = vsel %vm780_vm3, %v867_v10, %v871_v13  ;;  %v875_v11 = vor.u32 %v9343_v4, %v871_v13  ;;  %v9344_v59 = vshll.u32 %v6355_v29, 16  ;;  %v9348_v13 = vshrl.u32 %v6358_v38, 16 }
 0x1d5   :  { %v879_v6 = vrot.slane %v9344_v59, 1  ;;  %v9350_v59 = vshrl.u32 %v6360_v27, 16 }
 0x1d6   :  { %1872 = vmatpush1.bf16.msra.mxu1 %v5676_v37  ;;  %v9345_v37 = vshrl.u32 %v6355_v29, 16 }
 0x1d7   :  { %2034 = vmatprep.subr.bf16.mxu1 %v5681_v35  ;;  %v880_v9 = vsel %vm780_vm3, %v875_v11, %v879_v6  ;;  %v887_v35 = vrot.slane %v9346_v33, 1 }
 0x1d8   :  { %v883_v57 = vor.u32 %v9345_v37, %v879_v6 }
 0x1d9   :  { %4916 = vmatmul.mubr.msk.bf16.gmra.mrb[32].mxu1 %vm6392_vm6, %v9342_v51  ;;  %v895_v51 = vor.u32 %v894_v49, %v9348_v13  ;;  %v915_v49 = vrot.slane %v9354_v7, 1 }
 0x1da   :  { %1770 = vmatprep.mubr.bf16.mxu1 %v872_v18  ;;  %v888_v10 = vsel %vm780_vm3, %v883_v57, %v887_v35  ;;  %v9349_v18 = vshll.u32 %v6360_v27, 16  ;;  %v9352_v57 = vpack.c.bf16 %v6324_v58, %v6306_v44  ;;  %v9353_v35 = vshrl.u32 %v6197_v0, 16 }
 0x1db   :  { %v9356_v58 = vshll.u32 %v6459_v16, 16 }
 0x1dc   :  { %v899_v4 = vrot.slane %v9349_v18, 1 }
 0x1dd   :  { %v923_v31 = vrot.slane %v9356_v58, 1 }
 0x1de   :  { %v900_v11 = vsel %vm780_vm3, %v895_v51, %v899_v4  ;;  %v903_v6 = vor.u32 %v9350_v59, %v899_v4  ;;  %v9355_v51 = vshrl.u32 %v6201_v3, 16  ;;  %v5679_v4 = vld [vmem:[#allocation2 + $0x200] ss:$8 sps:$4 sm:$0xff]   ;;  %v5682_v59 = vld [vmem:[#allocation2 + $0x210] ss:$8 sps:$4 sm:$0xff]  }
 0x1e0   :  { %v919_v44 = vor.u32 %v9355_v51, %v915_v49  ;;  %v992_v51 = vrot.slane %v6197_v0, 1 }
 0x1e1   :  { %1771 = vmatmul.mubr.bf16.gmra.mrb[36].mxu1 %v6351_v20 }
 0x1e2   :  { %1780 = vmatprep.mubr.bf16.mxu1 %v880_v9  ;;  %v9351_v9 = vshll.u32 %v6197_v0, 16  ;;  %v924_v18 = vsel %vm780_vm3, %v919_v44, %v923_v31 }
 0x1e4   :  { %v907_v37 = vrot.slane %v9351_v9, 1  ;;  %v5685_v9 = vld [vmem:[#allocation2 + $0x220] ss:$8 sps:$4 sm:$0xff]  }
 0x1e6   :  { %v908_v33 = vsel %vm780_vm3, %v903_v6, %v907_v37  ;;  %v5687_v6 = vld [vmem:[#allocation2 + $0x224] ss:$8 sps:$4 sm:$0xff]  }
 0x1e9   :  { %1781 = vmatmul.mubr.bf16.gmra.mrb[40].mxu1 %v6353_v15 }
 0x1ea   :  { %1790 = vmatprep.mubr.bf16.mxu1 %v888_v10  ;;  %v911_v10 = vor.u32 %v9353_v35, %v907_v37  ;;  %v5690_v37 = vld [vmem:[#allocation2 + $0x234] ss:$8 sps:$4 sm:$0xff]   ;;  %v5699_v35 = vld [vmem:[#allocation2 + $0x264] ss:$8 sps:$4 sm:$0xff]  }
 0x1ec   :  { %v916_v13 = vsel %vm780_vm3, %v911_v10, %v915_v49  ;;  %v5700_v10 = vld [vmem:[#allocation2 + $0x270] ss:$8 sps:$4 sm:$0xff]   ;;  %v989_v49 = vrot.slane %v6358_v38, 1  ;;  %v996_v38 = vrot.slane %v6459_v16, 1  ;;  %v1137_v16 = vrot.slane %v6353_v15, 2 }
 0x1f1   :  { %1791 = vmatmul.mubr.bf16.gmra.mrb[44].mxu1 %v6355_v29 }
 0x1f2   :  { %1800 = vmatprep.mubr.bf16.mxu1 %v900_v11  ;;  %v5684_v11 = vld [vmem:[#allocation2 + $0x214] ss:$8 sps:$4 sm:$0xff]  }
 0x1f9   :  { %4920 = vmatmul.mubr.msk.bf16.gmra.mrb[48].mxu1 %vm6392_vm6, %v9352_v57  ;;  %v5693_v57 = vld [vmem:[#allocation2 + $0x244] ss:$8 sps:$4 sm:$0xff]  }
 0x1fa   :  { %1810 = vmatprep.mubr.bf16.mxu1 %v908_v33  ;;  %v5696_v33 = vld [vmem:[#allocation2 + $0x254] ss:$8 sps:$4 sm:$0xff]  }
 0x201   :  { %1811 = vmatmul.mubr.bf16.gmra.mrb[52].mxu1 %v6360_v27 }
 0x202   :  { %1820 = vmatprep.mubr.bf16.mxu1 %v916_v13  ;;  %v990_v13 = vrot.slane %v6360_v27, 1 }
 0x209   :  { %1821 = vmatmul.mubr.bf16.gmra.mrb[56].mxu1 %v6197_v0 }
 0x20a   :  { %1830 = vmatprep.mubr.bf16.mxu1 %v924_v18 }
 0x211   :  { %1831 = vmatmul.mubr.bf16.gmra.mrb[60].mxu1 %v6201_v3 }
 0x212   :  { %1873 = vmatprep.mubr.bf16.mxu1 %v6486_v54  ;;  %v5688_v54 = vld [vmem:[#allocation2 + $0x230] ss:$8 sps:$4 sm:$0xff]  }
 0x219   :  { %1874 = vmatmul.mubr.bf16.vlgmr.msra.gmra.mrb[0].mxu1 %v6489_v5  ;;  %v5691_v5 = vld [vmem:[#allocation2 + $0x240] ss:$8 sps:$4 sm:$0xff]  }
 0x21a   :  { %2035 = vmatpush1.bf16.msra.mxu1 %v5679_v4  ;;  %1883 = vmatprep.mubr.bf16.mxu1 %v6507_v23  ;;  %v5694_v23 = vld [vmem:[#allocation2 + $0x250] ss:$8 sps:$4 sm:$0xff]  }
 0x21b   :  { %2036 = vmatprep.subr.bf16.mxu1 %v5684_v11 }
 0x21e   :  { %2037 = vmatpush1.bf16.msra.mxu1 %v5682_v59 }
 0x21f   :  { %2038 = vmatprep.subr.bf16.mxu1 %v5687_v6 }
 0x221   :  { %1884 = vmatmul.mubr.bf16.gmra.mrb[4].mxu1 %v6499_v52  ;;  %v5697_v52 = vld [vmem:[#allocation2 + $0x260] ss:$8 sps:$4 sm:$0xff]  }
 0x222   :  { %1893 = vmatprep.mubr.bf16.mxu1 %v6522_v26  ;;  %2039 = vmatpush1.bf16.msra.mxu1 %v5685_v9  ;;  %v5702_v26 = vld [vmem:[#allocation2 + $0x274] ss:$8 sps:$4 sm:$0xff]  }
 0x223   :  { %2040 = vmatprep.subr.bf16.mxu1 %v5690_v37 }
 0x226   :  { %2041 = vmatpush1.bf16.msra.mxu1 %v5688_v54 }
 0x227   :  { %2042 = vmatprep.subr.bf16.mxu1 %v5693_v57 }
 0x229   :  { %1894 = vmatmul.mubr.bf16.gmra.mrb[8].mxu1 %v6510_v21  ;;  %v9357_v21 = vld [vmem:[#allocation13_spill] sm:$0xff] }
 0x22a   :  { %1903 = vmatprep.mubr.bf16.mxu1 %v6533_v42  ;;  %2043 = vmatpush1.bf16.msra.mxu1 %v5691_v5  ;;  %v980_v42 = vrot.slane %v6349_v45, 1  ;;  %v987_v45 = vrot.slane %v6457_v17, 1  ;;  %v994_v17 = vrot.slane %v6201_v3, 1 }
 0x22b   :  { %2044 = vmatprep.subr.bf16.mxu1 %v5696_v33 }
 0x22c   :  { %v997_v44 = vsel %vm961_vm8, %v994_v17, %v996_v38 }
 0x22e   :  { %2045 = vmatpush1.bf16.msra.mxu1 %v5694_v23 }
 0x22f   :  { %2046 = vmatprep.subr.bf16.mxu1 %v5699_v35 }
 0x231   :  { %1904 = vmatmul.mubr.bf16.gmra.mrb[12].mxu1 %v6513_v25  ;;  %v9358_v25 = vld [vmem:[#allocation14_spill] sm:$0xff] }
 0x232   :  { %1913 = vmatprep.mubr.bf16.mxu1 %v6542_v61  ;;  %2047 = vmatpush1.bf16.msra.mxu1 %v5697_v52  ;;  %v981_v61 = vrot.slane %v6351_v20, 1  ;;  %v9360_v20 = vrot.slane %v6360_v27, 2 }
 0x233   :  { %2048 = vmatprep.subr.bf16.mxu1 %v5702_v26 }
 0x236   :  { %2049 = vmatpush1.bf16.msra.mxu1 %v5700_v10 }
 0x239   :  { %1914 = vmatmul.mubr.bf16.gmra.mrb[16].mxu1 %v6536_v47  ;;  %v982_v47 = vsel %vm961_vm8, %v980_v42, %v981_v61 }
 0x23a   :  { %1923 = vmatprep.mubr.bf16.mxu1 %v6555_v12  ;;  %v9359_v12 = vld [vmem:[#allocation15_spill] sm:$0xff] }
 0x241   :  { %1924 = vmatmul.mubr.bf16.gmra.mrb[20].mxu1 %v6548_v1  ;;  %v983_v1 = vrot.slane %v6353_v15, 1  ;;  %v1146_v15 = vrot.slane %v6197_v0, 2 }
 0x242   :  { %1933 = vmatprep.mubr.bf16.mxu1 %v6572_v62 }
 0x243   :  { %v984_v62 = vsel %vm961_vm8, %v981_v61, %v983_v1 }
 0x249   :  { %1934 = vmatmul.mubr.bf16.gmra.mrb[24].mxu1 %v6558_v36  ;;  %v985_v36 = vrot.slane %v6355_v29, 1  ;;  %v1149_v29 = vsel %vm1115_vm9, %v1146_v15, %v1148_v55 }
 0x24a   :  { %1943 = vmatprep.mubr.bf16.mxu1 %v6592_v53 }
 0x24b   :  { %v986_v53 = vsel %vm961_vm8, %v983_v1, %v985_v36  ;;  %v988_v7 = vsel %vm961_vm8, %v985_v36, %v987_v45 }
 0x251   :  { %1944 = vmatmul.mubr.bf16.gmra.mrb[28].mxu1 %v9357_v21 }
 0x252   :  { %1953 = vmatprep.mubr.bf16.mxu1 %v9358_v25 }
 0x259   :  { %1954 = vmatmul.mubr.bf16.gmra.mrb[32].mxu1 %v982_v47 }
 0x25a   :  { %1963 = vmatprep.mubr.bf16.mxu1 %v9359_v12 }
 0x261   :  { %1964 = vmatmul.mubr.bf16.gmra.mrb[36].mxu1 %v984_v62 }
 0x262   :  { %1973 = vmatprep.mubr.bf16.mxu1 %v6615_v40  ;;  %v991_v40 = vsel %vm961_vm8, %v989_v49, %v990_v13 }
 0x269   :  { %1974 = vmatmul.mubr.bf16.gmra.mrb[40].mxu1 %v986_v53 }
 0x26a   :  { %1983 = vmatprep.mubr.bf16.mxu1 %v6628_v50  ;;  %v993_v50 = vsel %vm961_vm8, %v990_v13, %v992_v51 }
 0x271   :  { %1984 = vmatmul.mubr.bf16.gmra.mrb[44].mxu1 %v988_v7 }
 0x272   :  { %1993 = vmatprep.mubr.bf16.mxu1 %v6634_v39  ;;  %v995_v39 = vsel %vm961_vm8, %v992_v51, %v994_v17 }
 0x279   :  { %1994 = vmatmul.mubr.bf16.gmra.mrb[48].mxu1 %v991_v40 }
 0x27a   :  { %2003 = vmatprep.mubr.bf16.mxu1 %v6640_v28  ;;  %v5850_v28 = vmov 0  }
 0x281   :  { %2004 = vmatmul.mubr.bf16.gmra.mrb[52].mxu1 %v993_v50 }
 0x282   :  { %2013 = vmatprep.mubr.bf16.mxu1 %v6647_v43  ;;  %v1138_v43 = vsel %vm1115_vm9, %v1135_v48, %v1137_v16 }
 0x289   :  { %2014 = vmatmul.mubr.bf16.gmra.mrb[56].mxu1 %v995_v39 }
 0x28a   :  { %2023 = vmatprep.mubr.bf16.mxu1 %v6665_v60 }
 0x291   :  { %2024 = vmatmul.mubr.bf16.gmra.mrb[60].mxu1 %v997_v44 }
 0x292   :  { %2066 = vmatprep.mubr.bf16.mxu1 %v5850_v28 }
 0x299   :  { %2067 = vmatmul.mubr.bf16.vlgmr.msra.gmra.mrb[0].mxu1 %v6652_v22  ;;  %v1140_v22 = vsel %vm1115_vm9, %v1137_v16, %v1139_v14 }
 0x29a   :  { %2076 = vmatprep.mubr.bf16.mxu1 %v5850_v28 }
 0x2a1   :  { %2077 = vmatmul.mubr.bf16.gmra.mrb[4].mxu1 %v6657_v34  ;;  %v1147_v34 = vsel %vm1115_vm9, %v9360_v20, %v1146_v15 }
 0x2a2   :  { %2086 = vmatprep.mubr.bf16.mxu1 %v5850_v28 }
 0x2a9   :  { %2087 = vmatmul.mubr.bf16.gmra.mrb[8].mxu1 %v6660_v56 }
 0x2aa   :  { %2096 = vmatprep.mubr.bf16.mxu1 %v5850_v28 }
 0x2b1   :  { %2097 = vmatmul.mubr.bf16.gmra.mrb[12].mxu1 %v6668_v24 }
 0x2b2   :  { %2106 = vmatprep.mubr.bf16.mxu1 %v5850_v28 }
 0x2b9   :  { %2107 = vmatmul.mubr.bf16.gmra.mrb[16].mxu1 %v6674_v41 }
 0x2ba   :  { %2116 = vmatprep.mubr.bf16.mxu1 %v5850_v28 }
 0x2c1   :  { %2117 = vmatmul.mubr.bf16.gmra.mrb[20].mxu1 %v6677_v30 }
 0x2c2   :  { %2126 = vmatprep.mubr.bf16.mxu1 %v5850_v28 }
 0x2c9   :  { %2127 = vmatmul.mubr.bf16.gmra.mrb[24].mxu1 %v6683_v32 }
 0x2ca   :  { %2136 = vmatprep.mubr.bf16.mxu1 %v5850_v28 }
 0x2d1   :  { %2137 = vmatmul.mubr.bf16.gmra.mrb[28].mxu1 %v6686_v19 }
 0x2d2   :  { %2146 = vmatprep.mubr.bf16.mxu1 %v5850_v28 }
 0x2d9   :  { %2147 = vmatmul.mubr.bf16.gmra.mrb[32].mxu1 %v6692_v46 }
 0x2da   :  { %2156 = vmatprep.mubr.bf16.mxu1 %v5850_v28 }
 0x2e1   :  { %2157 = vmatmul.mubr.bf16.gmra.mrb[36].mxu1 %v1138_v43 }
 0x2e2   :  { %2166 = vmatprep.mubr.bf16.mxu1 %v5850_v28 }
 0x2e9   :  { %2167 = vmatmul.mubr.bf16.gmra.mrb[40].mxu1 %v1140_v22 }
 0x2ea   :  { %2176 = vmatprep.mubr.bf16.mxu1 %v5850_v28 }
 0x2f1   :  { %2177 = vmatmul.mubr.bf16.gmra.mrb[44].mxu1 %v6703_v8 }
 0x2f2   :  { %2186 = vmatprep.mubr.bf16.mxu1 %v5850_v28 }
 0x2f9   :  { %2187 = vmatmul.mubr.bf16.gmra.mrb[48].mxu1 %v6708_v2 }
 0x2fa   :  { %2196 = vmatprep.mubr.bf16.mxu1 %v5850_v28 }
 0x301   :  { %2197 = vmatmul.mubr.bf16.gmra.mrb[52].mxu1 %v1147_v34 }
 0x302   :  { %2206 = vmatprep.mubr.bf16.mxu1 %v5850_v28 }
 0x309   :  { %2207 = vmatmul.mubr.bf16.gmra.mrb[56].mxu1 %v1149_v29 }
 0x30a   :  { %2216 = vmatprep.mubr.bf16.mxu1 %v5850_v28 }
 0x311   :  { %2217 = vmatmul.mubr.bf16.gmra.mrb[60].mxu1 %v6716_v63 }
 0x36c   :  { %v6841_v56 = vpop.f32.mrb[0].mxu1 }
 0x36d   :  { %v6843_v60 = vpop.f32.mrb[1].mxu1  ;;  %v2229_v0 = vmul.f32 %v6841_v56, %v6841_v56 }
 0x36e   :  { %v6845_v24 = vpop.f32.mrb[2].mxu1  ;;  %v2230_v30 = vmul.f32 %v6843_v60, %v6843_v60 }
 0x36f   :  { %v2231_v27 = vmul.f32 %v6845_v24, %v6845_v24  ;;  %v2293_v3 = vadd.f32 %v6845_v24, %v6841_v56  ;;  %v6853_v41 = vpop.f32.mrb[3].mxu1 }
 0x370   :  { %v2232_v48 = vmul.f32 %v6853_v41, %v6853_v41  ;;  %v2330_v32 = vadd.f32 %v6853_v41, %v6843_v60 }
 0x371   :  { %v2367_v19 = vadd.f32 %v2231_v27, %v2229_v0 }
 0x372   :  { %v2404_v14 = vadd.f32 %v2232_v48, %v2230_v30 }
 0x374   :  { %v6861_v46 = vpop.f32.mrb[4].mxu1 }
 0x375   :  { %v2233_v55 = vmul.f32 %v6861_v46, %v6861_v46  ;;  %v2294_v8 = vadd.f32 %v2293_v3, %v6861_v46  ;;  %v6866_v2 = vpop.f32.mrb[5].mxu1 }
 0x376   :  { %v2234_v63 = vmul.f32 %v6866_v2, %v6866_v2  ;;  %v2331_v58 = vadd.f32 %v2330_v32, %v6866_v2  ;;  %v6871_v31 = vpop.f32.mrb[6].mxu1 }
 0x377   :  { %v2368_v18 = vadd.f32 %v2367_v19, %v2233_v55  ;;  %v2235_v4 = vmul.f32 %v6871_v31, %v6871_v31  ;;  %v2295_v11 = vadd.f32 %v2294_v8, %v6871_v31  ;;  %v6876_v59 = vpop.f32.mrb[7].mxu1 }
 0x378   :  { %v2405_v6 = vadd.f32 %v2404_v14, %v2234_v63  ;;  %v2236_v9 = vmul.f32 %v6876_v59, %v6876_v59  ;;  %v2332_v37 = vadd.f32 %v2331_v58, %v6876_v59 }
 0x379   :  { %v2369_v54 = vadd.f32 %v2368_v18, %v2235_v4 }
 0x37a   :  { %v2406_v57 = vadd.f32 %v2405_v6, %v2236_v9 }
 0x37c   :  { %v6881_v5 = vpop.f32.mrb[8].mxu1 }
 0x37d   :  { %v2237_v33 = vmul.f32 %v6881_v5, %v6881_v5  ;;  %v2296_v23 = vadd.f32 %v2295_v11, %v6881_v5  ;;  %v6886_v35 = vpop.f32.mrb[9].mxu1 }
 0x37e   :  { %v2238_v52 = vmul.f32 %v6886_v35, %v6886_v35  ;;  %v2333_v26 = vadd.f32 %v2332_v37, %v6886_v35  ;;  %v6891_v10 = vpop.f32.mrb[10].mxu1 }
 0x37f   :  { %v2370_v21 = vadd.f32 %v2369_v54, %v2237_v33  ;;  %v2239_v25 = vmul.f32 %v6891_v10, %v6891_v10  ;;  %v2297_v42 = vadd.f32 %v2296_v23, %v6891_v10  ;;  %v6896_v61 = vpop.f32.mrb[11].mxu1 }
 0x380   :  { %v2407_v47 = vadd.f32 %v2406_v57, %v2238_v52  ;;  %v2240_v12 = vmul.f32 %v6896_v61, %v6896_v61  ;;  %v2334_v1 = vadd.f32 %v2333_v26, %v6896_v61 }
 0x381   :  { %v2371_v62 = vadd.f32 %v2370_v21, %v2239_v25 }
 0x382   :  { %v2408_v36 = vadd.f32 %v2407_v47, %v2240_v12 }
 0x384   :  { %v6901_v53 = vpop.f32.mrb[12].mxu1 }
 0x385   :  { %v2241_v45 = vmul.f32 %v6901_v53, %v6901_v53  ;;  %v2298_v7 = vadd.f32 %v2297_v42, %v6901_v53  ;;  %v6906_v49 = vpop.f32.mrb[13].mxu1 }
 0x386   :  { %v2242_v13 = vmul.f32 %v6906_v49, %v6906_v49  ;;  %v2335_v40 = vadd.f32 %v2334_v1, %v6906_v49  ;;  %v6911_v51 = vpop.f32.mrb[14].mxu1 }
 0x387   :  { %v2372_v50 = vadd.f32 %v2371_v62, %v2241_v45  ;;  %v2243_v17 = vmul.f32 %v6911_v51, %v6911_v51  ;;  %v2299_v39 = vadd.f32 %v2298_v7, %v6911_v51  ;;  %v6916_v38 = vpop.f32.mrb[15].mxu1 }
 0x388   :  { %v2409_v44 = vadd.f32 %v2408_v36, %v2242_v13  ;;  %v2244_v28 = vmul.f32 %v6916_v38, %v6916_v38  ;;  %v2336_v16 = vadd.f32 %v2335_v40, %v6916_v38 }
 0x389   :  { %v2373_v43 = vadd.f32 %v2372_v50, %v2243_v17 }
 0x38a   :  { %v2410_v22 = vadd.f32 %v2409_v44, %v2244_v28 }
 0x38c   :  { %v6921_v15 = vpop.f32.mrb[16].mxu1 }
 0x38d   :  { %v2245_v20 = vmul.f32 %v6921_v15, %v6921_v15  ;;  %v2300_v34 = vadd.f32 %v2299_v39, %v6921_v15  ;;  %v6926_v29 = vpop.f32.mrb[17].mxu1 }
 0x38e   :  { %v2246_v0 = vmul.f32 %v6926_v29, %v6926_v29  ;;  %v2337_v27 = vadd.f32 %v2336_v16, %v6926_v29  ;;  %v6931_v3 = vpop.f32.mrb[18].mxu1 }
 0x38f   :  { %v2374_v30 = vadd.f32 %v2373_v43, %v2245_v20  ;;  %v2247_v48 = vmul.f32 %v6931_v3, %v6931_v3  ;;  %v2301_v32 = vadd.f32 %v2300_v34, %v6931_v3  ;;  %v6936_v19 = vpop.f32.mrb[19].mxu1 }
 0x390   :  { %v2411_v14 = vadd.f32 %v2410_v22, %v2246_v0  ;;  %v2248_v55 = vmul.f32 %v6936_v19, %v6936_v19  ;;  %v2338_v8 = vadd.f32 %v2337_v27, %v6936_v19 }
 0x391   :  { %v2375_v63 = vadd.f32 %v2374_v30, %v2247_v48 }
 0x392   :  { %v2412_v58 = vadd.f32 %v2411_v14, %v2248_v55 }
 0x394   :  { %v6941_v18 = vpop.f32.mrb[20].mxu1 }
 0x395   :  { %v2249_v4 = vmul.f32 %v6941_v18, %v6941_v18  ;;  %v2302_v11 = vadd.f32 %v2301_v32, %v6941_v18  ;;  %v6946_v6 = vpop.f32.mrb[21].mxu1 }
 0x396   :  { %v2250_v9 = vmul.f32 %v6946_v6, %v6946_v6  ;;  %v2339_v37 = vadd.f32 %v2338_v8, %v6946_v6  ;;  %v6951_v54 = vpop.f32.mrb[22].mxu1 }
 0x397   :  { %v2376_v57 = vadd.f32 %v2375_v63, %v2249_v4  ;;  %v2251_v33 = vmul.f32 %v6951_v54, %v6951_v54  ;;  %v2303_v23 = vadd.f32 %v2302_v11, %v6951_v54  ;;  %v6956_v52 = vpop.f32.mrb[23].mxu1 }
 0x398   :  { %v2413_v26 = vadd.f32 %v2412_v58, %v2250_v9  ;;  %v2252_v21 = vmul.f32 %v6956_v52, %v6956_v52  ;;  %v2340_v25 = vadd.f32 %v2339_v37, %v6956_v52 }
 0x399   :  { %v2377_v42 = vadd.f32 %v2376_v57, %v2251_v33 }
 0x39a   :  { %v2414_v47 = vadd.f32 %v2413_v26, %v2252_v21 }
 0x39c   :  { %v6961_v12 = vpop.f32.mrb[24].mxu1 }
 0x39d   :  { %v2253_v1 = vmul.f32 %v6961_v12, %v6961_v12  ;;  %v2304_v62 = vadd.f32 %v2303_v23, %v6961_v12  ;;  %v6966_v36 = vpop.f32.mrb[25].mxu1 }
 0x39e   :  { %v2254_v45 = vmul.f32 %v6966_v36, %v6966_v36  ;;  %v2341_v7 = vadd.f32 %v2340_v25, %v6966_v36  ;;  %v6971_v13 = vpop.f32.mrb[26].mxu1 }
 0x39f   :  { %v2378_v40 = vadd.f32 %v2377_v42, %v2253_v1  ;;  %v2255_v50 = vmul.f32 %v6971_v13, %v6971_v13  ;;  %v2305_v17 = vadd.f32 %v2304_v62, %v6971_v13  ;;  %v6976_v39 = vpop.f32.mrb[27].mxu1 }
 0x3a0   :  { %v2415_v44 = vadd.f32 %v2414_v47, %v2254_v45  ;;  %v2256_v28 = vmul.f32 %v6976_v39, %v6976_v39  ;;  %v2342_v16 = vadd.f32 %v2341_v7, %v6976_v39 }
 0x3a1   :  { %v2379_v43 = vadd.f32 %v2378_v40, %v2255_v50 }
 0x3a2   :  { %v2416_v22 = vadd.f32 %v2415_v44, %v2256_v28 }
 0x3a4   :  { %v6981_v20 = vpop.f32.mrb[28].mxu1 }
 0x3a5   :  { %v2257_v34 = vmul.f32 %v6981_v20, %v6981_v20  ;;  %v2306_v0 = vadd.f32 %v2305_v17, %v6981_v20  ;;  %v6986_v27 = vpop.f32.mrb[29].mxu1 }
 0x3a6   :  { %v2258_v30 = vmul.f32 %v6986_v27, %v6986_v27  ;;  %v2343_v48 = vadd.f32 %v2342_v16, %v6986_v27  ;;  %v6991_v32 = vpop.f32.mrb[30].mxu1 }
 0x3a7   :  { %v2380_v14 = vadd.f32 %v2379_v43, %v2257_v34  ;;  %v2259_v55 = vmul.f32 %v6991_v32, %v6991_v32  ;;  %v2307_v8 = vadd.f32 %v2306_v0, %v6991_v32  ;;  %v6996_v63 = vpop.f32.mrb[31].mxu1 }
 0x3a8   :  { %v2417_v58 = vadd.f32 %v2416_v22, %v2258_v30  ;;  %v2260_v4 = vmul.f32 %v6996_v63, %v6996_v63  ;;  %v2344_v11 = vadd.f32 %v2343_v48, %v6996_v63 }
 0x3a9   :  { %v2381_v9 = vadd.f32 %v2380_v14, %v2259_v55 }
 0x3aa   :  { %v2418_v37 = vadd.f32 %v2417_v58, %v2260_v4 }
 0x3ac   :  { %v7001_v57 = vpop.f32.mrb[32].mxu1 }
 0x3ad   :  { %v2261_v33 = vmul.f32 %v7001_v57, %v7001_v57  ;;  %v2308_v23 = vadd.f32 %v2307_v8, %v7001_v57  ;;  %v7006_v26 = vpop.f32.mrb[33].mxu1 }
 0x3ae   :  { %v2262_v21 = vmul.f32 %v7006_v26, %v7006_v26  ;;  %v2345_v25 = vadd.f32 %v2344_v11, %v7006_v26  ;;  %v7011_v42 = vpop.f32.mrb[34].mxu1 }
 0x3af   :  { %v2382_v47 = vadd.f32 %v2381_v9, %v2261_v33  ;;  %v2263_v1 = vmul.f32 %v7011_v42, %v7011_v42  ;;  %v2309_v62 = vadd.f32 %v2308_v23, %v7011_v42  ;;  %v7016_v45 = vpop.f32.mrb[35].mxu1 }
 0x3b0   :  { %v2419_v7 = vadd.f32 %v2418_v37, %v2262_v21  ;;  %v2264_v40 = vmul.f32 %v7016_v45, %v7016_v45  ;;  %v2346_v50 = vadd.f32 %v2345_v25, %v7016_v45 }
 0x3b1   :  { %v2383_v17 = vadd.f32 %v2382_v47, %v2263_v1 }
 0x3b2   :  { %v2420_v44 = vadd.f32 %v2419_v7, %v2264_v40 }
 0x3b4   :  { %v7021_v28 = vpop.f32.mrb[36].mxu1 }
 0x3b5   :  { %9361 = vst [vmem:[#allocation13_spill] sm:$0xff] %v7021_v28  ;;  %v2265_v16 = vmul.f32 %v7021_v28, %v7021_v28  ;;  %v2310_v43 = vadd.f32 %v2309_v62, %v7021_v28  ;;  %v7026_v22 = vpop.f32.mrb[37].mxu1 }
 0x3b6   :  { %9362 = vst [vmem:[#allocation14_spill] sm:$0xff] %v7026_v22  ;;  %v2266_v34 = vmul.f32 %v7026_v22, %v7026_v22  ;;  %v2347_v0 = vadd.f32 %v2346_v50, %v7026_v22  ;;  %v7031_v30 = vpop.f32.mrb[38].mxu1 }
 0x3b7   :  { %9363 = vst [vmem:[#allocation15_spill] sm:$0xff] %v7031_v30  ;;  %v2384_v48 = vadd.f32 %v2383_v17, %v2265_v16  ;;  %v2267_v14 = vmul.f32 %v7031_v30, %v7031_v30  ;;  %v2311_v55 = vadd.f32 %v2310_v43, %v7031_v30  ;;  %v7036_v8 = vpop.f32.mrb[39].mxu1 }
 0x3b8   :  { %9364 = vst [vmem:[#allocation16_spill] sm:$0xff] %v7036_v8  ;;  %v2421_v58 = vadd.f32 %v2420_v44, %v2266_v34  ;;  %v2268_v4 = vmul.f32 %v7036_v8, %v7036_v8  ;;  %v2348_v11 = vadd.f32 %v2347_v0, %v7036_v8 }
 0x3b9   :  { %v2385_v9 = vadd.f32 %v2384_v48, %v2267_v14  ;;  %v5703_v48 = vld [vmem:[#allocation5 + $0x40] sm:$0xff]  }
 0x3ba   :  { %v2422_v37 = vadd.f32 %v2421_v58, %v2268_v4  ;;  %5027 = vmatprep.subr.bf16.mxu0 %v5703_v48  ;;  %v5706_v48 = vld [vmem:[#allocation5 + $0x8] sm:$0xff]  }
 0x3bc   :  { %v7041_v33 = vpop.f32.mrb[40].mxu1 }
 0x3bd   :  { %9365 = vst [vmem:[#allocation17_spill] sm:$0xff] %v7041_v33  ;;  %v2269_v23 = vmul.f32 %v7041_v33, %v7041_v33  ;;  %v2312_v21 = vadd.f32 %v2311_v55, %v7041_v33  ;;  %v7046_v25 = vpop.f32.mrb[41].mxu1  ;;  %v5704_v55 = vld [vmem:[#allocation5] sm:$0xff]  }
 0x3be   :  { %9366 = vst [vmem:[#allocation18_spill] sm:$0xff] %v7046_v25  ;;  %v2270_v47 = vmul.f32 %v7046_v25, %v7046_v25  ;;  %v2349_v1 = vadd.f32 %v2348_v11, %v7046_v25  ;;  %v7051_v62 = vpop.f32.mrb[42].mxu1  ;;  %5028 = vmatpush3.bf16.msra.mxu0 %v5704_v55 }
 0x3bf   :  { %9367 = vst [vmem:[#allocation19_spill] sm:$0xff] %v7051_v62  ;;  %v2386_v7 = vadd.f32 %v2385_v9, %v2269_v23  ;;  %v2271_v40 = vmul.f32 %v7051_v62, %v7051_v62  ;;  %v2313_v50 = vadd.f32 %v2312_v21, %v7051_v62  ;;  %v7056_v17 = vpop.f32.mrb[43].mxu1 }
 0x3c0   :  { %9368 = vst [vmem:[#allocation20_spill] sm:$0xff] %v7056_v17  ;;  %v2423_v44 = vadd.f32 %v2422_v37, %v2270_v47  ;;  %v2272_v16 = vmul.f32 %v7056_v17, %v7056_v17  ;;  %v2350_v43 = vadd.f32 %v2349_v1, %v7056_v17 }
 0x3c1   :  { %v2387_v34 = vadd.f32 %v2386_v7, %v2271_v40  ;;  %v5705_v40 = vld [vmem:[#allocation5 + $0x48] sm:$0xff]  }
 0x3c2   :  { %v2424_v0 = vadd.f32 %v2423_v44, %v2272_v16  ;;  %5029 = vmatprep.subr.bf16.mxu0 %v5705_v40 }
 0x3c3   :  { %5030 = vmatpush3.bf16.msra.mxu0 %v5706_v48 }
 0x3c4   :  { %v7061_v14 = vpop.f32.mrb[44].mxu1 }
 0x3c5   :  { %9369 = vst [vmem:[#allocation21_spill] sm:$0xff] %v7061_v14  ;;  %v2273_v58 = vmul.f32 %v7061_v14, %v7061_v14  ;;  %v2314_v4 = vadd.f32 %v2313_v50, %v7061_v14  ;;  %v7066_v11 = vpop.f32.mrb[45].mxu1 }
 0x3c6   :  { %9370 = vst [vmem:[#allocation22_spill] sm:$0xff] %v7066_v11  ;;  %v2274_v9 = vmul.f32 %v7066_v11, %v7066_v11  ;;  %v2351_v37 = vadd.f32 %v2350_v43, %v7066_v11  ;;  %v7071_v23 = vpop.f32.mrb[46].mxu1 }
 0x3c7   :  { %9371 = vst [vmem:[#allocation23_spill] sm:$0xff] %v7071_v23  ;;  %v2388_v21 = vadd.f32 %v2387_v34, %v2273_v58  ;;  %v2275_v47 = vmul.f32 %v7071_v23, %v7071_v23  ;;  %v2315_v1 = vadd.f32 %v2314_v4, %v7071_v23  ;;  %v7076_v7 = vpop.f32.mrb[47].mxu1  ;;  %v5707_v34 = vld [vmem:[#allocation5 + $0x50] sm:$0xff]  }
 0x3c8   :  { %9372 = vst [vmem:[#allocation24_spill] sm:$0xff] %v7076_v7  ;;  %v2425_v50 = vadd.f32 %v2424_v0, %v2274_v9  ;;  %v2276_v44 = vmul.f32 %v7076_v7, %v7076_v7  ;;  %v2352_v16 = vadd.f32 %v2351_v37, %v7076_v7  ;;  %v5708_v58 = vld [vmem:[#allocation5 + $0x10] sm:$0xff]   ;;  %5031 = vmatprep.subr.bf16.mxu0 %v5707_v34  ;;  %v5710_v7 = vld [vmem:[#allocation5 + $0x18] sm:$0xff]  }
 0x3c9   :  { %v2389_v43 = vadd.f32 %v2388_v21, %v2275_v47  ;;  %5032 = vmatpush3.bf16.msra.mxu0 %v5708_v58 }
 0x3ca   :  { %v2426_v11 = vadd.f32 %v2425_v50, %v2276_v44 }
 0x3cc   :  { %v7081_v55 = vpop.f32.mrb[48].mxu1 }
 0x3cd   :  { %9373 = vst [vmem:[#allocation25_spill] sm:$0xff] %v7081_v55  ;;  %v2277_v4 = vmul.f32 %v7081_v55, %v7081_v55  ;;  %v2316_v23 = vadd.f32 %v2315_v1, %v7081_v55  ;;  %v7086_v0 = vpop.f32.mrb[49].mxu1  ;;  %v5709_v1 = vld [vmem:[#allocation5 + $0x58] sm:$0xff]  }
 0x3ce   :  { %9374 = vst [vmem:[#allocation26_spill] sm:$0xff] %v7086_v0  ;;  %v2278_v9 = vmul.f32 %v7086_v0, %v7086_v0  ;;  %v2353_v37 = vadd.f32 %v2352_v16, %v7086_v0  ;;  %v7091_v21 = vpop.f32.mrb[50].mxu1  ;;  %5033 = vmatprep.subr.bf16.mxu0 %v5709_v1 }
 0x3cf   :  { %9375 = vst [vmem:[#allocation27_spill] sm:$0xff] %v7091_v21  ;;  %v2390_v47 = vadd.f32 %v2389_v43, %v2277_v4  ;;  %v2279_v40 = vmul.f32 %v7091_v21, %v7091_v21  ;;  %v2317_v50 = vadd.f32 %v2316_v23, %v7091_v21  ;;  %v7096_v44 = vpop.f32.mrb[51].mxu1  ;;  %5034 = vmatpush3.bf16.msra.mxu0 %v5710_v7  ;;  %v5711_v43 = vld [vmem:[#allocation5 + $0x60] sm:$0xff]  }
 0x3d0   :  { %9376 = vst [vmem:[#allocation28_spill] sm:$0xff] %v7096_v44  ;;  %v2427_v48 = vadd.f32 %v2426_v11, %v2278_v9  ;;  %v2280_v34 = vmul.f32 %v7096_v44, %v7096_v44  ;;  %v2354_v55 = vadd.f32 %v2353_v37, %v7096_v44  ;;  %v5712_v4 = vld [vmem:[#allocation5 + $0x20] sm:$0xff]   ;;  %5035 = vmatprep.subr.bf16.mxu0 %v5711_v43 }
 0x3d1   :  { %v2391_v16 = vadd.f32 %v2390_v47, %v2279_v40 }
 0x3d2   :  { %v2428_v0 = vadd.f32 %v2427_v48, %v2280_v34  ;;  %v5714_v34 = vld [vmem:[#allocation5 + $0x28] sm:$0xff]  }
 0x3d3   :  { %5036 = vmatpush3.bf16.msra.mxu0 %v5712_v4 }
 0x3d4   :  { %v7101_v58 = vpop.f32.mrb[52].mxu1 }
 0x3d5   :  { %9377 = vst [vmem:[#allocation29_spill] sm:$0xff] %v7101_v58  ;;  %v2281_v23 = vmul.f32 %v7101_v58, %v7101_v58  ;;  %v2318_v21 = vadd.f32 %v2317_v50, %v7101_v58  ;;  %v7106_v11 = vpop.f32.mrb[53].mxu1  ;;  %v5713_v50 = vld [vmem:[#allocation5 + $0x68] sm:$0xff]   ;;  %v5715_v58 = vld [vmem:[#allocation5 + $0x70] sm:$0xff]  }
 0x3d6   :  { %9378 = vst [vmem:[#allocation30_spill] sm:$0xff] %v7106_v11  ;;  %v2282_v9 = vmul.f32 %v7106_v11, %v7106_v11  ;;  %v2355_v37 = vadd.f32 %v2354_v55, %v7106_v11  ;;  %v7111_v47 = vpop.f32.mrb[54].mxu1  ;;  %5037 = vmatprep.subr.bf16.mxu0 %v5713_v50 }
 0x3d7   :  { %9379 = vst [vmem:[#allocation31_spill] sm:$0xff] %v7111_v47  ;;  %v2392_v7 = vadd.f32 %v2391_v16, %v2281_v23  ;;  %v2283_v40 = vmul.f32 %v7111_v47, %v7111_v47  ;;  %v2319_v1 = vadd.f32 %v2318_v21, %v7111_v47  ;;  %v7116_v48 = vpop.f32.mrb[55].mxu1  ;;  %5038 = vmatpush3.bf16.msra.mxu0 %v5714_v34  ;;  %v5716_v16 = vld [vmem:[#allocation5 + $0x30] sm:$0xff]   ;;  %v5717_v23 = vld [vmem:[#allocation5 + $0x78] sm:$0xff]  }
 0x3d8   :  { %9380 = vst [vmem:[#allocation32_spill] sm:$0xff] %v7116_v48  ;;  %v2429_v43 = vadd.f32 %v2428_v0, %v2282_v9  ;;  %v2284_v44 = vmul.f32 %v7116_v48, %v7116_v48  ;;  %v2356_v55 = vadd.f32 %v2355_v37, %v7116_v48  ;;  %5039 = vmatprep.subr.bf16.mxu0 %v5715_v58 }
 0x3d9   :  { %v2393_v11 = vadd.f32 %v2392_v7, %v2283_v40 }
 0x3da   :  { %v2430_v4 = vadd.f32 %v2429_v43, %v2284_v44  ;;  %v5718_v44 = vld [vmem:[#allocation5 + $0x38] sm:$0xff]  }
 0x3db   :  { %5040 = vmatpush3.bf16.msra.mxu0 %v5716_v16 }
 0x3dc   :  { %v7121_v14 = vpop.f32.mrb[56].mxu1  ;;  %5041 = vmatprep.subr.bf16.mxu0 %v5717_v23 }
 0x3dd   :  { %9381 = vst [vmem:[#allocation33_spill] sm:$0xff] %v7121_v14  ;;  %v2285_v21 = vmul.f32 %v7121_v14, %v7121_v14  ;;  %v2320_v47 = vadd.f32 %v2319_v1, %v7121_v14  ;;  %v7126_v0 = vpop.f32.mrb[57].mxu1  ;;  %v5719_v1 = vld [vmem:[#allocation5 + $0xc0] sm:$0xff]  }
 0x3de   :  { %9382 = vst [vmem:[#allocation34_spill] sm:$0xff] %v7126_v0  ;;  %v2286_v9 = vmul.f32 %v7126_v0, %v7126_v0  ;;  %v2357_v37 = vadd.f32 %v2356_v55, %v7126_v0  ;;  %v7131_v7 = vpop.f32.mrb[58].mxu1 }
 0x3df   :  { %9383 = vst [vmem:[#allocation35_spill] sm:$0xff] %v7131_v7  ;;  %v2394_v58 = vadd.f32 %v2393_v11, %v2285_v21  ;;  %v2287_v40 = vmul.f32 %v7131_v7, %v7131_v7  ;;  %v2321_v50 = vadd.f32 %v2320_v47, %v7131_v7  ;;  %v7136_v34 = vpop.f32.mrb[59].mxu1  ;;  %5042 = vmatpush3.bf16.msra.mxu0 %v5718_v44 }
 0x3e0   :  { %9384 = vst [vmem:[#allocation36_spill] sm:$0xff] %v7136_v34  ;;  %v2431_v43 = vadd.f32 %v2430_v4, %v2286_v9  ;;  %v2288_v14 = vmul.f32 %v7136_v34, %v7136_v34  ;;  %v2358_v55 = vadd.f32 %v2357_v37, %v7136_v34  ;;  %5139 = vmatprep.subr.bf16.mxu0 %v5719_v1 }
 0x3e1   :  { %v2395_v0 = vadd.f32 %v2394_v58, %v2287_v40 }
 0x3e2   :  { %v2432_v48 = vadd.f32 %v2431_v43, %v2288_v14 }
 0x3e4   :  { %v7141_v11 = vpop.f32.mrb[60].mxu1 }
 0x3e5   :  { %9385 = vst [vmem:[#allocation37_spill] sm:$0xff] %v7141_v11  ;;  %v2289_v16 = vmul.f32 %v7141_v11, %v7141_v11  ;;  %v2322_v47 = vadd.f32 %v2321_v50, %v7141_v11  ;;  %v7146_v21 = vpop.f32.mrb[61].mxu1 }
 0x3e6   :  { %9386 = vst [vmem:[#allocation38_spill] sm:$0xff] %v7146_v21  ;;  %v2290_v4 = vmul.f32 %v7146_v21, %v7146_v21  ;;  %v2359_v23 = vadd.f32 %v2358_v55, %v7146_v21  ;;  %v7151_v9 = vpop.f32.mrb[62].mxu1 }
 0x3e7   :  { %9387 = vst [vmem:[#allocation39_spill] sm:$0xff] %v7151_v9  ;;  %v2396_v37 = vadd.f32 %v2395_v0, %v2289_v16  ;;  %v2291_v14 = vmul.f32 %v7151_v9, %v7151_v9  ;;  %v2323_v44 = vadd.f32 %v2322_v47, %v7151_v9  ;;  %v2224_v58 = vpop.f32.mrb[63].mxu1 }
 0x3e8   :  { %v2433_v40 = vadd.f32 %v2432_v48, %v2290_v4  ;;  %v2292_v1 = vmul.f32 %v2224_v58, %v2224_v58  ;;  %v2360_v43 = vadd.f32 %v2359_v23, %v2224_v58 }
 0x3e9   :  { %v2324_v50 = vrot.slane %v2323_v44, 4  ;;  %v2397_v11 = vadd.f32 %v2396_v37, %v2291_v14 }
 0x3ea   :  { %v2361_v34 = vrot.slane %v2360_v43, 4  ;;  %v2434_v7 = vadd.f32 %v2433_v40, %v2292_v1 }
 0x3eb   :  { %v2325_v17 = vadd.f32 %v2324_v50, %v2323_v44  ;;  %v2398_v62 = vrot.slane %v2397_v11, 4 }
 0x3ec   :  { %v2362_v25 = vadd.f32 %v2361_v34, %v2360_v43  ;;  %v2435_v55 = vrot.slane %v2434_v7, 4 }
 0x3ed   :  { %v2326_v21 = vrot.slane %v2325_v17, 2  ;;  %v2399_v33 = vadd.f32 %v2398_v62, %v2397_v11 }
 0x3ee   :  { %v2363_v0 = vrot.slane %v2362_v25, 2  ;;  %v2436_v16 = vadd.f32 %v2435_v55, %v2434_v7 }
 0x3ef   :  { %v2327_v8 = vadd.f32 %v2326_v21, %v2325_v17  ;;  %v2400_v30 = vrot.slane %v2399_v33, 2 }
 0x3f0   :  { %v2364_v22 = vadd.f32 %v2363_v0, %v2362_v25  ;;  %v2437_v47 = vrot.slane %v2436_v16, 2 }
 0x3f1   :  { %v2328_v9 = vrot.slane %v2327_v8, 1  ;;  %v2401_v48 = vadd.f32 %v2400_v30, %v2399_v33  ;;  %v5851_v30 = vmov 1966171168  }
 0x3f2   :  { %v2365_v4 = vrot.slane %v2364_v22, 1  ;;  %v2438_v23 = vadd.f32 %v2437_v47, %v2436_v16  ;;  %v2457_v33 = vunpack.c.l.s4 %v5851_v30 }
 0x3f3   :  { %v2329_v28 = vadd.f32 %v2328_v9, %v2327_v8  ;;  %v2402_v37 = vrot.slane %v2401_v48, 1 }
 0x3f4   :  { %v2366_v14 = vadd.f32 %v2365_v4, %v2364_v22  ;;  %v2439_v40 = vrot.slane %v2438_v23, 1  ;;  %v2458_v8 = vunpack.c.0.s8 %v2457_v33  ;;  %v9388_v22 = vld [vmem:[#allocation11_spill] sm:$0xff] }
 0x3f5   :  { %v2403_v44 = vadd.f32 %v2402_v37, %v2401_v48  ;;  %v2441_v1 = vmul.f32 0.00390625, %v2329_v28  ;;  %v2227_v48 = vld [vmem:[%s9233_s5] sm:$0x3] }
 0x3f6   :  { %v2440_v34 = vadd.f32 %v2439_v40, %v2438_v23  ;;  %v2442_v43 = vmul.f32 0.00390625, %v2366_v14  ;;  %v2461_v0 = vsub.s32 %v2458_v8, %v9388_v22  ;;  %v2479_v23 = vsub.s32 1, %v9388_v22  ;;  %v9389_v14 = vld [vmem:[#allocation12_spill] sm:$0xff]  ;;  %v9390_v8 = vld [vmem:[#allocation13_spill] sm:$0xff] }
 0x3f7   :  { %v2443_v50 = vmul.f32 0.00390625, %v2403_v44  ;;  %v2445_v62 = vmul.f32 %v2441_v1, %v2441_v1 }
 0x3f8   :  { %v2444_v11 = vmul.f32 0.00390625, %v2440_v34  ;;  %v2446_v7 = vmul.f32 %v2442_v43, %v2442_v43 }
 0x3f9   :  { %v2447_v17 = vsub.f32 %v2443_v50, %v2445_v62 }
 0x3fa   :  { %v2448_v21 = vsub.f32 %v2444_v11, %v2446_v7 }
 0x3fb   :  { %v2449_v25 = vadd.f32 1e-05, %v2447_v17 }
 0x3fc   :  { %v2450_v55 = vadd.f32 1e-05, %v2448_v21 }
 0x3fd   :  { %5761 = vrsqrt.f32 %v2449_v25 }
 0x3fe   :  { %5763 = vrsqrt.f32 %v2450_v55 }
 0x407   :  { %v5762_v9 = vpop.eup %5761 }
 0x408   :  { %v5764_v16 = vpop.eup %5763 }
 0x409   :  { %v2455_v28 = vcombine.low %v5762_v9, %v5764_v16  ;;  %v9391_v9 = vld [vmem:[#allocation14_spill] sm:$0xff] }
 0x40b   :  { %v2462_v47 = vrot.slane %v2455_v28, %v2461_v0 }
 0x40d   :  { %v2469_v4 = vrot.slane %v2462_v47, %v2461_v0 }
 0x40f   :  { %v2471_v37 = vmul.f32 %v2469_v4, %v2227_v48  ;;  %v9395_v48 = vld [vmem:[#allocation18_spill] sm:$0xff] }
 0x411   :  { %v7162_v40 = vrot.slane %v2471_v37, %v9389_v14  ;;  %v7164_v44 = vrot.slane %v2471_v37, %v2479_v23 }
 0x413   :  { %v2483_v34 = vmul.f32 %v7162_v40, %v2441_v1  ;;  %v2484_v50 = vmul.f32 %v7164_v44, %v2442_v43  ;;  %v2567_v62 = vmul.f32 %v7164_v44, %v2224_v58  ;;  %v7171_v11 = vmul.f32 %v7162_v40, %v6841_v56 }
 0x414   :  { %v7175_v7 = vmul.f32 %v7164_v44, %v6843_v60  ;;  %v7179_v17 = vmul.f32 %v7162_v40, %v6845_v24  ;;  %v7183_v21 = vmul.f32 %v7164_v44, %v6853_v41  ;;  %v7187_v1 = vmul.f32 %v7162_v40, %v6861_v46 }
 0x415   :  { %v2487_v58 = vcombine.low %v2483_v34, %v2484_v50  ;;  %v7191_v56 = vmul.f32 %v7164_v44, %v6866_v2  ;;  %v7195_v60 = vmul.f32 %v7162_v40, %v6871_v31  ;;  %v7199_v24 = vmul.f32 %v7164_v44, %v6876_v59  ;;  %v9397_v34 = vld [vmem:[#allocation20_spill] sm:$0xff] }
 0x416   :  { %v7203_v41 = vmul.f32 %v7162_v40, %v6881_v5  ;;  %v7207_v46 = vmul.f32 %v7164_v44, %v6886_v35  ;;  %v7211_v2 = vmul.f32 %v7162_v40, %v6891_v10  ;;  %v7215_v31 = vmul.f32 %v7164_v44, %v6896_v61  ;;  %v2228_v10 = vld [vmem:[%s9234_s6] sm:$0x3] }
 0x417   :  { %v2494_v43 = vrot.slane %v2487_v58, %v2461_v0  ;;  %v7219_v59 = vmul.f32 %v7162_v40, %v6901_v53  ;;  %v7223_v5 = vmul.f32 %v7164_v44, %v6906_v49  ;;  %v7227_v35 = vmul.f32 %v7162_v40, %v6911_v51 }
 0x418   :  { %v7234_v61 = vmul.f32 %v7164_v44, %v6916_v38  ;;  %v7238_v53 = vmul.f32 %v7162_v40, %v6921_v15  ;;  %v7242_v49 = vmul.f32 %v7164_v44, %v6926_v29  ;;  %v7246_v51 = vmul.f32 %v7162_v40, %v6931_v3 }
 0x419   :  { %v2501_v25 = vrot.slane %v2494_v43, %v2461_v0  ;;  %v7250_v55 = vmul.f32 %v7164_v44, %v6936_v19  ;;  %v7254_v38 = vmul.f32 %v7162_v40, %v6941_v18  ;;  %v7258_v15 = vmul.f32 %v7164_v44, %v6946_v6  ;;  %v9392_v0 = vld [vmem:[#allocation15_spill] sm:$0xff]  ;;  %v9399_v43 = vld [vmem:[#allocation22_spill] sm:$0xff] }
 0x41a   :  { %v7262_v29 = vmul.f32 %v7162_v40, %v6951_v54  ;;  %v7266_v3 = vmul.f32 %v7164_v44, %v6956_v52  ;;  %v7270_v19 = vmul.f32 %v7162_v40, %v6961_v12  ;;  %v7274_v18 = vmul.f32 %v7164_v44, %v6966_v36 }
 0x41b   :  { %v2503_v30 = vsub.f32 %v2228_v10, %v2501_v25  ;;  %v7278_v6 = vmul.f32 %v7162_v40, %v6971_v13  ;;  %v7282_v54 = vmul.f32 %v7164_v44, %v6976_v39  ;;  %v7286_v52 = vmul.f32 %v7162_v40, %v6981_v20 }
 0x41c   :  { %v7290_v12 = vmul.f32 %v7164_v44, %v6986_v27  ;;  %v7294_v36 = vmul.f32 %v7162_v40, %v6991_v32  ;;  %v7298_v13 = vmul.f32 %v7164_v44, %v6996_v63  ;;  %v7302_v39 = vmul.f32 %v7162_v40, %v7001_v57 }
 0x41d   :  { %v7305_v33 = vrot.slane %v2503_v30, %v9389_v14  ;;  %v7307_v20 = vrot.slane %v2503_v30, %v2479_v23  ;;  %v7311_v27 = vmul.f32 %v7164_v44, %v7006_v26  ;;  %v7315_v32 = vmul.f32 %v7162_v40, %v7011_v42  ;;  %v9393_v42 = vld [vmem:[#allocation16_spill] sm:$0xff]  ;;  %v9396_v23 = vld [vmem:[#allocation19_spill] sm:$0xff]  ;;  %v9412_v14 = vld [vmem:[#allocation30_spill] sm:$0xff] }
 0x41e   :  { %v7319_v63 = vmul.f32 %v7164_v44, %v7016_v45  ;;  %v7323_v57 = vmul.f32 %v7162_v40, %v9390_v8  ;;  %v7327_v22 = vmul.f32 %v7164_v44, %v9391_v9  ;;  %v7331_v26 = vmul.f32 %v7162_v40, %v9392_v0  ;;  %v9394_v45 = vld [vmem:[#allocation17_spill] sm:$0xff]  ;;  %v9400_v30 = vld [vmem:[#allocation23_spill] sm:$0xff]  ;;  %v9401_v9 = vld [vmem:[#allocation24_spill] sm:$0xff] }
 0x41f   :  { %v2642_v16 = vadd.f32 %v7307_v20, %v2567_v62  ;;  %v7336_v28 = vmul.f32 %v7164_v44, %v9393_v42  ;;  %v7340_v47 = vmul.f32 %v7162_v40, %v9394_v45  ;;  %v7344_v4 = vmul.f32 %v7164_v44, %v9395_v48  ;;  %v9398_v62 = vld [vmem:[#allocation21_spill] sm:$0xff]  ;;  %v9404_v48 = vld [vmem:[#allocation26_spill] sm:$0xff] }
 0x420   :  { %v7348_v37 = vmul.f32 %v7162_v40, %v9396_v23  ;;  %v7352_v50 = vmul.f32 %v7164_v44, %v9397_v34  ;;  %v7356_v58 = vmul.f32 %v7162_v40, %v9398_v62  ;;  %v7360_v10 = vmul.f32 %v7164_v44, %v9399_v43  ;;  %v9402_v42 = vld [vmem:[#allocation25_spill] sm:$0xff]  ;;  %v9406_v34 = vld [vmem:[#allocation27_spill] sm:$0xff] }
 0x421   :  { %v2706_v25 = vmax.f32 %v2642_v16, 0.0  ;;  %v7364_v8 = vmul.f32 %v7162_v40, %v9400_v30  ;;  %v7368_v0 = vmul.f32 %v7164_v44, %v9401_v9  ;;  %v7372_v45 = vmul.f32 %v7162_v40, %v9402_v42  ;;  %v9408_v16 = vld [vmem:[#allocation28_spill] sm:$0xff]  ;;  %v9410_v30 = vld [vmem:[#allocation29_spill] sm:$0xff] }
 0x422   :  { %v7376_v23 = vmul.f32 %v7164_v44, %v9404_v48  ;;  %v7380_v62 = vmul.f32 %v7162_v40, %v9406_v34  ;;  %v7384_v43 = vmul.f32 %v7164_v44, %v9408_v16  ;;  %v7388_v9 = vmul.f32 %v7162_v40, %v9410_v30 }
 0x423   :  { %9403 = vst [vmem:[#allocation11_spill] sm:$0xff] %v7372_v45  ;;  %v7392_v42 = vmul.f32 %v7164_v44, %v9412_v14  ;;  %v9414_v45 = vld [vmem:[#allocation31_spill] sm:$0xff] }
 0x424   :  { %9405 = vst [vmem:[#allocation13_spill] sm:$0xff] %v7376_v23  ;;  %9407 = vst [vmem:[#allocation14_spill] sm:$0xff] %v7380_v62  ;;  %v7396_v48 = vmul.f32 %v7162_v40, %v9414_v45  ;;  %v9416_v23 = vld [vmem:[#allocation32_spill] sm:$0xff]  ;;  %v9418_v62 = vld [vmem:[#allocation33_spill] sm:$0xff] }
 0x425   :  { %9409 = vst [vmem:[#allocation15_spill] sm:$0xff] %v7384_v43  ;;  %9411 = vst [vmem:[#allocation16_spill] sm:$0xff] %v7388_v9  ;;  %v7400_v34 = vmul.f32 %v7164_v44, %v9416_v23  ;;  %v7404_v16 = vmul.f32 %v7162_v40, %v9418_v62  ;;  %v9420_v43 = vld [vmem:[#allocation34_spill] sm:$0xff]  ;;  %v9422_v9 = vld [vmem:[#allocation35_spill] sm:$0xff] }
 0x426   :  { %9413 = vst [vmem:[#allocation17_spill] sm:$0xff] %v7392_v42  ;;  %9415 = vst [vmem:[#allocation18_spill] sm:$0xff] %v7396_v48  ;;  %v7408_v30 = vmul.f32 %v7164_v44, %v9420_v43  ;;  %v7412_v14 = vmul.f32 %v7162_v40, %v9422_v9  ;;  %v9423_v42 = vld [vmem:[#allocation36_spill] sm:$0xff]  ;;  %v7418_v48 = vrot.slane %v2706_v25, 7  ;;  %v9425_v23 = vld [vmem:[#allocation37_spill] sm:$0xff]  ;;  %v7434_v9 = vadd.f32 %v7305_v33, %v7171_v11 }
 0x427   :  { %9417 = vst [vmem:[#allocation19_spill] sm:$0xff] %v7400_v34  ;;  %9419 = vst [vmem:[#allocation20_spill] sm:$0xff] %v7404_v16  ;;  %v7416_v45 = vmul.f32 %v7164_v44, %v9423_v42  ;;  %v7422_v34 = vmul.f32 %v7162_v40, %v9425_v23  ;;  %v9426_v62 = vld [vmem:[#allocation38_spill] sm:$0xff]  ;;  %v9427_v43 = vld [vmem:[#allocation39_spill] sm:$0xff]  ;;  %v7438_v25 = vadd.f32 %v7307_v20, %v7175_v7 }
 0x428   :  { %9421 = vst [vmem:[#allocation21_spill] sm:$0xff] %v7408_v30  ;;  %9424 = vst [vmem:[#allocation22_spill] sm:$0xff] %v7418_v48  ;;  %v7426_v16 = vmul.f32 %v7164_v44, %v9426_v62  ;;  %v7430_v30 = vmul.f32 %v7162_v40, %v9427_v43  ;;  %v7442_v42 = vadd.f32 %v7305_v33, %v7179_v17 }
 0x429   :  { %v7446_v44 = vadd.f32 %v7307_v20, %v7183_v21  ;;  %v7450_v40 = vadd.f32 %v7305_v33, %v7187_v1  ;;  %v7454_v11 = vadd.f32 %v7307_v20, %v7191_v56  ;;  %v7458_v7 = vadd.f32 %v7305_v33, %v7195_v60 }
 0x42a   :  { %v7462_v17 = vadd.f32 %v7307_v20, %v7199_v24  ;;  %v7466_v21 = vadd.f32 %v7305_v33, %v7203_v41  ;;  %v7470_v1 = vadd.f32 %v7307_v20, %v7207_v46  ;;  %v7474_v56 = vadd.f32 %v7305_v33, %v7211_v2  ;;  %v9435_v23 = vld [vmem:[#allocation11_spill] sm:$0xff] }
 0x42b   :  { %v7478_v60 = vadd.f32 %v7307_v20, %v7215_v31  ;;  %v7482_v24 = vadd.f32 %v7305_v33, %v7219_v59  ;;  %v7486_v41 = vadd.f32 %v7307_v20, %v7223_v5  ;;  %v7490_v46 = vadd.f32 %v7305_v33, %v7227_v35  ;;  %v9437_v62 = vld [vmem:[#allocation13_spill] sm:$0xff]  ;;  %v9439_v43 = vld [vmem:[#allocation14_spill] sm:$0xff] }
 0x42c   :  { %v7494_v2 = vadd.f32 %v7307_v20, %v7234_v61  ;;  %v7498_v31 = vadd.f32 %v7305_v33, %v7238_v53  ;;  %v7502_v59 = vadd.f32 %v7307_v20, %v7242_v49  ;;  %v7506_v5 = vadd.f32 %v7305_v33, %v7246_v51  ;;  %v9441_v48 = vld [vmem:[#allocation15_spill] sm:$0xff] }
 0x42d   :  { %v7510_v35 = vadd.f32 %v7307_v20, %v7250_v55  ;;  %v7514_v61 = vadd.f32 %v7305_v33, %v7254_v38  ;;  %v7518_v53 = vadd.f32 %v7307_v20, %v7258_v15  ;;  %v7522_v49 = vadd.f32 %v7305_v33, %v7262_v29 }
 0x42e   :  { %v7526_v51 = vadd.f32 %v7307_v20, %v7266_v3  ;;  %v7530_v55 = vadd.f32 %v7305_v33, %v7270_v19  ;;  %v7534_v38 = vadd.f32 %v7307_v20, %v7274_v18  ;;  %v7538_v15 = vadd.f32 %v7305_v33, %v7278_v6 }
 0x42f   :  { %v7542_v29 = vadd.f32 %v7307_v20, %v7282_v54  ;;  %v7546_v3 = vadd.f32 %v7305_v33, %v7286_v52  ;;  %v7550_v19 = vadd.f32 %v7307_v20, %v7290_v12  ;;  %v7554_v18 = vadd.f32 %v7305_v33, %v7294_v36 }
 0x430   :  { %v7558_v6 = vadd.f32 %v7307_v20, %v7298_v13  ;;  %v7562_v54 = vadd.f32 %v7305_v33, %v7302_v39  ;;  %v7566_v52 = vadd.f32 %v7307_v20, %v7311_v27  ;;  %v7570_v12 = vadd.f32 %v7305_v33, %v7315_v32 }
 0x431   :  { %v7574_v36 = vadd.f32 %v7307_v20, %v7319_v63  ;;  %v7578_v13 = vadd.f32 %v7305_v33, %v7323_v57  ;;  %v7582_v39 = vadd.f32 %v7307_v20, %v7327_v22  ;;  %v7586_v27 = vadd.f32 %v7305_v33, %v7331_v26 }
 0x432   :  { %v7590_v32 = vadd.f32 %v7307_v20, %v7336_v28  ;;  %v7594_v63 = vadd.f32 %v7305_v33, %v7340_v47  ;;  %v7598_v57 = vadd.f32 %v7307_v20, %v7344_v4  ;;  %v7602_v22 = vadd.f32 %v7305_v33, %v7348_v37 }
 0x433   :  { %9428 = vst [vmem:[#allocation23_spill] sm:$0xff] %v7578_v13  ;;  %9429 = vst [vmem:[#allocation24_spill] sm:$0xff] %v7582_v39  ;;  %v7606_v26 = vadd.f32 %v7307_v20, %v7352_v50  ;;  %v7610_v28 = vadd.f32 %v7305_v33, %v7356_v58  ;;  %v7614_v47 = vadd.f32 %v7307_v20, %v7360_v10 }
 0x434   :  { %9430 = vst [vmem:[#allocation25_spill] sm:$0xff] %v7586_v27  ;;  %9431 = vst [vmem:[#allocation26_spill] sm:$0xff] %v7590_v32  ;;  %v7618_v4 = vadd.f32 %v7305_v33, %v7364_v8  ;;  %v7622_v37 = vadd.f32 %v7307_v20, %v7368_v0  ;;  %v7626_v50 = vadd.f32 %v7305_v33, %v9435_v23 }
 0x435   :  { %9432 = vst [vmem:[#allocation27_spill] sm:$0xff] %v7594_v63  ;;  %v7630_v58 = vadd.f32 %v7307_v20, %v9437_v62  ;;  %v7634_v10 = vadd.f32 %v7305_v33, %v9439_v43  ;;  %v7638_v8 = vadd.f32 %v7307_v20, %v9441_v48 }
 0x436   :  { %9433 = vst [vmem:[#allocation28_spill] sm:$0xff] %v7618_v4  ;;  %9434 = vst [vmem:[#allocation29_spill] sm:$0xff] %v7622_v37  ;;  %v9443_v4 = vld [vmem:[#allocation16_spill] sm:$0xff]  ;;  %v9444_v37 = vld [vmem:[#allocation17_spill] sm:$0xff] }
 0x437   :  { %9436 = vst [vmem:[#allocation30_spill] sm:$0xff] %v7626_v50  ;;  %9438 = vst [vmem:[#allocation31_spill] sm:$0xff] %v7630_v58  ;;  %v7642_v0 = vadd.f32 %v7305_v33, %v9443_v4  ;;  %v7646_v23 = vadd.f32 %v7307_v20, %v9444_v37  ;;  %v9446_v50 = vld [vmem:[#allocation18_spill] sm:$0xff]  ;;  %v9447_v58 = vld [vmem:[#allocation19_spill] sm:$0xff]  ;;  %v7666_v37 = vadd.f32 %v7305_v33, %v7412_v14  ;;  %v9468_v14 = vmax.f32 %v7450_v40, 0.0 }
 0x438   :  { %9440 = vst [vmem:[#allocation32_spill] sm:$0xff] %v7634_v10  ;;  %9442 = vst [vmem:[#allocation33_spill] sm:$0xff] %v7638_v8  ;;  %v7650_v62 = vadd.f32 %v7305_v33, %v9446_v50  ;;  %v7654_v43 = vadd.f32 %v7307_v20, %v9447_v58  ;;  %v9448_v10 = vld [vmem:[#allocation20_spill] sm:$0xff]  ;;  %v9449_v8 = vld [vmem:[#allocation21_spill] sm:$0xff]  ;;  %v7670_v50 = vadd.f32 %v7307_v20, %v7416_v45  ;;  %v9464_v45 = vmax.f32 %v7434_v9, 0.0 }
 0x439   :  { %9445 = vst [vmem:[#allocation34_spill] sm:$0xff] %v7646_v23  ;;  %v7658_v48 = vadd.f32 %v7305_v33, %v9448_v10  ;;  %v7662_v4 = vadd.f32 %v7307_v20, %v9449_v8  ;;  %9451 = vst [vmem:[#allocation36_spill] sm:$0xff] %v7666_v37  ;;  %v7674_v58 = vadd.f32 %v7305_v33, %v7422_v34  ;;  %v9461_v13 = vmov %v7666_v37 }
 0x43a   :  { %9452 = vst [vmem:[#allocation37_spill] sm:$0xff] %v7670_v50  ;;  %v7678_v10 = vadd.f32 %v7307_v20, %v7426_v16  ;;  %v7682_v8 = vadd.f32 %v7305_v33, %v7430_v30  ;;  %v9462_v39 = vmov %v7670_v50  ;;  %v7749_v23 = vrot.slane %v9464_v45, 7 }
 0x43b   :  { %9450 = vst [vmem:[#allocation35_spill] sm:$0xff] %v7662_v4  ;;  %9453 = vst [vmem:[#allocation38_spill] sm:$0xff] %v7674_v58  ;;  %v9463_v27 = vmov %v7674_v58  ;;  %v9465_v34 = vmax.f32 %v7438_v25, 0.0  ;;  %v9466_v20 = vmax.f32 %v7442_v42, 0.0  ;;  %v9467_v33 = vmax.f32 %v7446_v44, 0.0 }
 0x43c   :  { %v7765_v30 = vrot.slane %v9468_v14, 7  ;;  %v9469_v9 = vmax.f32 %v7454_v11, 0.0  ;;  %v9470_v25 = vmax.f32 %v7458_v7, 0.0  ;;  %v9471_v42 = vmax.f32 %v7462_v17, 0.0 }
 0x43d   :  { %v7753_v50 = vrot.slane %v9465_v34, 7  ;;  %v7757_v58 = vrot.slane %v9466_v20, 7  ;;  %v7761_v16 = vrot.slane %v9467_v33, 7  ;;  %v9472_v44 = vmax.f32 %v7466_v21, 0.0 }
 0x43e   :  { %v7769_v45 = vrot.slane %v9469_v9, 7  ;;  %v7773_v34 = vrot.slane %v9470_v25, 7  ;;  %v7777_v20 = vrot.slane %v9471_v42, 7  ;;  %v9473_v40 = vmax.f32 %v7470_v1, 0.0 }
 0x43f   :  { %v9458_v32 = vld [vmem:[#allocation32_spill] sm:$0xff]  ;;  %v9459_v63 = vld [vmem:[#allocation33_spill] sm:$0xff]  ;;  %v7781_v33 = vrot.slane %v9472_v44, 7  ;;  %v7790_v11 = vsel %vm2771_vm10, %v7749_v23, %v7757_v58  ;;  %v9474_v7 = vmax.f32 %v7474_v56, 0.0  ;;  %v9475_v17 = vmax.f32 %v7478_v60, 0.0 }
 0x440   :  { %v7785_v14 = vrot.slane %v9473_v40, 7  ;;  %v9476_v21 = vmax.f32 %v7482_v24, 0.0  ;;  %v9477_v1 = vmax.f32 %v7486_v41, 0.0  ;;  %v9478_v40 = vmax.f32 %v7490_v46, 0.0 }
 0x441   :  { %v7794_v9 = vrot.slane %v9474_v7, 7  ;;  %v7798_v25 = vrot.slane %v9475_v17, 7  ;;  %v9479_v56 = vmax.f32 %v7494_v2, 0.0  ;;  %v9480_v60 = vmax.f32 %v7498_v31, 0.0 }
 0x442   :  { %v9460_v4 = vld [vmem:[#allocation35_spill] sm:$0xff]  ;;  %v7802_v42 = vrot.slane %v9476_v21, 7  ;;  %v7806_v44 = vrot.slane %v9477_v1, 7  ;;  %v7810_v37 = vrot.slane %v9478_v40, 7  ;;  %v9481_v24 = vmax.f32 %v7502_v59, 0.0 }
 0x443   :  { %v7814_v7 = vrot.slane %v9479_v56, 7  ;;  %v7818_v17 = vrot.slane %v9480_v60, 7  ;;  %v9482_v41 = vmax.f32 %v7506_v5, 0.0  ;;  %v9483_v46 = vmax.f32 %v7510_v35, 0.0 }
 0x444   :  { %v7822_v21 = vrot.slane %v9481_v24, 7  ;;  %v9484_v2 = vmax.f32 %v7514_v61, 0.0  ;;  %v9485_v31 = vmax.f32 %v7518_v53, 0.0  ;;  %v9486_v59 = vmax.f32 %v7522_v49, 0.0 }
 0x445   :  { %v7826_v1 = vrot.slane %v9482_v41, 7  ;;  %v7830_v40 = vrot.slane %v9483_v46, 7  ;;  %v9487_v5 = vmax.f32 %v7526_v51, 0.0  ;;  %v9488_v35 = vmax.f32 %v7530_v55, 0.0 }
 0x446   :  { %v7834_v56 = vrot.slane %v9484_v2, 7  ;;  %v7838_v60 = vrot.slane %v9485_v31, 7  ;;  %v7842_v24 = vrot.slane %v9486_v59, 7  ;;  %v9489_v61 = vmax.f32 %v7534_v38, 0.0 }
 0x447   :  { %v7846_v41 = vrot.slane %v9487_v5, 7  ;;  %v7850_v46 = vrot.slane %v9488_v35, 7  ;;  %v9490_v53 = vmax.f32 %v7538_v15, 0.0  ;;  %v9491_v49 = vmax.f32 %v7542_v29, 0.0 }
 0x448   :  { %v7854_v2 = vrot.slane %v9489_v61, 7  ;;  %v9492_v51 = vmax.f32 %v7546_v3, 0.0  ;;  %v9494_v55 = vmax.f32 %v7550_v19, 0.0  ;;  %v9496_v38 = vmax.f32 %v7554_v18, 0.0 }
 0x449   :  { %v7858_v31 = vrot.slane %v9490_v53, 7  ;;  %v7862_v59 = vrot.slane %v9491_v49, 7  ;;  %v9497_v15 = vmax.f32 %v7558_v6, 0.0  ;;  %v9498_v29 = vmax.f32 %v7562_v54, 0.0 }
 0x44a   :  { %v7866_v5 = vrot.slane %v9492_v51, 7  ;;  %v7870_v35 = vrot.slane %v9494_v55, 7  ;;  %v7874_v61 = vrot.slane %v9496_v38, 7  ;;  %v9500_v3 = vmax.f32 %v7566_v52, 0.0 }
 0x44b   :  { %v7878_v53 = vrot.slane %v9497_v15, 7  ;;  %v7882_v49 = vrot.slane %v9498_v29, 7  ;;  %v9502_v19 = vmax.f32 %v7570_v12, 0.0  ;;  %v9504_v18 = vmax.f32 %v7574_v36, 0.0 }
 0x44c   :  { %9493 = vst [vmem:[#allocation39_spill] sm:$0xff] %v7866_v5  ;;  %9495 = vst [vmem:[#allocation11_spill] sm:$0xff] %v7870_v35  ;;  %v7886_v51 = vrot.slane %v9500_v3, 7  ;;  %v9505_v5 = vld [vmem:[#allocation23_spill] sm:$0xff]  ;;  %v9507_v35 = vld [vmem:[#allocation24_spill] sm:$0xff] }
 0x44d   :  { %9499 = vst [vmem:[#allocation13_spill] sm:$0xff] %v7882_v49  ;;  %v7890_v55 = vrot.slane %v9502_v19, 7  ;;  %v7894_v38 = vrot.slane %v9504_v18, 7  ;;  %v9506_v6 = vmax.f32 %v9505_v5, 0.0  ;;  %v9508_v54 = vmax.f32 %v9507_v35, 0.0  ;;  %v9509_v49 = vld [vmem:[#allocation25_spill] sm:$0xff] }
 0x44e   :  { %9501 = vst [vmem:[#allocation14_spill] sm:$0xff] %v7886_v51  ;;  %v9510_v52 = vmax.f32 %v9509_v49, 0.0  ;;  %v9511_v51 = vld [vmem:[#allocation26_spill] sm:$0xff]  ;;  %v9516_v5 = vmax.f32 %v7598_v57, 0.0  ;;  %v9518_v35 = vmax.f32 %v7602_v22, 0.0  ;;  %v9520_v49 = vmax.f32 %v7606_v26, 0.0 }
 0x44f   :  { %9503 = vst [vmem:[#allocation15_spill] sm:$0xff] %v7890_v55  ;;  %v7898_v15 = vrot.slane %v9506_v6, 7  ;;  %v7902_v29 = vrot.slane %v9508_v54, 7  ;;  %v9512_v12 = vmax.f32 %v9511_v51, 0.0  ;;  %v9513_v55 = vld [vmem:[#allocation27_spill] sm:$0xff]  ;;  %v9522_v51 = vmax.f32 %v7610_v28, 0.0 }
 0x450   :  { %v7906_v3 = vrot.slane %v9510_v52, 7  ;;  %v9514_v36 = vmax.f32 %v9513_v55, 0.0  ;;  %v7918_v6 = vrot.slane %v9516_v5, 7  ;;  %v7922_v54 = vrot.slane %v9518_v35, 7 }
 0x451   :  { %v7910_v19 = vrot.slane %v9512_v12, 7  ;;  %v7926_v52 = vrot.slane %v9520_v49, 7  ;;  %v7930_v12 = vrot.slane %v9522_v51, 7  ;;  %v9524_v55 = vmax.f32 %v7614_v47, 0.0 }
 0x452   :  { %v7914_v18 = vrot.slane %v9514_v36, 7  ;;  %9517 = vst [vmem:[#allocation17_spill] sm:$0xff] %v7918_v6  ;;  %9519 = vst [vmem:[#allocation18_spill] sm:$0xff] %v7922_v54  ;;  %v9527_v6 = vld [vmem:[#allocation29_spill] sm:$0xff]  ;;  %v9529_v54 = vld [vmem:[#allocation30_spill] sm:$0xff]  ;;  %v9535_v47 = vmax.f32 %v9458_v32, 0.0 }
 0x453   :  { %9521 = vst [vmem:[#allocation19_spill] sm:$0xff] %v7926_v52  ;;  %9523 = vst [vmem:[#allocation20_spill] sm:$0xff] %v7930_v12  ;;  %v7934_v36 = vrot.slane %v9524_v55, 7  ;;  %v9528_v22 = vmax.f32 %v9527_v6, 0.0  ;;  %v9530_v26 = vmax.f32 %v9529_v54, 0.0  ;;  %v9532_v52 = vld [vmem:[#allocation31_spill] sm:$0xff] }
 0x454   :  { %9515 = vst [vmem:[#allocation16_spill] sm:$0xff] %v7914_v18  ;;  %v9525_v18 = vld [vmem:[#allocation28_spill] sm:$0xff]  ;;  %v9533_v28 = vmax.f32 %v9532_v52, 0.0  ;;  %v7954_v55 = vrot.slane %v9535_v47, 7  ;;  %v9537_v6 = vmax.f32 %v7642_v0, 0.0  ;;  %v9538_v12 = vld [vmem:[#allocation34_spill] sm:$0xff] }
 0x455   :  { %v9526_v57 = vmax.f32 %v9525_v18, 0.0  ;;  %v7942_v35 = vrot.slane %v9528_v22, 7  ;;  %v7946_v49 = vrot.slane %v9530_v26, 7  ;;  %v9536_v18 = vmax.f32 %v9459_v63, 0.0 }
 0x456   :  { %v7950_v51 = vrot.slane %v9533_v28, 7  ;;  %v7962_v22 = vrot.slane %v9537_v6, 7  ;;  %v9539_v54 = vmax.f32 %v9538_v12, 0.0  ;;  %v9540_v52 = vmax.f32 %v7650_v62, 0.0 }
 0x457   :  { %v7938_v5 = vrot.slane %v9526_v57, 7  ;;  %9531 = vst [vmem:[#allocation21_spill] sm:$0xff] %v7946_v49  ;;  %v7958_v57 = vrot.slane %v9536_v18, 7  ;;  %v9541_v32 = vmax.f32 %v7654_v43, 0.0  ;;  %v9542_v63 = vmax.f32 %v7658_v48, 0.0 }
 0x458   :  { %9534 = vst [vmem:[#allocation32_spill] sm:$0xff] %v7950_v51  ;;  %v7966_v26 = vrot.slane %v9539_v54, 7  ;;  %v7970_v28 = vrot.slane %v9540_v52, 7  ;;  %v9543_v0 = vmax.f32 %v9460_v4, 0.0  ;;  %v9544_v12 = vmax.f32 %v9461_v13, 0.0 }
 0x459   :  { %v7974_v47 = vrot.slane %v9541_v32, 7  ;;  %v7978_v18 = vrot.slane %v9542_v63, 7  ;;  %v9545_v62 = vmax.f32 %v9462_v39, 0.0  ;;  %v9546_v43 = vmax.f32 %v9463_v27, 0.0 }
 0x45a   :  { %v7982_v6 = vrot.slane %v9543_v0, 7  ;;  %v7986_v54 = vrot.slane %v9544_v12, 7  ;;  %v9547_v48 = vmax.f32 %v7678_v10, 0.0  ;;  %v9548_v4 = vmax.f32 %v7682_v8, 0.0 }
 0x45b   :  { %v7990_v52 = vrot.slane %v9545_v62, 7  ;;  %v7994_v32 = vrot.slane %v9546_v43, 7  ;;  %v2964_v13 = vsel %vm2771_vm10, 0.0, %v7749_v23  ;;  %v8009_v39 = vsel %vm2771_vm10, %v7810_v37, 0.0 }
 0x45c   :  { %v7999_v63 = vrot.slane %v9547_v48, 7  ;;  %v8003_v0 = vrot.slane %v9548_v4, 7  ;;  %9549 = vst [vmem:[#allocation33_spill] sm:$0xff] %v8009_v39  ;;  %v8013_v27 = vsel %vm2771_vm10, %v7814_v7, 0.0  ;;  %v8017_v10 = vsel %vm2771_vm10, %v7874_v61, 0.0 }
 0x45d   :  { %9550 = vst [vmem:[#allocation35_spill] sm:$0xff] %v8013_v27  ;;  %9551 = vst [vmem:[#allocation36_spill] sm:$0xff] %v8017_v10  ;;  %v8021_v8 = vsel %vm2771_vm10, %v7878_v53, 0.0  ;;  %v8025_v12 = vsel %vm2771_vm10, %v7938_v5, 0.0  ;;  %v8029_v62 = vsel %vm2771_vm10, %v7942_v35, 0.0  ;;  %v8036_v48 = vpack.c.bf16 %v7790_v11, %v2964_v13 }
 0x45e   :  { %9552 = vst [vmem:[#allocation37_spill] sm:$0xff] %v8021_v8  ;;  %9553 = vst [vmem:[#allocation38_spill] sm:$0xff] %v8025_v12  ;;  %v8033_v43 = vsel %vm2771_vm10, %v8003_v0, 0.0  ;;  %v4975_v4 = vpack.c.bf16 %v7790_v11, %v7749_v23  ;;  %v2777_v12 = vsel %vm2771_vm10, %v7753_v50, %v7761_v16  ;;  %v2781_v13 = vsel %vm2771_vm10, %v7761_v16, %v7769_v45  ;;  %v5720_v8 = vld [vmem:[#allocation5 + $0x80] sm:$0xff]  }
 0x45f   :  { %9554 = vst [vmem:[#allocation23_spill] sm:$0xff] %v8029_v62  ;;  %9555 = vst [vmem:[#allocation24_spill] sm:$0xff] %v8033_v43  ;;  %v2965_v62 = vsel %vm2771_vm10, 0.0, %v7753_v50  ;;  %v2785_v23 = vsel %vm2771_vm10, %v7769_v45, %v7777_v20  ;;  %v4971_v43 = vpack.c.bf16 %v2777_v12, %v7753_v50  ;;  %v2779_v27 = vsel %vm2771_vm10, %v7757_v58, %v7765_v30  ;;  %v5721_v50 = vld [vmem:[#allocation5 + $0xc8] sm:$0xff]  }
 0x460   :  { %9556 = vst [vmem:[#allocation25_spill] sm:$0xff] %v8036_v48  ;;  %v8056_v11 = vpack.c.bf16 %v2777_v12, %v2965_v62  ;;  %v8059_v39 = vpack.c.bf16 %v2785_v23, %v2781_v13  ;;  %v2783_v48 = vsel %vm2771_vm10, %v7765_v30, %v7773_v34  ;;  %v2789_v16 = vsel %vm2771_vm10, %v7777_v20, %v7785_v14  ;;  %v9569_v23 = vld [vmem:[#allocation18_spill] sm:$0xff] }
 0x461   :  { %v2793_v45 = vsel %vm2771_vm10, %v7785_v14, %v7798_v25  ;;  %v2787_v12 = vsel %vm2771_vm10, %v7773_v34, %v7781_v33  ;;  %4972 = vmatprep.mubr.msk.bf16.mxu0 %vm8041_vm12, %v4971_v43  ;;  %v8078_v58 = vpack.c.bf16 %v2783_v48, %v2779_v27  ;;  %v2791_v30 = vsel %vm2771_vm10, %v7781_v33, %v7794_v9 }
 0x462   :  { %v8080_v62 = vpack.c.bf16 %v2793_v45, %v2789_v16  ;;  %v2797_v20 = vsel %vm2771_vm10, %v7798_v25, %v7806_v44  ;;  %4976 = vmatmul.mubr.msk.bf16.vlgmr.msra.gmra.mrb[32].mxu0 %vm8041_vm12, %v4975_v4  ;;  %v8090_v14 = vpack.c.bf16 %v2791_v30, %v2787_v12  ;;  %v2801_v34 = vsel %vm2771_vm10, %v7806_v44, %v7814_v7  ;;  %v5722_v25 = vld [vmem:[#allocation5 + $0x88] sm:$0xff]  }
 0x463   :  { %9559 = vst [vmem:[#allocation26_spill] sm:$0xff] %v8078_v58  ;;  %v2795_v27 = vsel %vm2771_vm10, %v7794_v9, %v7802_v42  ;;  %v2799_v33 = vsel %vm2771_vm10, %v7802_v42, %v7810_v37  ;;  %5140 = vmatpush3.bf16.msra.mxu0 %v5720_v8  ;;  %3908 = vmatprep.mubr.bf16.mxu0 %v8059_v39  ;;  %v2967_v9 = vsel %vm2771_vm10, 0.0, %v7822_v21  ;;  %v5723_v42 = vld [vmem:[#allocation5 + $0xd0] sm:$0xff]   ;;  %v2966_v4 = vsel %vm2771_vm10, 0.0, %v7818_v17 }
 0x464   :  { %9560 = vst [vmem:[#allocation27_spill] sm:$0xff] %v8080_v62  ;;  %v8102_v43 = vpack.c.bf16 %v2801_v34, %v2797_v20  ;;  %v8104_v48 = vpack.c.bf16 %v2799_v33, %v2795_v27  ;;  %v8109_v44 = vsel %vm2771_vm10, %v7822_v21, %v7830_v40  ;;  %5141 = vmatprep.subr.bf16.mxu0 %v5721_v50  ;;  %v3068_v37 = vshrl.u32 %v8080_v62, 16 }
 0x465   :  { %v8114_v7 = vpack.c.bf16 %v8109_v44, %v2967_v9  ;;  %v8121_v8 = vsel %vm2771_vm10, %v7818_v17, %v7826_v1  ;;  %v2811_v16 = vsel %vm2771_vm10, %v7830_v40, %v7838_v60  ;;  %v2815_v45 = vsel %vm2771_vm10, %v7838_v60, %v7846_v41  ;;  %v5724_v40 = vld [vmem:[#allocation5 + $0x90] sm:$0xff]  }
 0x466   :  { %v8126_v13 = vpack.c.bf16 %v8121_v8, %v2966_v4  ;;  %v8136_v50 = vpack.c.bf16 %v2815_v45, %v2811_v16  ;;  %v2809_v12 = vsel %vm2771_vm10, %v7826_v1, %v7834_v56  ;;  %v2813_v30 = vsel %vm2771_vm10, %v7834_v56, %v7842_v24  ;;  %v9563_v16 = vld [vmem:[#allocation14_spill] sm:$0xff] }
 0x467   :  { %v2819_v20 = vsel %vm2771_vm10, %v7846_v41, %v7854_v2  ;;  %5142 = vmatpush3.bf16.msra.mxu0 %v5722_v25  ;;  %v8147_v34 = vpack.c.bf16 %v2813_v30, %v2809_v12  ;;  %v2823_v60 = vsel %vm2771_vm10, %v7854_v2, %v7862_v59  ;;  %v2817_v1 = vsel %vm2771_vm10, %v7842_v24, %v7850_v46  ;;  %v5725_v41 = vld [vmem:[#allocation5 + $0xd8] sm:$0xff]   ;;  %v9561_v25 = vld [vmem:[#allocation11_spill] sm:$0xff]  ;;  %v9568_v12 = vld [vmem:[#allocation16_spill] sm:$0xff] }
 0x468   :  { %v2821_v56 = vsel %vm2771_vm10, %v7850_v46, %v7858_v31  ;;  %5143 = vmatprep.subr.bf16.mxu0 %v5723_v42  ;;  %v8158_v27 = vpack.c.bf16 %v2823_v60, %v2819_v20  ;;  %v2827_v9 = vsel %vm2771_vm10, %v7862_v59, %v9561_v25  ;;  %v2831_v2 = vsel %vm2771_vm10, %v9561_v25, %v7878_v53  ;;  %v9562_v24 = vld [vmem:[#allocation39_spill] sm:$0xff]  ;;  %v9565_v30 = vld [vmem:[#allocation13_spill] sm:$0xff] }
 0x469   :  { %v8160_v33 = vpack.c.bf16 %v2821_v56, %v2817_v1  ;;  %v8168_v4 = vpack.c.bf16 %v2831_v2, %v2827_v9  ;;  %v2825_v46 = vsel %vm2771_vm10, %v7858_v31, %v9562_v24  ;;  %v2829_v42 = vsel %vm2771_vm10, %v9562_v24, %v7874_v61  ;;  %v9564_v31 = vld [vmem:[#allocation15_spill] sm:$0xff]  ;;  %v5726_v61 = vld [vmem:[#allocation5 + $0x98] sm:$0xff]  }
 0x46a   :  { %v8179_v45 = vsel %vm2771_vm10, %v9563_v16, %v7894_v38  ;;  %3909 = vmatmul.mubr.bf16.gmra.mrb[36].mxu0 %v8078_v58  ;;  %v8182_v59 = vpack.c.bf16 %v2829_v42, %v2825_v46  ;;  %v2969_v53 = vsel %vm2771_vm10, 0.0, %v9563_v16  ;;  %v8191_v20 = vsel %vm2771_vm10, %v9565_v30, %v9564_v31  ;;  %v5727_v9 = vld [vmem:[#allocation5 + $0xe0] sm:$0xff]  }
 0x46b   :  { %3916 = vmatprep.mubr.bf16.mxu0 %v8080_v62  ;;  %5144 = vmatpush3.bf16.msra.mxu0 %v5724_v40  ;;  %v8195_v60 = vpack.c.bf16 %v8179_v45, %v2969_v53  ;;  %v2968_v1 = vsel %vm2771_vm10, 0.0, %v9565_v30  ;;  %v2841_v25 = vsel %vm2771_vm10, %v7894_v38, %v7902_v29  ;;  %v2845_v40 = vsel %vm2771_vm10, %v7902_v29, %v7910_v19 }
 0x46c   :  { %5145 = vmatprep.subr.bf16.mxu0 %v5725_v41  ;;  %v8205_v2 = vpack.c.bf16 %v8191_v20, %v2968_v1  ;;  %v2839_v24 = vsel %vm2771_vm10, %v9564_v31, %v7898_v15  ;;  %v2843_v46 = vsel %vm2771_vm10, %v7898_v15, %v7906_v3  ;;  %v8216_v42 = vpack.c.bf16 %v2845_v40, %v2841_v25  ;;  %v9566_v41 = vld [vmem:[#allocation17_spill] sm:$0xff]  ;;  %v9567_v1 = vld [vmem:[#allocation19_spill] sm:$0xff] }
 0x46d   :  { %v8218_v38 = vpack.c.bf16 %v2843_v46, %v2839_v24  ;;  %v2849_v53 = vsel %vm2771_vm10, %v7910_v19, %v9566_v41  ;;  %v2853_v29 = vsel %vm2771_vm10, %v9566_v41, %v9567_v1  ;;  %v2847_v31 = vsel %vm2771_vm10, %v7906_v3, %v9568_v12  ;;  %v5728_v19 = vld [vmem:[#allocation5 + $0xa0] sm:$0xff]   ;;  %v9570_v46 = vld [vmem:[#allocation20_spill] sm:$0xff] }
 0x46e   :  { %v8226_v56 = vpack.c.bf16 %v2853_v29, %v2849_v53  ;;  %v2851_v15 = vsel %vm2771_vm10, %v9568_v12, %v9569_v23  ;;  %v2857_v25 = vsel %vm2771_vm10, %v9567_v1, %v7934_v36  ;;  %v2861_v24 = vsel %vm2771_vm10, %v7934_v36, %v7942_v35  ;;  %v5729_v41 = vld [vmem:[#allocation5 + $0xe8] sm:$0xff]  }
 0x46f   :  { %5146 = vmatpush3.bf16.msra.mxu0 %v5726_v61  ;;  %v8237_v40 = vpack.c.bf16 %v2851_v15, %v2847_v31  ;;  %v2855_v3 = vsel %vm2771_vm10, %v9569_v23, %v9570_v46  ;;  %v2859_v12 = vsel %vm2771_vm10, %v9570_v46, %v7938_v5  ;;  %v8248_v53 = vpack.c.bf16 %v2861_v24, %v2857_v25  ;;  %v5730_v24 = vld [vmem:[#allocation5 + $0xa8] sm:$0xff]  }
 0x470   :  { %5147 = vmatprep.subr.bf16.mxu0 %v5727_v9  ;;  %v8250_v61 = vpack.c.bf16 %v2859_v12, %v2855_v3  ;;  %v8255_v1 = vsel %vm2771_vm10, %v7950_v51, %v7958_v57  ;;  %v2971_v36 = vsel %vm2771_vm10, 0.0, %v7950_v51  ;;  %v8267_v23 = vsel %vm2771_vm10, %v7946_v49, %v7954_v55 }
 0x471   :  { %9571 = vst [vmem:[#allocation28_spill] sm:$0xff] %v8255_v1  ;;  %v8260_v35 = vpack.c.bf16 %v8255_v1, %v2971_v36  ;;  %9572 = vst [vmem:[#allocation29_spill] sm:$0xff] %v8267_v23  ;;  %v2970_v9 = vsel %vm2771_vm10, 0.0, %v7946_v49  ;;  %v2871_v15 = vsel %vm2771_vm10, %v7958_v57, %v7966_v26  ;;  %v2875_v25 = vsel %vm2771_vm10, %v7966_v26, %v7974_v47  ;;  %v5731_v36 = vld [vmem:[#allocation5 + $0xf0] sm:$0xff]  }
 0x472   :  { %3917 = vmatmul.mubr.bf16.gmra.mrb[40].mxu0 %v8090_v14  ;;  %v8273_v29 = vpack.c.bf16 %v8267_v23, %v2970_v9  ;;  %v8284_v46 = vpack.c.bf16 %v2875_v25, %v2871_v15  ;;  %v2869_v3 = vsel %vm2771_vm10, %v7954_v55, %v7962_v22  ;;  %v2873_v12 = vsel %vm2771_vm10, %v7962_v22, %v7970_v28  ;;  %v9573_v25 = vld [vmem:[#allocation22_spill] sm:$0xff] }
 0x473   :  { %3924 = vmatprep.mubr.bf16.mxu0 %v8102_v43  ;;  %5148 = vmatpush3.bf16.msra.mxu0 %v5728_v19  ;;  %v3033_v57 = vshrl.u32 %v8056_v11, 16  ;;  %v8293_v9 = vpack.c.bf16 %v2873_v12, %v2869_v3  ;;  %v2879_v26 = vsel %vm2771_vm10, %v7974_v47, %v7982_v6  ;;  %v2883_v19 = vsel %vm2771_vm10, %v7982_v6, %v7990_v52  ;;  %v5732_v12 = vld [vmem:[#allocation5 + $0xb0] sm:$0xff]  }
 0x474   :  { %5149 = vmatprep.subr.bf16.mxu0 %v5729_v41  ;;  %v2877_v55 = vsel %vm2771_vm10, %v7970_v28, %v7978_v18  ;;  %v8304_v15 = vpack.c.bf16 %v2883_v19, %v2879_v26  ;;  %v2881_v22 = vsel %vm2771_vm10, %v7978_v18, %v7986_v54  ;;  %v2887_v41 = vsel %vm2771_vm10, %v7990_v52, %v7999_v63  ;;  %v9574_v19 = vld [vmem:[#allocation25_spill] sm:$0xff] }
 0x475   :  { %v2891_v47 = vsel %vm2771_vm10, %v7999_v63, %v9573_v25  ;;  %v8315_v3 = vpack.c.bf16 %v2881_v22, %v2877_v55  ;;  %v2885_v28 = vsel %vm2771_vm10, %v7986_v54, %v7994_v32  ;;  %v2889_v18 = vsel %vm2771_vm10, %v7994_v32, %v8003_v0  ;;  %v5733_v22 = vld [vmem:[#allocation5 + $0xf8] sm:$0xff]  }
 0x476   :  { %v8317_v6 = vpack.c.bf16 %v2891_v47, %v2887_v41  ;;  %v8325_v26 = vpack.c.bf16 %v2889_v18, %v2885_v28  ;;  %v3035_v52 = vshll.u32 %v8056_v11, 16  ;;  %v3040_v63 = vshll.u32 %v8059_v39, 16 }
 0x477   :  { %5150 = vmatpush3.bf16.msra.mxu0 %v5730_v24  ;;  %v3021_v55 = vshrl.u32 %v9574_v19, 16  ;;  %v3023_v41 = vshll.u32 %v9574_v19, 16  ;;  %v3028_v54 = vshll.u32 %v8078_v58, 16  ;;  %v3052_v47 = vshrl.u32 %v8059_v39, 16 }
 0x478   :  { %5151 = vmatprep.subr.bf16.mxu0 %v5731_v36  ;;  %v3056_v32 = vshll.u32 %v8080_v62, 16  ;;  %v3037_v0 = vrot.slane %v3035_v52, 1  ;;  %v3042_v24 = vrot.slane %v3040_v63, 1  ;;  %v3044_v28 = vshrl.u32 %v8078_v58, 16  ;;  %v5734_v52 = vld [vmem:[#allocation5 + $0xb8] sm:$0xff]   ;;  %v5735_v58 = vld [vmem:[#allocation5 + $0x140] sm:$0xff]  }
 0x479   :  { %v3048_v18 = vshll.u32 %v8090_v14, 16  ;;  %v3025_v31 = vrot.slane %v3023_v41, 1  ;;  %v3030_v5 = vrot.slane %v3028_v54, 1  ;;  %v9575_v49 = vpack.c.bf16 %v8109_v44, %v7822_v21 }
 0x47a   :  { %3925 = vmatmul.mubr.bf16.gmra.mrb[44].mxu0 %v8104_v48  ;;  %v3058_v36 = vrot.slane %v3056_v32, 1  ;;  %v3038_v63 = vor.u32 %v3037_v0, %v3033_v57  ;;  %v3054_v23 = vor.u32 %v3052_v47, %v3042_v24  ;;  %v3072_v1 = vshll.u32 %v8102_v43, 16  ;;  %v9580_v47 = vld [vmem:[#allocation33_spill] sm:$0xff] }
 0x47b   :  { %4980 = vmatprep.mubr.msk.bf16.mxu0 %vm8041_vm12, %v9575_v49  ;;  %5152 = vmatpush3.bf16.msra.mxu0 %v5732_v12  ;;  %v3050_v51 = vrot.slane %v3048_v18, 1  ;;  %v3026_v41 = vor.u32 %v3025_v31, %v3021_v55  ;;  %v3046_v54 = vor.u32 %v3044_v28, %v3030_v5  ;;  %v3060_v62 = vshrl.u32 %v8090_v14, 16  ;;  %v9578_v55 = vld [vmem:[#allocation35_spill] sm:$0xff] }
 0x47c   :  { %5153 = vmatprep.subr.bf16.mxu0 %v5733_v22  ;;  %v3070_v32 = vor.u32 %v3068_v37, %v3058_v36  ;;  %v8346_v19 = vsel %vm780_vm3, %v3038_v63, %v3042_v24  ;;  %v8349_v21 = vsel %vm780_vm3, %v3054_v23, %v3058_v36  ;;  %v3074_v49 = vrot.slane %v3072_v1, 1 }
 0x47d   :  { %9576 = vst [vmem:[#allocation30_spill] sm:$0xff] %v8349_v21  ;;  %v3064_v44 = vshll.u32 %v8104_v48, 16  ;;  %v8353_v57 = vsel %vm780_vm3, %v3026_v41, %v3030_v5  ;;  %v8356_v12 = vsel %vm780_vm3, %v3046_v54, %v3050_v51  ;;  %v3062_v31 = vor.u32 %v3060_v62, %v3050_v51 }
 0x47e   :  { %9577 = vst [vmem:[#allocation31_spill] sm:$0xff] %v8356_v12  ;;  %v8360_v37 = vpack.c.bf16 %v9578_v55, %v9578_v55  ;;  %v8363_v22 = vsel %vm780_vm3, %v3070_v32, %v3074_v49  ;;  %v3084_v1 = vshrl.u32 %v8102_v43, 16  ;;  %v8368_v0 = vpack.c.bf16 %v9580_v47, %v9580_v47 }
 0x47f   :  { %5154 = vmatpush3.bf16.msra.mxu0 %v5734_v52  ;;  %9579 = vst [vmem:[#allocation34_spill] sm:$0xff] %v8363_v22  ;;  %v3066_v23 = vrot.slane %v3064_v44, 1  ;;  %v3076_v51 = vshrl.u32 %v8104_v48, 16  ;;  %v3105_v62 = vshrl.u32 %v8114_v7, 16  ;;  %v3107_v24 = vshll.u32 %v8114_v7, 16 }
 0x480   :  { %5251 = vmatprep.subr.bf16.mxu0 %v5735_v58  ;;  %v3088_v5 = vshll.u32 %v8360_v37, 16  ;;  %v3086_v18 = vor.u32 %v3084_v1, %v3074_v49  ;;  %v3080_v36 = vshll.u32 %v8368_v0, 16  ;;  %v3112_v52 = vshll.u32 %v8136_v50, 16 }
 0x481   :  { %v8375_v28 = vsel %vm780_vm3, %v3062_v31, %v3066_v23  ;;  %v9582_v63 = vpack.c.bf16 %v8121_v8, %v7818_v17  ;;  %v3078_v41 = vor.u32 %v3076_v51, %v3066_v23  ;;  %v3109_v54 = vrot.slane %v3107_v24, 1 }
 0x482   :  { %9581 = vst [vmem:[#allocation11_spill] sm:$0xff] %v8375_v28  ;;  %v3090_v58 = vrot.slane %v3088_v5, 1  ;;  %v3093_v32 = vshrl.u32 %v8126_v13, 16  ;;  %v3082_v44 = vrot.slane %v3080_v36, 1  ;;  %v3114_v31 = vrot.slane %v3112_v52, 1 }
 0x483   :  { %4984 = vmatmul.mubr.msk.bf16.gmra.mrb[48].mxu0 %vm8041_vm12, %v9582_v63  ;;  %v3095_v49 = vshll.u32 %v8126_v13, 16  ;;  %v3100_v55 = vshll.u32 %v8147_v34, 16  ;;  %v3110_v17 = vor.u32 %v3109_v54, %v3105_v62  ;;  %v3124_v8 = vshrl.u32 %v8136_v50, 16 }
 0x484   :  { %3940 = vmatprep.mubr.bf16.mxu0 %v8136_v50  ;;  %v8389_v1 = vsel %vm780_vm3, %v3086_v18, %v3090_v58  ;;  %v3128_v47 = vshll.u32 %v8158_v27, 16  ;;  %v8394_v23 = vsel %vm780_vm3, %v3078_v41, %v3082_v44  ;;  %v3116_v24 = vshrl.u32 %v8147_v34, 16  ;;  %v9616_v10 = vld [vmem:[#allocation30_spill] sm:$0xff] }
 0x485   :  { %9583 = vst [vmem:[#allocation39_spill] sm:$0xff] %v8389_v1  ;;  %9584 = vst [vmem:[#allocation14_spill] sm:$0xff] %v8394_v23  ;;  %v3097_v5 = vrot.slane %v3095_v49, 1  ;;  %v3102_v51 = vrot.slane %v3100_v55, 1  ;;  %v8398_v36 = vsel %vm780_vm3, %v3110_v17, %v3114_v31  ;;  %v3126_v52 = vor.u32 %v3124_v8, %v3114_v31 }
 0x486   :  { %9585 = vst [vmem:[#allocation15_spill] sm:$0xff] %v8398_v36  ;;  %v3130_v63 = vrot.slane %v3128_v47, 1  ;;  %v3120_v18 = vshll.u32 %v8160_v33, 16  ;;  %v3140_v54 = vshrl.u32 %v8158_v27, 16  ;;  %v3144_v1 = vshll.u32 %v8168_v4, 16  ;;  %v9588_v47 = vld [vmem:[#allocation37_spill] sm:$0xff] }
 0x487   :  { %v3098_v58 = vor.u32 %v3097_v5, %v3093_v32  ;;  %v3118_v62 = vor.u32 %v3116_v24, %v3102_v51  ;;  %v3132_v49 = vshrl.u32 %v8160_v33, 16  ;;  %v3136_v55 = vshll.u32 %v8182_v59, 16 }
 0x488   :  { %v8404_v41 = vsel %vm780_vm3, %v3126_v52, %v3130_v63  ;;  %v3122_v44 = vrot.slane %v3120_v18, 1  ;;  %v3142_v31 = vor.u32 %v3140_v54, %v3130_v63  ;;  %v3146_v8 = vrot.slane %v3144_v1, 1  ;;  %v9591_v63 = vld [vmem:[#allocation36_spill] sm:$0xff] }
 0x489   :  { %9586 = vst [vmem:[#allocation13_spill] sm:$0xff] %v8404_v41  ;;  %v8409_v17 = vsel %vm780_vm3, %v3098_v58, %v3102_v51  ;;  %v8413_v32 = vpack.c.bf16 %v9588_v47, %v9588_v47  ;;  %v3138_v52 = vrot.slane %v3136_v55, 1  ;;  %v3156_v18 = vshrl.u32 %v8168_v4, 16 }
 0x48a   :  { %9587 = vst [vmem:[#allocation17_spill] sm:$0xff] %v8409_v17  ;;  %v8417_v5 = vsel %vm780_vm3, %v3118_v62, %v3122_v44  ;;  %v3134_v24 = vor.u32 %v3132_v49, %v3122_v44  ;;  %v8422_v51 = vsel %vm780_vm3, %v3142_v31, %v3146_v8  ;;  %v8427_v58 = vpack.c.bf16 %v9591_v63, %v9591_v63 }
 0x48b   :  { %3941 = vmatmul.mubr.bf16.gmra.mrb[52].mxu0 %v8147_v34  ;;  %9589 = vst [vmem:[#allocation19_spill] sm:$0xff] %v8417_v5  ;;  %9590 = vst [vmem:[#allocation16_spill] sm:$0xff] %v8422_v51  ;;  %v3160_v1 = vshll.u32 %v8413_v32, 16  ;;  %v3148_v54 = vshrl.u32 %v8182_v59, 16  ;;  %v3158_v44 = vor.u32 %v3156_v18, %v3146_v8  ;;  %v3177_v49 = vshrl.u32 %v8195_v60, 16 }
 0x48c   :  { %3948 = vmatprep.mubr.bf16.mxu0 %v8158_v27  ;;  %v8431_v62 = vsel %vm780_vm3, %v3134_v24, %v3138_v52  ;;  %v3179_v55 = vshll.u32 %v8195_v60, 16  ;;  %v3152_v31 = vshll.u32 %v8427_v58, 16  ;;  %v3184_v51 = vshll.u32 %v8216_v42, 16 }
 0x48d   :  { %9592 = vst [vmem:[#allocation18_spill] sm:$0xff] %v8431_v62  ;;  %v3162_v47 = vrot.slane %v3160_v1, 1  ;;  %v3150_v5 = vor.u32 %v3148_v54, %v3138_v52  ;;  %v3165_v63 = vshrl.u32 %v8205_v2, 16  ;;  %v3167_v17 = vshll.u32 %v8205_v2, 16 }
 0x48e   :  { %v3181_v41 = vrot.slane %v3179_v55, 1  ;;  %v3172_v36 = vshll.u32 %v8218_v38, 16  ;;  %v3154_v8 = vrot.slane %v3152_v31, 1  ;;  %v3186_v18 = vrot.slane %v3184_v51, 1 }
 0x48f   :  { %v8441_v24 = vsel %vm780_vm3, %v3158_v44, %v3162_v47  ;;  %v3196_v62 = vshrl.u32 %v8216_v42, 16  ;;  %v3169_v52 = vrot.slane %v3167_v17, 1  ;;  %v3200_v23 = vshll.u32 %v8226_v56, 16 }
 0x490   :  { %9593 = vst [vmem:[#allocation20_spill] sm:$0xff] %v8441_v24  ;;  %v3182_v1 = vor.u32 %v3181_v41, %v3177_v49  ;;  %v3174_v54 = vrot.slane %v3172_v36, 1  ;;  %v8446_v55 = vsel %vm780_vm3, %v3150_v5, %v3154_v8  ;;  %v3188_v22 = vshrl.u32 %v8218_v38, 16 }
 0x491   :  { %9594 = vst [vmem:[#allocation22_spill] sm:$0xff] %v8446_v55  ;;  %v3198_v28 = vor.u32 %v3196_v62, %v3186_v18  ;;  %v3192_v12 = vshll.u32 %v8237_v40, 16  ;;  %v3170_v51 = vor.u32 %v3169_v52, %v3165_v63  ;;  %v3202_v47 = vrot.slane %v3200_v23, 1 }
 0x492   :  { %v8452_v44 = vsel %vm780_vm3, %v3182_v1, %v3186_v18  ;;  %v3212_v41 = vshrl.u32 %v8226_v56, 16  ;;  %v3190_v36 = vor.u32 %v3188_v22, %v3174_v54  ;;  %v3216_v5 = vshll.u32 %v8248_v53, 16  ;;  %v9599_v22 = vld [vmem:[#allocation23_spill] sm:$0xff] }
 0x493   :  { %3949 = vmatmul.mubr.bf16.gmra.mrb[56].mxu0 %v8160_v33  ;;  %9595 = vst [vmem:[#allocation35_spill] sm:$0xff] %v8452_v44  ;;  %v3194_v17 = vrot.slane %v3192_v12, 1  ;;  %v3204_v62 = vshrl.u32 %v8237_v40, 16  ;;  %v8459_v49 = vsel %vm780_vm3, %v3170_v51, %v3174_v54  ;;  %v8462_v31 = vsel %vm780_vm3, %v3198_v28, %v3202_v47  ;;  %v9600_v54 = vld [vmem:[#allocation38_spill] sm:$0xff] }
 0x494   :  { %3956 = vmatprep.mubr.bf16.mxu0 %v8168_v4  ;;  %9596 = vst [vmem:[#allocation33_spill] sm:$0xff] %v8459_v49  ;;  %9597 = vst [vmem:[#allocation37_spill] sm:$0xff] %v8462_v31  ;;  %v3214_v8 = vor.u32 %v3212_v41, %v3202_v47  ;;  %v3208_v63 = vshll.u32 %v8250_v61, 16  ;;  %v3218_v18 = vrot.slane %v3216_v5, 1  ;;  %v8470_v12 = vpack.c.bf16 %v9599_v22, %v9599_v22 }
 0x495   :  { %v8466_v23 = vsel %vm780_vm3, %v3190_v36, %v3194_v17  ;;  %v3206_v1 = vor.u32 %v3204_v62, %v3194_v17  ;;  %v3228_v44 = vshrl.u32 %v8248_v53, 16  ;;  %v8475_v51 = vpack.c.bf16 %v9600_v54, %v9600_v54 }
 0x496   :  { %9598 = vst [vmem:[#allocation36_spill] sm:$0xff] %v8466_v23  ;;  %v3210_v52 = vrot.slane %v3208_v63, 1  ;;  %v3220_v28 = vshrl.u32 %v8250_v61, 16  ;;  %v8479_v47 = vsel %vm780_vm3, %v3214_v8, %v3218_v18  ;;  %v3232_v41 = vshll.u32 %v8470_v12, 16 }
 0x497   :  { %9601 = vst [vmem:[#allocation23_spill] sm:$0xff] %v8479_v47  ;;  %v3249_v36 = vshrl.u32 %v8260_v35, 16  ;;  %v3251_v17 = vshll.u32 %v8260_v35, 16  ;;  %v3230_v62 = vor.u32 %v3228_v44, %v3218_v18  ;;  %v3224_v22 = vshll.u32 %v8475_v51, 16 }
 0x498   :  { %v8485_v5 = vsel %vm780_vm3, %v3206_v1, %v3210_v52  ;;  %v3222_v63 = vor.u32 %v3220_v28, %v3210_v52  ;;  %v3234_v54 = vrot.slane %v3232_v41, 1  ;;  %v3256_v31 = vshll.u32 %v8284_v46, 16 }
 0x499   :  { %9602 = vst [vmem:[#allocation38_spill] sm:$0xff] %v8485_v5  ;;  %v3253_v23 = vrot.slane %v3251_v17, 1  ;;  %v3237_v8 = vshrl.u32 %v8273_v29, 16  ;;  %v3226_v47 = vrot.slane %v3224_v22, 1  ;;  %v3239_v49 = vshll.u32 %v8273_v29, 16 }
 0x49a   :  { %v3244_v55 = vshll.u32 %v8293_v9, 16  ;;  %v3268_v1 = vshrl.u32 %v8284_v46, 16  ;;  %v9603_v44 = vpack.c.bf16 %v8179_v45, %v9563_v16  ;;  %v8500_v18 = vsel %vm780_vm3, %v3230_v62, %v3234_v54 }
 0x49b   :  { %3957 = vmatmul.mubr.bf16.gmra.mrb[60].mxu0 %v8182_v59  ;;  %v3254_v52 = vor.u32 %v3253_v23, %v3249_v36  ;;  %v3258_v28 = vrot.slane %v3256_v31, 1  ;;  %v3272_v41 = vshll.u32 %v8304_v15, 16  ;;  %v8504_v17 = vsel %vm780_vm3, %v3222_v63, %v3226_v47 }
 0x49c   :  { %4988 = vmatprep.mubr.msk.bf16.mxu0 %vm8041_vm12, %v9603_v44  ;;  %v3241_v22 = vrot.slane %v3239_v49, 1  ;;  %v3246_v5 = vrot.slane %v3244_v55, 1  ;;  %v3260_v24 = vshrl.u32 %v8293_v9, 16  ;;  %v3264_v44 = vshll.u32 %v8315_v3, 16 }
 0x49d   :  { %v8508_v21 = vsel %vm780_vm3, %v3254_v52, %v3258_v28  ;;  %v3270_v16 = vor.u32 %v3268_v1, %v3258_v28  ;;  %v3274_v45 = vrot.slane %v3272_v41, 1  ;;  %v3284_v31 = vshrl.u32 %v8304_v15, 16 }
 0x49e   :  { %v3242_v62 = vor.u32 %v3241_v22, %v3237_v8  ;;  %v3262_v54 = vor.u32 %v3260_v24, %v3246_v5  ;;  %v3288_v23 = vshll.u32 %v8317_v6, 16  ;;  %v3266_v49 = vrot.slane %v3264_v44, 1 }
 0x49f   :  { %v8514_v47 = vsel %vm780_vm3, %v3270_v16, %v3274_v45  ;;  %v3276_v55 = vshrl.u32 %v8315_v3, 16  ;;  %v3280_v36 = vshll.u32 %v8325_v26, 16  ;;  %v3286_v1 = vor.u32 %v3284_v31, %v3274_v45 }
 0x4a0   :  { %v8519_v63 = vsel %vm780_vm3, %v3242_v62, %v3246_v5  ;;  %v8521_v52 = vrot.slane %v3288_v23, 1  ;;  %v8524_v24 = vsel %vm780_vm3, %v3262_v54, %v3266_v49  ;;  %v9604_v41 = vpack.c.bf16 %v8191_v20, %v9565_v30  ;;  %v9605_v5 = vld [vmem:[#allocation24_spill] sm:$0xff]  ;;  %v9607_v23 = vld [vmem:[#allocation25_spill] sm:$0xff] }
 0x4a1   :  { %v3278_v8 = vor.u32 %v3276_v55, %v3266_v49  ;;  %v3282_v28 = vrot.slane %v3280_v36, 1  ;;  %v8537_v16 = vpack.c.bf16 %v9605_v5, %v9605_v5  ;;  %v3292_v45 = vshrl.u32 %v8325_v26, 16  ;;  %v9608_v36 = vld [vmem:[#allocation26_spill] sm:$0xff] }
 0x4a2   :  { %v8533_v22 = vsel %vm780_vm3, %v3286_v1, %v8521_v52  ;;  %v2979_v44 = vsel %vm2771_vm10, %v9573_v25, 0.0  ;;  %v3383_v20 = vrot.slane %v8056_v11, 1  ;;  %v3384_v62 = vrot.slane %v8059_v39, 1  ;;  %v9609_v25 = vld [vmem:[#allocation27_spill] sm:$0xff] }
 0x4a3   :  { %4992 = vmatmul.mubr.msk.bf16.gmra.mrb[64].mxu0 %vm8041_vm12, %v9604_v41  ;;  %v8544_v30 = vsel %vm780_vm3, %v3278_v8, %v3282_v28  ;;  %v3294_v54 = vor.u32 %v3292_v45, %v3282_v28  ;;  %v3296_v31 = vshll.u32 %v8537_v16, 16  ;;  %v3380_v49 = vrot.slane %v9607_v23, 1 }
 0x4a4   :  { %3972 = vmatprep.mubr.bf16.mxu0 %v8216_v42  ;;  %9606 = vst [vmem:[#allocation24_spill] sm:$0xff] %v8544_v30  ;;  %v8551_v55 = vsel %vm961_vm8, %v3383_v20, %v3384_v62  ;;  %v3381_v1 = vrot.slane %v9608_v36, 1  ;;  %v3388_v41 = vrot.slane %v9609_v25, 1  ;;  %v3386_v5 = vrot.slane %v8090_v14, 1 }
 0x4a5   :  { %v8556_v8 = vpack.c.bf16 %v2979_v44, %v2979_v44  ;;  %v3298_v30 = vrot.slane %v3296_v31, 1  ;;  %v3392_v11 = vrot.slane %v8102_v43, 1  ;;  %v3390_v39 = vrot.slane %v8104_v48, 1 }
 0x4a6   :  { %v8561_v28 = vsel %vm961_vm8, %v3380_v49, %v3381_v1  ;;  %v8564_v45 = vsel %vm961_vm8, %v3384_v62, %v3388_v41  ;;  %v8567_v20 = vsel %vm961_vm8, %v3381_v1, %v3386_v5  ;;  %v3396_v23 = vrot.slane %v8360_v37, 1 }
 0x4a7   :  { %v8571_v14 = vsel %vm780_vm3, %v3294_v54, %v3298_v30  ;;  %v8574_v44 = vsel %vm961_vm8, %v3388_v41, %v3392_v11  ;;  %v8577_v43 = vsel %vm961_vm8, %v3386_v5, %v3390_v39  ;;  %v3394_v48 = vrot.slane %v8368_v0, 1 }
 0x4a8   :  { %v8581_v31 = vsel %vm961_vm8, %v3392_v11, %v3396_v23  ;;  %v3401_v62 = vrot.slane %v8114_v7, 1  ;;  %v3402_v49 = vrot.slane %v8136_v50, 1  ;;  %v3398_v37 = vrot.slane %v8126_v13, 1 }
 0x4a9   :  { %v8588_v30 = vsel %vm961_vm8, %v3390_v39, %v3394_v48  ;;  %v3399_v54 = vrot.slane %v8147_v34, 1  ;;  %v3406_v36 = vrot.slane %v8158_v27, 1  ;;  %v3404_v0 = vrot.slane %v8160_v33, 1 }
 0x4aa   :  { %v8595_v1 = vsel %vm961_vm8, %v3401_v62, %v3402_v49  ;;  %v3410_v7 = vrot.slane %v8168_v4, 1  ;;  %v3408_v13 = vrot.slane %v8182_v59, 1  ;;  %v3414_v50 = vrot.slane %v8413_v32, 1 }
 0x4ab   :  { %3973 = vmatmul.mubr.bf16.gmra.mrb[68].mxu0 %v8218_v38  ;;  %v8601_v25 = vsel %vm961_vm8, %v3398_v37, %v3399_v54  ;;  %v8604_v34 = vsel %vm961_vm8, %v3402_v49, %v3406_v36  ;;  %v8607_v27 = vsel %vm961_vm8, %v3399_v54, %v3404_v0  ;;  %v3412_v33 = vrot.slane %v8427_v58, 1 }
 0x4ac   :  { %3980 = vmatprep.mubr.bf16.mxu0 %v8226_v56  ;;  %v8611_v41 = vsel %vm961_vm8, %v3406_v36, %v3410_v7  ;;  %v8614_v4 = vsel %vm961_vm8, %v3404_v0, %v3408_v13  ;;  %v8617_v59 = vsel %vm961_vm8, %v3410_v7, %v3414_v50  ;;  %v3419_v32 = vrot.slane %v8195_v60, 1 }
 0x4ad   :  { %v8621_v5 = vsel %vm961_vm8, %v3408_v13, %v3412_v33  ;;  %v3420_v11 = vrot.slane %v8216_v42, 1  ;;  %v3416_v39 = vrot.slane %v8205_v2, 1  ;;  %v3417_v58 = vrot.slane %v8218_v38, 1 }
 0x4ae   :  { %v3424_v23 = vrot.slane %v8226_v56, 1  ;;  %v3422_v48 = vrot.slane %v8237_v40, 1  ;;  %v3428_v62 = vrot.slane %v8248_v53, 1  ;;  %v3426_v49 = vrot.slane %v8250_v61, 1 }
 0x4af   :  { %v8631_v37 = vsel %vm961_vm8, %v3419_v32, %v3420_v11  ;;  %v8634_v60 = vsel %vm961_vm8, %v3416_v39, %v3417_v58  ;;  %v3432_v42 = vrot.slane %v8470_v12, 1  ;;  %v3430_v2 = vrot.slane %v8475_v51, 1 }
 0x4b0   :  { %v8639_v38 = vsel %vm961_vm8, %v3420_v11, %v3424_v23  ;;  %v8642_v56 = vsel %vm961_vm8, %v3417_v58, %v3422_v48  ;;  %v8645_v54 = vsel %vm961_vm8, %v3424_v23, %v3428_v62  ;;  %v8648_v36 = vsel %vm961_vm8, %v3422_v48, %v3426_v49 }
 0x4b1   :  { %v8652_v0 = vsel %vm961_vm8, %v3428_v62, %v3432_v42  ;;  %v8655_v12 = vsel %vm961_vm8, %v3426_v49, %v3430_v2  ;;  %v3437_v51 = vrot.slane %v8260_v35, 1  ;;  %v3438_v7 = vrot.slane %v8284_v46, 1  ;;  %v9610_v2 = vld [vmem:[#allocation28_spill] sm:$0xff] }
 0x4b2   :  { %v3434_v13 = vrot.slane %v8273_v29, 1  ;;  %v3435_v50 = vrot.slane %v8293_v9, 1  ;;  %v3442_v33 = vrot.slane %v8304_v15, 1  ;;  %v3446_v11 = vrot.slane %v8317_v6, 1 }
 0x4b3   :  { %3981 = vmatmul.mubr.bf16.gmra.mrb[72].mxu0 %v8237_v40  ;;  %v3440_v40 = vrot.slane %v8315_v3, 1  ;;  %v8665_v32 = vsel %vm961_vm8, %v3437_v51, %v3438_v7  ;;  %v3444_v39 = vrot.slane %v8325_v26, 1  ;;  %v3450_v35 = vrot.slane %v8556_v8, 1  ;;  %v9611_v51 = vld [vmem:[#allocation32_spill] sm:$0xff] }
 0x4b4   :  { %3988 = vmatprep.mubr.bf16.mxu0 %v8248_v53  ;;  %v8671_v58 = vsel %vm961_vm8, %v3434_v13, %v3435_v50  ;;  %v8674_v53 = vsel %vm961_vm8, %v3438_v7, %v3442_v33  ;;  %v3448_v23 = vrot.slane %v8537_v16, 1  ;;  %v8681_v48 = vsel %vm961_vm8, %v3442_v33, %v3446_v11  ;;  %v9613_v16 = vld [vmem:[#allocation29_spill] sm:$0xff]  ;;  %v5737_v33 = vld [vmem:[#allocation5 + $0x148] sm:$0xff]  }
 0x4b5   :  { %v8677_v29 = vsel %vm961_vm8, %v3435_v50, %v3440_v40  ;;  %v8684_v62 = vsel %vm961_vm8, %v3440_v40, %v3444_v39  ;;  %v8687_v49 = vsel %vm961_vm8, %v3446_v11, %v3450_v35  ;;  %v9612_v7 = vpack.c.bf16 %v9610_v2, %v9611_v51  ;;  %v9614_v13 = vld [vmem:[#allocation21_spill] sm:$0xff]  ;;  %v9617_v40 = vld [vmem:[#allocation31_spill] sm:$0xff]  ;;  %v9618_v11 = vld [vmem:[#allocation34_spill] sm:$0xff] }
 0x4b6   :  { %v8690_v42 = vsel %vm961_vm8, %v3444_v39, %v3448_v23  ;;  %v9615_v50 = vpack.c.bf16 %v9613_v16, %v9614_v13  ;;  %v5745_v39 = vld [vmem:[#allocation5 + $0x168] sm:$0xff]   ;;  %v5747_v51 = vld [vmem:[#allocation5 + $0x170] sm:$0xff]   ;;  %v5749_v16 = vld [vmem:[#allocation5 + $0x178] sm:$0xff]  }
 0x4b7   :  { %v9619_v35 = vld [vmem:[#allocation11_spill] sm:$0xff]  ;;  %v9621_v13 = vld [vmem:[#allocation14_spill] sm:$0xff] }
 0x4b8   :  { %v9620_v23 = vld [vmem:[#allocation39_spill] sm:$0xff] }
 0x4b9   :  { %v5746_v2 = vld [vmem:[#allocation5 + $0x128] sm:$0xff]  }
 0x4bb   :  { %3989 = vmatmul.mubr.bf16.gmra.mrb[76].mxu0 %v8250_v61  ;;  %v5736_v61 = vld [vmem:[#allocation5 + $0x100] sm:$0xff]  }
 0x4bc   :  { %4996 = vmatprep.mubr.msk.bf16.mxu0 %vm8041_vm12, %v9612_v7  ;;  %v5748_v7 = vld [vmem:[#allocation5 + $0x130] sm:$0xff]  }
 0x4c3   :  { %5000 = vmatmul.mubr.msk.bf16.gmra.mrb[80].mxu0 %vm8041_vm12, %v9615_v50  ;;  %v9622_v50 = vld [vmem:[#allocation15_spill] sm:$0xff] }
 0x4c4   :  { %4004 = vmatprep.mubr.bf16.mxu0 %v8284_v46  ;;  %v5738_v46 = vld [vmem:[#allocation5 + $0x108] sm:$0xff]  }
 0x4cb   :  { %4005 = vmatmul.mubr.bf16.gmra.mrb[84].mxu0 %v8293_v9  ;;  %v5739_v9 = vld [vmem:[#allocation5 + $0x150] sm:$0xff]  }
 0x4cc   :  { %4012 = vmatprep.mubr.bf16.mxu0 %v8304_v15  ;;  %v5740_v15 = vld [vmem:[#allocation5 + $0x110] sm:$0xff]  }
 0x4d3   :  { %4013 = vmatmul.mubr.bf16.gmra.mrb[88].mxu0 %v8315_v3  ;;  %v5741_v3 = vld [vmem:[#allocation5 + $0x158] sm:$0xff]  }
 0x4d4   :  { %4020 = vmatprep.mubr.bf16.mxu0 %v8317_v6 }
 0x4db   :  { %4021 = vmatmul.mubr.bf16.gmra.mrb[92].mxu0 %v8325_v26  ;;  %v5742_v26 = vld [vmem:[#allocation5 + $0x118] sm:$0xff]  }
 0x4dc   :  { %4061 = vmatprep.mubr.bf16.mxu0 %v8346_v19  ;;  %v5743_v19 = vld [vmem:[#allocation5 + $0x160] sm:$0xff]  }
 0x4e3   :  { %4062 = vmatmul.mubr.bf16.vlgmr.msra.gmra.mrb[96].mxu0 %v8353_v57  ;;  %v5744_v57 = vld [vmem:[#allocation5 + $0x120] sm:$0xff]  }
 0x4e4   :  { %5252 = vmatpush3.bf16.msra.mxu0 %v5736_v61  ;;  %4069 = vmatprep.mubr.bf16.mxu0 %v9616_v10  ;;  %v5750_v61 = vld [vmem:[#allocation5 + $0x138] sm:$0xff]  }
 0x4e5   :  { %5253 = vmatprep.subr.bf16.mxu0 %v5737_v33  ;;  %v9623_v33 = vld [vmem:[#allocation17_spill] sm:$0xff] }
 0x4e6   :  { %v9624_v10 = vld [vmem:[#allocation13_spill] sm:$0xff] }
 0x4e8   :  { %5254 = vmatpush3.bf16.msra.mxu0 %v5738_v46  ;;  %v9625_v46 = vld [vmem:[#allocation19_spill] sm:$0xff] }
 0x4e9   :  { %5255 = vmatprep.subr.bf16.mxu0 %v5739_v9  ;;  %v9626_v9 = vld [vmem:[#allocation16_spill] sm:$0xff] }
 0x4eb   :  { %4070 = vmatmul.mubr.bf16.gmra.mrb[100].mxu0 %v9617_v40  ;;  %v9629_v40 = vld [vmem:[#allocation22_spill] sm:$0xff] }
 0x4ec   :  { %4077 = vmatprep.mubr.bf16.mxu0 %v9618_v11  ;;  %5256 = vmatpush3.bf16.msra.mxu0 %v5740_v15  ;;  %v9627_v15 = vld [vmem:[#allocation18_spill] sm:$0xff]  ;;  %v9630_v11 = vld [vmem:[#allocation35_spill] sm:$0xff] }
 0x4ed   :  { %5257 = vmatprep.subr.bf16.mxu0 %v5741_v3  ;;  %v9628_v3 = vld [vmem:[#allocation20_spill] sm:$0xff] }
 0x4f0   :  { %5258 = vmatpush3.bf16.msra.mxu0 %v5742_v26  ;;  %v9631_v26 = vld [vmem:[#allocation33_spill] sm:$0xff] }
 0x4f1   :  { %5259 = vmatprep.subr.bf16.mxu0 %v5743_v19  ;;  %v9632_v19 = vld [vmem:[#allocation37_spill] sm:$0xff] }
 0x4f3   :  { %4078 = vmatmul.mubr.bf16.gmra.mrb[104].mxu0 %v9619_v35  ;;  %v9635_v35 = vld [vmem:[#allocation38_spill] sm:$0xff] }
 0x4f4   :  { %4085 = vmatprep.mubr.bf16.mxu0 %v9620_v23  ;;  %5260 = vmatpush3.bf16.msra.mxu0 %v5744_v57  ;;  %v9633_v57 = vld [vmem:[#allocation36_spill] sm:$0xff] }
 0x4f5   :  { %5261 = vmatprep.subr.bf16.mxu0 %v5745_v39  ;;  %v9634_v39 = vld [vmem:[#allocation23_spill] sm:$0xff] }
 0x4f8   :  { %5262 = vmatpush3.bf16.msra.mxu0 %v5746_v2 }
 0x4f9   :  { %5263 = vmatprep.subr.bf16.mxu0 %v5747_v51 }
 0x4fb   :  { %4086 = vmatmul.mubr.bf16.gmra.mrb[108].mxu0 %v9621_v13 }
 0x4fc   :  { %4093 = vmatprep.mubr.bf16.mxu0 %v9622_v50  ;;  %5264 = vmatpush3.bf16.msra.mxu0 %v5748_v7 }
 0x4fd   :  { %5265 = vmatprep.subr.bf16.mxu0 %v5749_v16 }
 0x500   :  { %5266 = vmatpush3.bf16.msra.mxu0 %v5750_v61 }
 0x503   :  { %4094 = vmatmul.mubr.bf16.gmra.mrb[112].mxu0 %v9623_v33 }
 0x504   :  { %4101 = vmatprep.mubr.bf16.mxu0 %v9624_v10 }
 0x50b   :  { %4102 = vmatmul.mubr.bf16.gmra.mrb[116].mxu0 %v9625_v46 }
 0x50c   :  { %4109 = vmatprep.mubr.bf16.mxu0 %v9626_v9 }
 0x513   :  { %4110 = vmatmul.mubr.bf16.gmra.mrb[120].mxu0 %v9627_v15 }
 0x514   :  { %4117 = vmatprep.mubr.bf16.mxu0 %v9628_v3 }
 0x51b   :  { %4118 = vmatmul.mubr.bf16.gmra.mrb[124].mxu0 %v9629_v40 }
 0x51c   :  { %4125 = vmatprep.mubr.bf16.mxu0 %v9630_v11 }
 0x523   :  { %4126 = vmatmul.mubr.bf16.gmra.mrb[128].mxu0 %v9631_v26  ;;  %v3304_v26 = vshll.u32 %v8556_v8, 16 }
 0x524   :  { %4133 = vmatprep.mubr.bf16.mxu0 %v9632_v19 }
 0x52b   :  { %4134 = vmatmul.mubr.bf16.gmra.mrb[132].mxu0 %v9633_v57 }
 0x52c   :  { %4141 = vmatprep.mubr.bf16.mxu0 %v9634_v39 }
 0x533   :  { %4142 = vmatmul.mubr.bf16.gmra.mrb[136].mxu0 %v9635_v35 }
 0x534   :  { %4149 = vmatprep.mubr.bf16.mxu0 %v8500_v18 }
 0x535   :  { %v5043_v23 = vpop.f32.mrb[32].mxu0 }
 0x536   :  { %v5044_v2 = vpop.f32.mrb[33].mxu0 }
 0x537   :  { %v8732_v51 = vadd.f32 %v5044_v2, %v5043_v23  ;;  %v5046_v7 = vpop.f32.mrb[34].mxu0  ;;  %v3306_v23 = vrot.slane %v3304_v26, 1 }
 0x538   :  { %v5047_v16 = vpop.f32.mrb[35].mxu0 }
 0x539   :  { %v8734_v13 = vadd.f32 %v5047_v16, %v5046_v7  ;;  %v9636_v7 = vld [vmem:[#allocation24_spill] sm:$0xff] }
 0x53b   :  { %4150 = vmatmul.mubr.bf16.gmra.mrb[140].mxu0 %v8504_v17 }
 0x53c   :  { %4157 = vmatprep.mubr.bf16.mxu0 %v8508_v21  ;;  %v3300_v21 = vshrl.u32 %v8317_v6, 16 }
 0x53d   :  { %v5049_v50 = vpop.f32.mrb[36].mxu0 }
 0x53e   :  { %v5050_v61 = vpop.f32.mrb[37].mxu0 }
 0x53f   :  { %v8738_v33 = vadd.f32 %v5050_v61, %v5049_v50  ;;  %v5052_v10 = vpop.f32.mrb[38].mxu0 }
 0x540   :  { %v5053_v46 = vpop.f32.mrb[39].mxu0 }
 0x541   :  { %v8740_v9 = vadd.f32 %v5053_v46, %v5052_v10 }
 0x543   :  { %4158 = vmatmul.mubr.bf16.gmra.mrb[144].mxu0 %v8519_v63 }
 0x544   :  { %4165 = vmatprep.mubr.bf16.mxu0 %v8514_v47  ;;  %v3302_v47 = vor.u32 %v3300_v21, %v8521_v52 }
 0x545   :  { %v5055_v18 = vpop.f32.mrb[40].mxu0 }
 0x546   :  { %v5056_v15 = vpop.f32.mrb[41].mxu0 }
 0x547   :  { %v8744_v3 = vadd.f32 %v5056_v15, %v5055_v18  ;;  %v5058_v40 = vpop.f32.mrb[42].mxu0 }
 0x548   :  { %v5059_v17 = vpop.f32.mrb[43].mxu0 }
 0x549   :  { %v8746_v11 = vadd.f32 %v5059_v17, %v5058_v40 }
 0x54b   :  { %4166 = vmatmul.mubr.bf16.gmra.mrb[148].mxu0 %v8524_v24  ;;  %v3307_v24 = vsel %vm780_vm3, %v3302_v47, %v3306_v23 }
 0x54c   :  { %4173 = vmatprep.mubr.bf16.mxu0 %v8533_v22 }
 0x54d   :  { %v5061_v19 = vpop.f32.mrb[44].mxu0 }
 0x54e   :  { %v5062_v63 = vpop.f32.mrb[45].mxu0 }
 0x54f   :  { %v8753_v57 = vadd.f32 %v5062_v63, %v5061_v19  ;;  %v5064_v39 = vpop.f32.mrb[46].mxu0 }
 0x550   :  { %v5065_v35 = vpop.f32.mrb[47].mxu0 }
 0x551   :  { %v8755_v2 = vadd.f32 %v5065_v35, %v5064_v39 }
 0x553   :  { %4174 = vmatmul.mubr.bf16.gmra.mrb[152].mxu0 %v9636_v7 }
 0x554   :  { %4181 = vmatprep.mubr.bf16.mxu0 %v3307_v24 }
 0x556   :  { %v5067_v22 = vpop.f32.mrb[48].mxu0 }
 0x557   :  { %v5068_v6 = vpop.f32.mrb[49].mxu0 }
 0x558   :  { %v8759_v16 = vadd.f32 %v5068_v6, %v5067_v22  ;;  %v5070_v8 = vpop.f32.mrb[50].mxu0 }
 0x559   :  { %v5071_v50 = vpop.f32.mrb[51].mxu0 }
 0x55a   :  { %v8761_v61 = vadd.f32 %v5071_v50, %v5070_v8 }
 0x55b   :  { %4182 = vmatmul.mubr.bf16.gmra.mrb[156].mxu0 %v8571_v14 }
 0x55c   :  { %4222 = vmatprep.mubr.bf16.mxu0 %v8551_v55 }
 0x55e   :  { %v5073_v52 = vpop.f32.mrb[52].mxu0 }
 0x55f   :  { %v5074_v10 = vpop.f32.mrb[53].mxu0 }
 0x560   :  { %v8765_v46 = vadd.f32 %v5074_v10, %v5073_v52  ;;  %v5076_v18 = vpop.f32.mrb[54].mxu0 }
 0x561   :  { %v5077_v15 = vpop.f32.mrb[55].mxu0 }
 0x562   :  { %v8767_v40 = vadd.f32 %v5077_v15, %v5076_v18 }
 0x563   :  { %4223 = vmatmul.mubr.bf16.vlgmr.msra.gmra.mrb[160].mxu0 %v8561_v28 }
 0x564   :  { %4230 = vmatprep.mubr.bf16.mxu0 %v8564_v45 }
 0x566   :  { %v5079_v17 = vpop.f32.mrb[56].mxu0 }
 0x567   :  { %v5080_v21 = vpop.f32.mrb[57].mxu0 }
 0x568   :  { %v8771_v26 = vadd.f32 %v5080_v21, %v5079_v17  ;;  %v5082_v19 = vpop.f32.mrb[58].mxu0 }
 0x569   :  { %v5083_v14 = vpop.f32.mrb[59].mxu0 }
 0x56a   :  { %v8773_v63 = vadd.f32 %v5083_v14, %v5082_v19 }
 0x56b   :  { %4231 = vmatmul.mubr.bf16.gmra.mrb[164].mxu0 %v8567_v20 }
 0x56c   :  { %4238 = vmatprep.mubr.bf16.mxu0 %v8574_v44 }
 0x56e   :  { %v5085_v55 = vpop.f32.mrb[60].mxu0 }
 0x56f   :  { %v5086_v47 = vpop.f32.mrb[61].mxu0 }
 0x570   :  { %v8777_v39 = vadd.f32 %v5086_v47, %v5085_v55  ;;  %v5088_v35 = vpop.f32.mrb[62].mxu0 }
 0x571   :  { %v5089_v28 = vpop.f32.mrb[63].mxu0 }
 0x572   :  { %v8779_v23 = vadd.f32 %v5089_v28, %v5088_v35 }
 0x573   :  { %4239 = vmatmul.mubr.bf16.gmra.mrb[168].mxu0 %v8577_v43 }
 0x574   :  { %4246 = vmatprep.mubr.bf16.mxu0 %v8581_v31 }
 0x576   :  { %v5091_v45 = vpop.f32.mrb[64].mxu0 }
 0x577   :  { %v5092_v7 = vpop.f32.mrb[65].mxu0 }
 0x578   :  { %v8783_v24 = vadd.f32 %v5092_v7, %v5091_v45  ;;  %v5094_v22 = vpop.f32.mrb[66].mxu0 }
 0x579   :  { %v5095_v20 = vpop.f32.mrb[67].mxu0 }
 0x57a   :  { %v8785_v6 = vadd.f32 %v5095_v20, %v5094_v22 }
 0x57b   :  { %4247 = vmatmul.mubr.bf16.gmra.mrb[172].mxu0 %v8588_v30 }
 0x57c   :  { %4254 = vmatprep.mubr.bf16.mxu0 %v8595_v1 }
 0x57e   :  { %v5097_v44 = vpop.f32.mrb[68].mxu0 }
 0x57f   :  { %v5098_v8 = vpop.f32.mrb[69].mxu0 }
 0x580   :  { %v8789_v50 = vadd.f32 %v5098_v8, %v5097_v44  ;;  %v5100_v52 = vpop.f32.mrb[70].mxu0 }
 0x581   :  { %v5101_v43 = vpop.f32.mrb[71].mxu0 }
 0x582   :  { %v8791_v10 = vadd.f32 %v5101_v43, %v5100_v52 }
 0x583   :  { %4255 = vmatmul.mubr.bf16.gmra.mrb[176].mxu0 %v8601_v25 }
 0x584   :  { %4262 = vmatprep.mubr.bf16.mxu0 %v8604_v34 }
 0x586   :  { %v5103_v31 = vpop.f32.mrb[72].mxu0 }
 0x587   :  { %v5104_v18 = vpop.f32.mrb[73].mxu0 }
 0x588   :  { %v8795_v15 = vadd.f32 %v5104_v18, %v5103_v31  ;;  %v5106_v17 = vpop.f32.mrb[74].mxu0 }
 0x589   :  { %v5107_v30 = vpop.f32.mrb[75].mxu0 }
 0x58a   :  { %v8797_v21 = vadd.f32 %v5107_v30, %v5106_v17 }
 0x58b   :  { %4263 = vmatmul.mubr.bf16.gmra.mrb[180].mxu0 %v8607_v27 }
 0x58c   :  { %4270 = vmatprep.mubr.bf16.mxu0 %v8611_v41 }
 0x58e   :  { %v5109_v1 = vpop.f32.mrb[76].mxu0 }
 0x58f   :  { %v5110_v19 = vpop.f32.mrb[77].mxu0 }
 0x590   :  { %v8801_v14 = vadd.f32 %v5110_v19, %v5109_v1  ;;  %v5112_v55 = vpop.f32.mrb[78].mxu0 }
 0x591   :  { %v5113_v25 = vpop.f32.mrb[79].mxu0 }
 0x592   :  { %v8803_v47 = vadd.f32 %v5113_v25, %v5112_v55 }
 0x593   :  { %4271 = vmatmul.mubr.bf16.gmra.mrb[184].mxu0 %v8614_v4 }
 0x594   :  { %4278 = vmatprep.mubr.bf16.mxu0 %v8617_v59 }
 0x596   :  { %v5115_v34 = vpop.f32.mrb[80].mxu0 }
 0x597   :  { %v5116_v35 = vpop.f32.mrb[81].mxu0 }
 0x598   :  { %v8807_v28 = vadd.f32 %v5116_v35, %v5115_v34  ;;  %v5118_v45 = vpop.f32.mrb[82].mxu0 }
 0x599   :  { %v5119_v27 = vpop.f32.mrb[83].mxu0 }
 0x59a   :  { %v8809_v7 = vadd.f32 %v5119_v27, %v5118_v45 }
 0x59b   :  { %4279 = vmatmul.mubr.bf16.gmra.mrb[188].mxu0 %v8621_v5 }
 0x59c   :  { %4286 = vmatprep.mubr.bf16.mxu0 %v8631_v37 }
 0x59e   :  { %v5121_v41 = vpop.f32.mrb[84].mxu0 }
 0x59f   :  { %v5122_v22 = vpop.f32.mrb[85].mxu0 }
 0x5a0   :  { %v8813_v20 = vadd.f32 %v5122_v22, %v5121_v41  ;;  %v5124_v44 = vpop.f32.mrb[86].mxu0 }
 0x5a1   :  { %v5125_v4 = vpop.f32.mrb[87].mxu0 }
 0x5a2   :  { %v8815_v8 = vadd.f32 %v5125_v4, %v5124_v44 }
 0x5a3   :  { %4287 = vmatmul.mubr.bf16.gmra.mrb[192].mxu0 %v8634_v60 }
 0x5a4   :  { %4294 = vmatprep.mubr.bf16.mxu0 %v8639_v38 }
 0x5a6   :  { %v5127_v59 = vpop.f32.mrb[88].mxu0 }
 0x5a7   :  { %v5128_v52 = vpop.f32.mrb[89].mxu0 }
 0x5a8   :  { %v8819_v43 = vadd.f32 %v5128_v52, %v5127_v59  ;;  %v5130_v31 = vpop.f32.mrb[90].mxu0 }
 0x5a9   :  { %v5131_v5 = vpop.f32.mrb[91].mxu0 }
 0x5aa   :  { %v8821_v18 = vadd.f32 %v5131_v5, %v5130_v31 }
 0x5ab   :  { %4295 = vmatmul.mubr.bf16.gmra.mrb[196].mxu0 %v8642_v56 }
 0x5ac   :  { %4302 = vmatprep.mubr.bf16.mxu0 %v8645_v54 }
 0x5ae   :  { %v5133_v37 = vpop.f32.mrb[92].mxu0 }
 0x5af   :  { %v5134_v17 = vpop.f32.mrb[93].mxu0 }
 0x5b0   :  { %v8825_v30 = vadd.f32 %v5134_v17, %v5133_v37  ;;  %v5136_v1 = vpop.f32.mrb[94].mxu0 }
 0x5b1   :  { %v5137_v60 = vpop.f32.mrb[95].mxu0 }
 0x5b2   :  { %v8827_v19 = vadd.f32 %v5137_v60, %v5136_v1 }
 0x5b3   :  { %4303 = vmatmul.mubr.bf16.gmra.mrb[200].mxu0 %v8648_v36 }
 0x5b4   :  { %4310 = vmatprep.mubr.bf16.mxu0 %v8652_v0 }
 0x5b6   :  { %v5155_v38 = vpop.f32.mrb[96].mxu0 }
 0x5b7   :  { %v5156_v55 = vpop.f32.mrb[97].mxu0 }
 0x5b8   :  { %v5157_v25 = vadd.f32 %v5156_v55, %v5155_v38  ;;  %v5158_v34 = vpop.f32.mrb[98].mxu0 }
 0x5b9   :  { %v5159_v35 = vpop.f32.mrb[99].mxu0 }
 0x5ba   :  { %v8832_v56 = vadd.f32 %v5157_v25, %v8732_v51  ;;  %v5160_v54 = vadd.f32 %v5159_v35, %v5158_v34 }
 0x5bb   :  { %4311 = vmatmul.mubr.bf16.gmra.mrb[204].mxu0 %v8655_v12 }
 0x5bc   :  { %v8836_v45 = vadd.f32 %v5160_v54, %v8734_v13  ;;  %4318 = vmatprep.mubr.bf16.mxu0 %v8665_v32 }
 0x5be   :  { %v5161_v27 = vpop.f32.mrb[100].mxu0 }
 0x5bf   :  { %v5162_v36 = vpop.f32.mrb[101].mxu0 }
 0x5c0   :  { %v5163_v41 = vadd.f32 %v5162_v36, %v5161_v27  ;;  %v5164_v0 = vpop.f32.mrb[102].mxu0 }
 0x5c1   :  { %v5165_v22 = vpop.f32.mrb[103].mxu0 }
 0x5c2   :  { %v8840_v44 = vadd.f32 %v5163_v41, %v8738_v33  ;;  %v5166_v4 = vadd.f32 %v5165_v22, %v5164_v0 }
 0x5c3   :  { %4319 = vmatmul.mubr.bf16.gmra.mrb[208].mxu0 %v8671_v58 }
 0x5c4   :  { %v8844_v51 = vadd.f32 %v5166_v4, %v8740_v9  ;;  %4326 = vmatprep.mubr.bf16.mxu0 %v8674_v53 }
 0x5c6   :  { %v5167_v12 = vpop.f32.mrb[104].mxu0 }
 0x5c7   :  { %v5168_v13 = vpop.f32.mrb[105].mxu0 }
 0x5c8   :  { %v5169_v59 = vadd.f32 %v5168_v13, %v5167_v12  ;;  %v5170_v32 = vpop.f32.mrb[106].mxu0 }
 0x5c9   :  { %v5171_v52 = vpop.f32.mrb[107].mxu0 }
 0x5ca   :  { %v8848_v31 = vadd.f32 %v5169_v59, %v8744_v3  ;;  %v5172_v5 = vadd.f32 %v5171_v52, %v5170_v32 }
 0x5cb   :  { %4327 = vmatmul.mubr.bf16.gmra.mrb[212].mxu0 %v8677_v29 }
 0x5cc   :  { %v8852_v33 = vadd.f32 %v5172_v5, %v8746_v11  ;;  %4334 = vmatprep.mubr.bf16.mxu0 %v8681_v48 }
 0x5ce   :  { %v5173_v58 = vpop.f32.mrb[108].mxu0 }
 0x5cf   :  { %v5174_v9 = vpop.f32.mrb[109].mxu0 }
 0x5d0   :  { %v5175_v37 = vadd.f32 %v5174_v9, %v5173_v58  ;;  %v5176_v53 = vpop.f32.mrb[110].mxu0 }
 0x5d1   :  { %v5177_v17 = vpop.f32.mrb[111].mxu0 }
 0x5d2   :  { %v8856_v1 = vadd.f32 %v5175_v37, %v8753_v57  ;;  %v5178_v60 = vadd.f32 %v5177_v17, %v5176_v53 }
 0x5d3   :  { %4335 = vmatmul.mubr.bf16.gmra.mrb[216].mxu0 %v8684_v62 }
 0x5d4   :  { %v8860_v3 = vadd.f32 %v5178_v60, %v8755_v2  ;;  %4342 = vmatprep.mubr.bf16.mxu0 %v8687_v49 }
 0x5d6   :  { %v5179_v29 = vpop.f32.mrb[112].mxu0 }
 0x5d7   :  { %v5180_v11 = vpop.f32.mrb[113].mxu0 }
 0x5d8   :  { %v5181_v38 = vadd.f32 %v5180_v11, %v5179_v29  ;;  %v5182_v48 = vpop.f32.mrb[114].mxu0 }
 0x5d9   :  { %v5183_v55 = vpop.f32.mrb[115].mxu0 }
 0x5da   :  { %v8864_v25 = vadd.f32 %v5181_v38, %v8759_v16  ;;  %v5184_v34 = vadd.f32 %v5183_v55, %v5182_v48 }
 0x5db   :  { %4343 = vmatmul.mubr.bf16.gmra.mrb[220].mxu0 %v8690_v42 }
 0x5dc   :  { %v8868_v57 = vadd.f32 %v5184_v34, %v8761_v61 }
 0x5de   :  { %v5185_v62 = vpop.f32.mrb[116].mxu0 }
 0x5df   :  { %v5186_v35 = vpop.f32.mrb[117].mxu0 }
 0x5e0   :  { %v5187_v2 = vadd.f32 %v5186_v35, %v5185_v62  ;;  %v5188_v54 = vpop.f32.mrb[118].mxu0 }
 0x5e1   :  { %v5189_v27 = vpop.f32.mrb[119].mxu0 }
 0x5e2   :  { %v8871_v49 = vadd.f32 %v5187_v2, %v8765_v46  ;;  %v5190_v36 = vadd.f32 %v5189_v27, %v5188_v54 }
 0x5e4   :  { %v8874_v41 = vadd.f32 %v5190_v36, %v8767_v40 }
 0x5e6   :  { %v5191_v16 = vpop.f32.mrb[120].mxu0 }
 0x5e7   :  { %v5192_v0 = vpop.f32.mrb[121].mxu0 }
 0x5e8   :  { %v5193_v22 = vadd.f32 %v5192_v0, %v5191_v16  ;;  %v5194_v4 = vpop.f32.mrb[122].mxu0 }
 0x5e9   :  { %v5195_v42 = vpop.f32.mrb[123].mxu0 }
 0x5ea   :  { %v8877_v61 = vadd.f32 %v5193_v22, %v8771_v26  ;;  %v5196_v12 = vadd.f32 %v5195_v42, %v5194_v4 }
 0x5ec   :  { %v8880_v13 = vadd.f32 %v5196_v12, %v8773_v63 }
 0x5ee   :  { %v5197_v59 = vpop.f32.mrb[124].mxu0 }
 0x5ef   :  { %v5198_v32 = vpop.f32.mrb[125].mxu0 }
 0x5f0   :  { %v5199_v46 = vadd.f32 %v5198_v32, %v5197_v59  ;;  %v5200_v52 = vpop.f32.mrb[126].mxu0 }
 0x5f1   :  { %v5201_v5 = vpop.f32.mrb[127].mxu0 }
 0x5f2   :  { %v8883_v40 = vadd.f32 %v5199_v46, %v8777_v39  ;;  %v5202_v58 = vadd.f32 %v5201_v5, %v5200_v52 }
 0x5f4   :  { %v8886_v9 = vadd.f32 %v5202_v58, %v8779_v23 }
 0x5f6   :  { %v5203_v37 = vpop.f32.mrb[128].mxu0 }
 0x5f7   :  { %v5204_v53 = vpop.f32.mrb[129].mxu0 }
 0x5f8   :  { %v5205_v26 = vadd.f32 %v5204_v53, %v5203_v37  ;;  %v5206_v17 = vpop.f32.mrb[130].mxu0 }
 0x5f9   :  { %v5207_v60 = vpop.f32.mrb[131].mxu0 }
 0x5fa   :  { %v8889_v63 = vadd.f32 %v5205_v26, %v8783_v24  ;;  %v5208_v29 = vadd.f32 %v5207_v60, %v5206_v17 }
 0x5fc   :  { %v8892_v11 = vadd.f32 %v5208_v29, %v8785_v6 }
 0x5fe   :  { %v5209_v38 = vpop.f32.mrb[132].mxu0 }
 0x5ff   :  { %v5210_v48 = vpop.f32.mrb[133].mxu0 }
 0x600   :  { %v5211_v39 = vadd.f32 %v5210_v48, %v5209_v38  ;;  %v5212_v55 = vpop.f32.mrb[134].mxu0 }
 0x601   :  { %v5213_v34 = vpop.f32.mrb[135].mxu0 }
 0x602   :  { %v8895_v23 = vadd.f32 %v5211_v39, %v8789_v50  ;;  %v5214_v62 = vadd.f32 %v5213_v34, %v5212_v55  ;;  %v5751_v50 = vld [vmem:[%s9238_s10] sm:$0xff]  }
 0x604   :  { %v8898_v35 = vadd.f32 %v5214_v62, %v8791_v10  ;;  %v5852_v10 = vmov 0.0  }
 0x605   :  { %5406 = vmatprep.subr.bf16.mxu1 %v5852_v10  ;;  %5422 = vmatprep.mubr.msk.bf16.mxu1 %vm5853_vm13, %v5852_v10 }
 0x606   :  { %v5215_v2 = vpop.f32.mrb[136].mxu0  ;;  %5407 = vmatpush3.bf16.msra.mxu1 %v5751_v50 }
 0x607   :  { %v5216_v54 = vpop.f32.mrb[137].mxu0  ;;  %5408 = vmatprep.subr.bf16.mxu1 %v5852_v10 }
 0x608   :  { %v5217_v24 = vadd.f32 %v5216_v54, %v5215_v2  ;;  %v5218_v27 = vpop.f32.mrb[138].mxu0 }
 0x609   :  { %v5219_v36 = vpop.f32.mrb[139].mxu0 }
 0x60a   :  { %v8901_v6 = vadd.f32 %v5217_v24, %v8795_v15  ;;  %v5220_v16 = vadd.f32 %v5219_v36, %v5218_v27 }
 0x60c   :  { %v8904_v0 = vadd.f32 %v5220_v16, %v8797_v21 }
 0x60e   :  { %v5221_v22 = vpop.f32.mrb[140].mxu0 }
 0x60f   :  { %v5222_v4 = vpop.f32.mrb[141].mxu0 }
 0x610   :  { %v5223_v42 = vadd.f32 %v5222_v4, %v5221_v22  ;;  %v5224_v12 = vpop.f32.mrb[142].mxu0 }
 0x611   :  { %v5225_v59 = vpop.f32.mrb[143].mxu0 }
 0x612   :  { %v8912_v15 = vadd.f32 %v5223_v42, %v8801_v14  ;;  %v5226_v21 = vadd.f32 %v5225_v59, %v5224_v12  ;;  %v5752_v14 = vld [vmem:[%s9238_s10 + $0x8] sm:$0xff]  }
 0x613   :  { %5409 = vmatpush3.bf16.msra.mxu1 %v5752_v14 }
 0x614   :  { %v8915_v32 = vadd.f32 %v5226_v21, %v8803_v47  ;;  %5410 = vmatprep.subr.bf16.mxu1 %v5852_v10 }
 0x616   :  { %v5227_v46 = vpop.f32.mrb[144].mxu0 }
 0x617   :  { %v5228_v52 = vpop.f32.mrb[145].mxu0 }
 0x618   :  { %v5229_v5 = vadd.f32 %v5228_v52, %v5227_v46  ;;  %v5230_v58 = vpop.f32.mrb[146].mxu0 }
 0x619   :  { %v5231_v37 = vpop.f32.mrb[147].mxu0 }
 0x61a   :  { %v8918_v53 = vadd.f32 %v5229_v5, %v8807_v28  ;;  %v5232_v26 = vadd.f32 %v5231_v37, %v5230_v58 }
 0x61c   :  { %v8921_v17 = vadd.f32 %v5232_v26, %v8809_v7 }
 0x61e   :  { %v5233_v60 = vpop.f32.mrb[148].mxu0 }
 0x61f   :  { %v5234_v29 = vpop.f32.mrb[149].mxu0 }
 0x620   :  { %v5235_v47 = vadd.f32 %v5234_v29, %v5233_v60  ;;  %v5236_v38 = vpop.f32.mrb[150].mxu0 }
 0x621   :  { %v5237_v48 = vpop.f32.mrb[151].mxu0 }
 0x622   :  { %v8928_v39 = vadd.f32 %v5235_v47, %v8813_v20  ;;  %v5238_v28 = vadd.f32 %v5237_v48, %v5236_v38  ;;  %v5753_v20 = vld [vmem:[%s9238_s10 + $0x10] sm:$0xff]  }
 0x623   :  { %5411 = vmatpush3.bf16.msra.mxu1 %v5753_v20 }
 0x624   :  { %v8931_v55 = vadd.f32 %v5238_v28, %v8815_v8  ;;  %5412 = vmatprep.subr.bf16.mxu1 %v5852_v10 }
 0x626   :  { %v5239_v7 = vpop.f32.mrb[152].mxu0 }
 0x627   :  { %v5240_v34 = vpop.f32.mrb[153].mxu0 }
 0x628   :  { %v5241_v62 = vadd.f32 %v5240_v34, %v5239_v7  ;;  %v5242_v2 = vpop.f32.mrb[154].mxu0 }
 0x629   :  { %v5243_v54 = vpop.f32.mrb[155].mxu0 }
 0x62a   :  { %v8934_v24 = vadd.f32 %v5241_v62, %v8819_v43  ;;  %v5244_v27 = vadd.f32 %v5243_v54, %v5242_v2 }
 0x62c   :  { %v8937_v36 = vadd.f32 %v5244_v27, %v8821_v18 }
 0x62e   :  { %v5245_v16 = vpop.f32.mrb[156].mxu0 }
 0x62f   :  { %v5246_v22 = vpop.f32.mrb[157].mxu0 }
 0x630   :  { %v5247_v8 = vadd.f32 %v5246_v22, %v5245_v16  ;;  %v5248_v50 = vpop.f32.mrb[158].mxu0 }
 0x631   :  { %v5249_v4 = vpop.f32.mrb[159].mxu0 }
 0x632   :  { %v8944_v42 = vadd.f32 %v5247_v8, %v8825_v30  ;;  %v5250_v43 = vadd.f32 %v5249_v4, %v5248_v50 }
 0x634   :  { %v8947_v12 = vadd.f32 %v5250_v43, %v8827_v19 }
 0x636   :  { %v5267_v18 = vpop.f32.mrb[160].mxu0 }
 0x637   :  { %v5268_v59 = vpop.f32.mrb[161].mxu0 }
 0x638   :  { %v5269_v21 = vadd.f32 %v5268_v59, %v5267_v18  ;;  %v5270_v46 = vpop.f32.mrb[162].mxu0 }
 0x639   :  { %v5271_v52 = vpop.f32.mrb[163].mxu0 }
 0x63a   :  { %v8950_v5 = vadd.f32 %v5269_v21, %v8832_v56  ;;  %v5272_v58 = vadd.f32 %v5271_v52, %v5270_v46 }
 0x63c   :  { %v8953_v37 = vadd.f32 %v5272_v58, %v8836_v45 }
 0x63e   :  { %v5273_v26 = vpop.f32.mrb[164].mxu0  ;;  %v4385_v43 = vadd.f32 %v8953_v37, %v8950_v5 }
 0x63f   :  { %v5274_v60 = vpop.f32.mrb[165].mxu0 }
 0x640   :  { %v5275_v30 = vadd.f32 %v5274_v60, %v5273_v26  ;;  %v5276_v14 = vpop.f32.mrb[166].mxu0 }
 0x641   :  { %v5277_v29 = vpop.f32.mrb[167].mxu0 }
 0x642   :  { %v8956_v19 = vadd.f32 %v5275_v30, %v8840_v44  ;;  %v5278_v47 = vadd.f32 %v5277_v29, %v5276_v14 }
 0x644   :  { %v8959_v38 = vadd.f32 %v5278_v47, %v8844_v51  ;;  %v4355_v18 = vmul.f32 %v8956_v19, %v8956_v19 }
 0x646   :  { %v5279_v48 = vpop.f32.mrb[168].mxu0  ;;  %v4356_v60 = vmul.f32 %v8959_v38, %v8959_v38 }
 0x647   :  { %v5280_v28 = vpop.f32.mrb[169].mxu0 }
 0x648   :  { %v5281_v56 = vadd.f32 %v5280_v28, %v5279_v48  ;;  %v5282_v7 = vpop.f32.mrb[170].mxu0 }
 0x649   :  { %v5283_v34 = vpop.f32.mrb[171].mxu0 }
 0x64a   :  { %v8962_v45 = vadd.f32 %v5281_v56, %v8848_v31  ;;  %v5284_v62 = vadd.f32 %v5283_v34, %v5282_v7  ;;  %v4354_v31 = vmul.f32 %v8953_v37, %v8953_v37 }
 0x64c   :  { %v8965_v2 = vadd.f32 %v5284_v62, %v8852_v33  ;;  %v4353_v33 = vmul.f32 %v8950_v5, %v8950_v5  ;;  %v4357_v29 = vmul.f32 %v8962_v45, %v8962_v45 }
 0x64e   :  { %v5285_v54 = vpop.f32.mrb[172].mxu0  ;;  %v4422_v46 = vadd.f32 %v4354_v31, %v4353_v33 }
 0x64f   :  { %v5286_v27 = vpop.f32.mrb[173].mxu0 }
 0x650   :  { %v5287_v44 = vadd.f32 %v5286_v27, %v5285_v54  ;;  %v5288_v16 = vpop.f32.mrb[174].mxu0  ;;  %v4423_v26 = vadd.f32 %v4422_v46, %v4355_v18  ;;  %v4358_v54 = vmul.f32 %v8965_v2, %v8965_v2 }
 0x651   :  { %v5289_v20 = vpop.f32.mrb[175].mxu0 }
 0x652   :  { %v8968_v51 = vadd.f32 %v5287_v44, %v8856_v1  ;;  %v5290_v22 = vadd.f32 %v5289_v20, %v5288_v16  ;;  %v4424_v28 = vadd.f32 %v4423_v26, %v4356_v60 }
 0x654   :  { %v8971_v8 = vadd.f32 %v5290_v22, %v8860_v3  ;;  %v4386_v3 = vadd.f32 %v4385_v43, %v8956_v19  ;;  %v4425_v62 = vadd.f32 %v4424_v28, %v4357_v29  ;;  %v4359_v16 = vmul.f32 %v8968_v51, %v8968_v51 }
 0x656   :  { %v5291_v50 = vpop.f32.mrb[176].mxu0  ;;  %v4387_v14 = vadd.f32 %v4386_v3, %v8959_v38  ;;  %v4426_v22 = vadd.f32 %v4425_v62, %v4358_v54  ;;  %v4360_v43 = vmul.f32 %v8971_v8, %v8971_v8 }
 0x657   :  { %v5292_v4 = vpop.f32.mrb[177].mxu0 }
 0x658   :  { %v5293_v1 = vadd.f32 %v5292_v4, %v5291_v50  ;;  %v5294_v59 = vpop.f32.mrb[178].mxu0  ;;  %v4388_v56 = vadd.f32 %v4387_v14, %v8962_v45  ;;  %v4427_v33 = vadd.f32 %v4426_v22, %v4359_v16 }
 0x659   :  { %v5295_v21 = vpop.f32.mrb[179].mxu0 }
 0x65a   :  { %v8983_v52 = vadd.f32 %v5293_v1, %v8864_v25  ;;  %v5296_v58 = vadd.f32 %v5295_v21, %v5294_v59  ;;  %v4389_v44 = vadd.f32 %v4388_v56, %v8965_v2  ;;  %v4428_v3 = vadd.f32 %v4427_v33, %v4360_v43 }
 0x65c   :  { %v8988_v30 = vadd.f32 %v5296_v58, %v8868_v57  ;;  %v4390_v31 = vadd.f32 %v4389_v44, %v8968_v51  ;;  %v4361_v21 = vmul.f32 %v8983_v52, %v8983_v52 }
 0x65e   :  { %v5297_v47 = vpop.f32.mrb[180].mxu0  ;;  %v4391_v59 = vadd.f32 %v4390_v31, %v8971_v8  ;;  %v4429_v60 = vadd.f32 %v4428_v3, %v4361_v21  ;;  %v4362_v14 = vmul.f32 %v8988_v30, %v8988_v30 }
 0x65f   :  { %v5298_v48 = vpop.f32.mrb[181].mxu0 }
 0x660   :  { %v5299_v25 = vadd.f32 %v5298_v48, %v5297_v47  ;;  %v5300_v7 = vpop.f32.mrb[182].mxu0  ;;  %v4392_v58 = vadd.f32 %v4391_v59, %v8983_v52 }
 0x661   :  { %v5301_v34 = vpop.f32.mrb[183].mxu0 }
 0x662   :  { %v8997_v57 = vadd.f32 %v5299_v25, %v8871_v49  ;;  %v5302_v27 = vadd.f32 %v5301_v34, %v5300_v7  ;;  %v4393_v48 = vadd.f32 %v4392_v58, %v8988_v30  ;;  %v4430_v7 = vadd.f32 %v4429_v60, %v4362_v14 }
 0x664   :  { %v9003_v20 = vadd.f32 %v5302_v27, %v8874_v41  ;;  %v4363_v28 = vmul.f32 %v8997_v57, %v8997_v57  ;;  %v4394_v34 = vadd.f32 %v4393_v48, %v8997_v57 }
 0x666   :  { %v5303_v50 = vpop.f32.mrb[184].mxu0  ;;  %v4431_v54 = vadd.f32 %v4430_v7, %v4363_v28  ;;  %v4364_v27 = vmul.f32 %v9003_v20, %v9003_v20  ;;  %v4395_v16 = vadd.f32 %v4394_v34, %v9003_v20 }
 0x667   :  { %v5304_v4 = vpop.f32.mrb[185].mxu0 }
 0x668   :  { %v5305_v49 = vadd.f32 %v5304_v4, %v5303_v50  ;;  %v5306_v18 = vpop.f32.mrb[186].mxu0  ;;  %v4432_v4 = vadd.f32 %v4431_v54, %v4364_v27 }
 0x669   :  { %v5307_v1 = vpop.f32.mrb[187].mxu0 }
 0x66a   :  { %v9012_v41 = vadd.f32 %v5305_v49, %v8877_v61  ;;  %v5308_v46 = vadd.f32 %v5307_v1, %v5306_v18 }
 0x66c   :  { %v9016_v26 = vadd.f32 %v5308_v46, %v8880_v13  ;;  %v4365_v22 = vmul.f32 %v9012_v41, %v9012_v41  ;;  %v4396_v33 = vadd.f32 %v4395_v16, %v9012_v41 }
 0x66e   :  { %v5309_v29 = vpop.f32.mrb[188].mxu0  ;;  %v4433_v18 = vadd.f32 %v4432_v4, %v4365_v22  ;;  %v4366_v1 = vmul.f32 %v9016_v26, %v9016_v26  ;;  %v4397_v21 = vadd.f32 %v4396_v33, %v9016_v26 }
 0x66f   :  { %v5310_v47 = vpop.f32.mrb[189].mxu0 }
 0x670   :  { %v5311_v61 = vadd.f32 %v5310_v47, %v5309_v29  ;;  %v5312_v56 = vpop.f32.mrb[190].mxu0  ;;  %v4434_v58 = vadd.f32 %v4433_v18, %v4366_v1 }
 0x671   :  { %v5313_v25 = vpop.f32.mrb[191].mxu0 }
 0x672   :  { %v9025_v13 = vadd.f32 %v5311_v61, %v8883_v40  ;;  %v5314_v62 = vadd.f32 %v5313_v25, %v5312_v56 }
 0x674   :  { %v9030_v44 = vadd.f32 %v5314_v62, %v8886_v9  ;;  %v4367_v46 = vmul.f32 %v9025_v13, %v9025_v13  ;;  %v4398_v60 = vadd.f32 %v4397_v21, %v9025_v13 }
 0x676   :  { %v5315_v31 = vpop.f32.mrb[192].mxu0  ;;  %v4435_v47 = vadd.f32 %v4434_v58, %v4367_v46  ;;  %v4368_v48 = vmul.f32 %v9030_v44, %v9030_v44  ;;  %v4399_v56 = vadd.f32 %v4398_v60, %v9030_v44 }
 0x677   :  { %v5316_v50 = vpop.f32.mrb[193].mxu0 }
 0x678   :  { %v5317_v40 = vadd.f32 %v5316_v50, %v5315_v31  ;;  %v5318_v43 = vpop.f32.mrb[194].mxu0  ;;  %v4436_v34 = vadd.f32 %v4435_v47, %v4368_v48 }
 0x679   :  { %v5319_v49 = vpop.f32.mrb[195].mxu0 }
 0x67a   :  { %v9039_v9 = vadd.f32 %v5317_v40, %v8889_v63  ;;  %v5320_v59 = vadd.f32 %v5319_v49, %v5318_v43 }
 0x67c   :  { %v9045_v3 = vadd.f32 %v5320_v59, %v8892_v11  ;;  %v4369_v25 = vmul.f32 %v9039_v9, %v9039_v9  ;;  %v4400_v62 = vadd.f32 %v4399_v56, %v9039_v9 }
 0x67e   :  { %v5321_v14 = vpop.f32.mrb[196].mxu0  ;;  %v4437_v27 = vadd.f32 %v4436_v34, %v4369_v25  ;;  %v4370_v16 = vmul.f32 %v9045_v3, %v9045_v3  ;;  %v4401_v50 = vadd.f32 %v4400_v62, %v9045_v3  ;;  %v5754_v62 = vld [vmem:[%s9238_s10 + $0x18] sm:$0xff]  }
 0x67f   :  { %v5322_v29 = vpop.f32.mrb[197].mxu0  ;;  %5413 = vmatpush3.bf16.msra.mxu1 %v5754_v62 }
 0x680   :  { %v5323_v63 = vadd.f32 %v5322_v29, %v5321_v14  ;;  %v5324_v28 = vpop.f32.mrb[198].mxu0  ;;  %v4438_v43 = vadd.f32 %v4437_v27, %v4370_v16  ;;  %5414 = vmatprep.subr.bf16.mxu1 %v5852_v10 }
 0x681   :  { %v5325_v61 = vpop.f32.mrb[199].mxu0 }
 0x682   :  { %v9054_v11 = vadd.f32 %v5323_v63, %v8895_v23  ;;  %v5326_v7 = vadd.f32 %v5325_v61, %v5324_v28 }
 0x684   :  { %v9058_v54 = vadd.f32 %v5326_v7, %v8898_v35  ;;  %v4371_v4 = vmul.f32 %v9054_v11, %v9054_v11  ;;  %v4402_v49 = vadd.f32 %v4401_v50, %v9054_v11 }
 0x686   :  { %v5327_v22 = vpop.f32.mrb[200].mxu0  ;;  %v4439_v1 = vadd.f32 %v4438_v43, %v4371_v4  ;;  %v4372_v59 = vmul.f32 %v9058_v54, %v9058_v54  ;;  %v4403_v46 = vadd.f32 %v4402_v49, %v9058_v54 }
 0x687   :  { %v5328_v31 = vpop.f32.mrb[201].mxu0 }
 0x688   :  { %v5329_v23 = vadd.f32 %v5328_v31, %v5327_v22  ;;  %v5330_v33 = vpop.f32.mrb[202].mxu0  ;;  %v4440_v29 = vadd.f32 %v4439_v1, %v4372_v59  ;;  %v5755_v22 = vld [vmem:[%s9238_s10 + $0x20] sm:$0xff]  }
 0x689   :  { %v5331_v40 = vpop.f32.mrb[203].mxu0  ;;  %5415 = vmatpush3.bf16.msra.mxu1 %v5755_v22 }
 0x68a   :  { %v9067_v35 = vadd.f32 %v5329_v23, %v8901_v6  ;;  %v5332_v18 = vadd.f32 %v5331_v40, %v5330_v33  ;;  %5416 = vmatprep.subr.bf16.mxu1 %v5852_v10 }
 0x68c   :  { %v9072_v21 = vadd.f32 %v5332_v18, %v8904_v0  ;;  %v4373_v58 = vmul.f32 %v9067_v35, %v9067_v35  ;;  %v4404_v47 = vadd.f32 %v4403_v46, %v9067_v35  ;;  %v5756_v18 = vld [vmem:[%s9238_s10 + $0x28] sm:$0xff]  }
 0x68d   :  { %5417 = vmatpush3.bf16.msra.mxu1 %v5756_v18 }
 0x68e   :  { %v5333_v60 = vpop.f32.mrb[204].mxu0  ;;  %v4441_v28 = vadd.f32 %v4440_v29, %v4373_v58  ;;  %v4374_v61 = vmul.f32 %v9072_v21, %v9072_v21  ;;  %v4405_v25 = vadd.f32 %v4404_v47, %v9072_v21  ;;  %v5757_v47 = vld [vmem:[%s9238_s10 + $0x30] sm:$0xff]   ;;  %5418 = vmatprep.subr.bf16.mxu1 %v5852_v10 }
 0x68f   :  { %v5334_v14 = vpop.f32.mrb[205].mxu0 }
 0x690   :  { %v5335_v6 = vadd.f32 %v5334_v14, %v5333_v60  ;;  %v5336_v48 = vpop.f32.mrb[206].mxu0  ;;  %v4442_v27 = vadd.f32 %v4441_v28, %v4374_v61 }
 0x691   :  { %v5337_v63 = vpop.f32.mrb[207].mxu0  ;;  %5419 = vmatpush3.bf16.msra.mxu1 %v5757_v47 }
 0x692   :  { %v9081_v0 = vadd.f32 %v5335_v6, %v8912_v15  ;;  %v5338_v56 = vadd.f32 %v5337_v63, %v5336_v48  ;;  %5420 = vmatprep.subr.bf16.mxu1 %v5852_v10 }
 0x694   :  { %v4375_v7 = vmul.f32 %v9081_v0, %v9081_v0  ;;  %v9087_v34 = vadd.f32 %v5338_v56, %v8915_v32  ;;  %v4406_v15 = vadd.f32 %v4405_v25, %v9081_v0  ;;  %v5758_v25 = vld [vmem:[%s9238_s10 + $0x38] sm:$0xff]  }
 0x695   :  { %5421 = vmatpush3.bf16.msra.mxu1 %v5758_v25 }
 0x696   :  { %v5339_v16 = vpop.f32.mrb[208].mxu0  ;;  %v4443_v32 = vadd.f32 %v4442_v27, %v4375_v7  ;;  %v4376_v50 = vmul.f32 %v9087_v34, %v9087_v34  ;;  %v4407_v40 = vadd.f32 %v4406_v15, %v9087_v34 }
 0x697   :  { %v5340_v31 = vpop.f32.mrb[209].mxu0 }
 0x698   :  { %v5341_v4 = vadd.f32 %v5340_v31, %v5339_v16  ;;  %v5342_v23 = vpop.f32.mrb[210].mxu0  ;;  %v4444_v1 = vadd.f32 %v4443_v32, %v4376_v50 }
 0x699   :  { %v5343_v33 = vpop.f32.mrb[211].mxu0 }
 0x69a   :  { %v9102_v43 = vadd.f32 %v5341_v4, %v8918_v53  ;;  %v5344_v49 = vadd.f32 %v5343_v33, %v5342_v23 }
 0x69c   :  { %v4377_v59 = vmul.f32 %v9102_v43, %v9102_v43  ;;  %v4408_v46 = vadd.f32 %v4407_v40, %v9102_v43  ;;  %v9112_v58 = vadd.f32 %v5344_v49, %v8921_v17 }
 0x69e   :  { %v4445_v60 = vadd.f32 %v4444_v1, %v4377_v59  ;;  %v4378_v53 = vmul.f32 %v9112_v58, %v9112_v58  ;;  %v4409_v14 = vadd.f32 %v4408_v46, %v9112_v58  ;;  %v5345_v29 = vpop.f32.mrb[212].mxu0 }
 0x69f   :  { %v5346_v6 = vpop.f32.mrb[213].mxu0 }
 0x6a0   :  { %v4446_v48 = vadd.f32 %v4445_v60, %v4378_v53  ;;  %v5347_v63 = vadd.f32 %v5346_v6, %v5345_v29  ;;  %v5348_v28 = vpop.f32.mrb[214].mxu0 }
 0x6a1   :  { %v5349_v17 = vpop.f32.mrb[215].mxu0 }
 0x6a2   :  { %v9122_v61 = vadd.f32 %v5347_v63, %v8928_v39  ;;  %v5350_v56 = vadd.f32 %v5349_v17, %v5348_v28 }
 0x6a4   :  { %v4379_v7 = vmul.f32 %v9122_v61, %v9122_v61  ;;  %v4410_v62 = vadd.f32 %v4409_v14, %v9122_v61  ;;  %v4332_v27 = vadd.f32 %v5350_v56, %v8931_v55 }
 0x6a6   :  { %v4447_v15 = vadd.f32 %v4446_v48, %v4379_v7  ;;  %v4380_v16 = vmul.f32 %v4332_v27, %v4332_v27  ;;  %v4411_v22 = vadd.f32 %v4410_v62, %v4332_v27  ;;  %v5351_v39 = vpop.f32.mrb[216].mxu0 }
 0x6a7   :  { %v5352_v31 = vpop.f32.mrb[217].mxu0 }
 0x6a8   :  { %v4448_v32 = vadd.f32 %v4447_v15, %v4380_v16  ;;  %v5353_v50 = vadd.f32 %v5352_v31, %v5351_v39  ;;  %v5354_v4 = vpop.f32.mrb[218].mxu0 }
 0x6a9   :  { %v5355_v23 = vpop.f32.mrb[219].mxu0 }
 0x6aa   :  { %v4337_v33 = vadd.f32 %v5353_v50, %v8934_v24  ;;  %v5356_v10 = vadd.f32 %v5355_v23, %v5354_v4 }
 0x6ac   :  { %v4381_v40 = vmul.f32 %v4337_v33, %v4337_v33  ;;  %v4412_v49 = vadd.f32 %v4411_v22, %v4337_v33  ;;  %v4340_v18 = vadd.f32 %v5356_v10, %v8937_v36 }
 0x6ae   :  { %v4449_v1 = vadd.f32 %v4448_v32, %v4381_v40  ;;  %v4382_v59 = vmul.f32 %v4340_v18, %v4340_v18  ;;  %v4413_v55 = vadd.f32 %v4412_v49, %v4340_v18  ;;  %v5357_v46 = vpop.f32.mrb[220].mxu0 }
 0x6af   :  { %v5358_v60 = vpop.f32.mrb[221].mxu0 }
 0x6b0   :  { %v4450_v53 = vadd.f32 %v4449_v1, %v4382_v59  ;;  %v5359_v14 = vadd.f32 %v5358_v60, %v5357_v46  ;;  %v5360_v29 = vpop.f32.mrb[222].mxu0  ;;  %v4351_v59 = vld [vmem:[%s9236_s8] sm:$0x1] }
 0x6b1   :  { %v5361_v47 = vpop.f32.mrb[223].mxu0  ;;  %v4352_v60 = vld [vmem:[%s9237_s9] sm:$0x1] }
 0x6b2   :  { %v4345_v6 = vadd.f32 %v5359_v14, %v8944_v42  ;;  %v5362_v48 = vadd.f32 %v5361_v47, %v5360_v29  ;;  %v9637_v14 = vld [vmem:[#allocation12_spill] sm:$0xff] }
 0x6b4   :  { %v4383_v63 = vmul.f32 %v4345_v6, %v4345_v6  ;;  %v4414_v28 = vadd.f32 %v4413_v55, %v4345_v6  ;;  %v4348_v24 = vadd.f32 %v5362_v48, %v8947_v12 }
 0x6b6   :  { %v4451_v17 = vadd.f32 %v4450_v53, %v4383_v63  ;;  %v4384_v56 = vmul.f32 %v4348_v24, %v4348_v24  ;;  %v4415_v25 = vadd.f32 %v4414_v28, %v4348_v24 }
 0x6b8   :  { %v4416_v36 = vrot.slane %v4415_v25, 4  ;;  %v4452_v7 = vadd.f32 %v4451_v17, %v4384_v56 }
 0x6ba   :  { %v4417_v62 = vadd.f32 %v4416_v36, %v4415_v25  ;;  %v4453_v15 = vrot.slane %v4452_v7, 4 }
 0x6bc   :  { %v4418_v16 = vrot.slane %v4417_v62, 2  ;;  %v4454_v22 = vadd.f32 %v4453_v15, %v4452_v7 }
 0x6be   :  { %v4419_v39 = vadd.f32 %v4418_v16, %v4417_v62  ;;  %v4455_v31 = vrot.slane %v4454_v22, 2 }
 0x6c0   :  { %v4420_v32 = vrot.slane %v4419_v39, 1  ;;  %v4456_v50 = vadd.f32 %v4455_v31, %v4454_v22 }
 0x6c2   :  { %v4421_v4 = vadd.f32 %v4420_v32, %v4419_v39  ;;  %v4457_v42 = vrot.slane %v4456_v50, 1 }
 0x6c4   :  { %v4458_v23 = vadd.f32 %v4457_v42, %v4456_v50  ;;  %v4459_v10 = vmul.f32 0.00390625, %v4421_v4 }
 0x6c6   :  { %v4460_v40 = vmul.f32 0.00390625, %v4458_v23  ;;  %v4461_v49 = vmul.f32 %v4459_v10, %v4459_v10 }
 0x6c8   :  { %v4462_v12 = vsub.f32 %v4460_v40, %v4461_v49 }
 0x6ca   :  { %v4463_v1 = vadd.f32 1e-05, %v4462_v12 }
 0x6cc   :  { %5765 = vrsqrt.f32 %v4463_v1 }
 0x6d6   :  { %v5766_v55 = vpop.eup %5765 }
 0x6d7   :  { %v4465_v46 = vmul.f32 %v5766_v55, %v4351_v59 }
 0x6d9   :  { %v4466_v53 = vmul.f32 %v4465_v46, %v4459_v10  ;;  %v4472_v29 = vrot.slane %v4465_v46, %v9637_v14 }
 0x6db   :  { %v4467_v47 = vsub.f32 %v4352_v60, %v4466_v53  ;;  %v4498_v48 = vmul.f32 %v4472_v29, %v9102_v43  ;;  %v4499_v63 = vmul.f32 %v4472_v29, %v9112_v58  ;;  %v4500_v28 = vmul.f32 %v4472_v29, %v9122_v61 }
 0x6dc   :  { %v4501_v17 = vmul.f32 %v4472_v29, %v4332_v27  ;;  %v4502_v56 = vmul.f32 %v4472_v29, %v4337_v33  ;;  %v4503_v25 = vmul.f32 %v4472_v29, %v4340_v18  ;;  %v4504_v36 = vmul.f32 %v4472_v29, %v4345_v6 }
 0x6dd   :  { %v4505_v7 = vmul.f32 %v4472_v29, %v4348_v24  ;;  %v9147_v62 = vrot.slane %v4467_v47, %v9637_v14  ;;  %v4474_v15 = vmul.f32 %v4472_v29, %v8950_v5  ;;  %v4475_v16 = vmul.f32 %v4472_v29, %v8953_v37 }
 0x6de   :  { %v4476_v22 = vmul.f32 %v4472_v29, %v8956_v19  ;;  %v4477_v43 = vmul.f32 %v4472_v29, %v8959_v38  ;;  %v4478_v58 = vmul.f32 %v4472_v29, %v8962_v45  ;;  %v4479_v61 = vmul.f32 %v4472_v29, %v8965_v2 }
 0x6df   :  { %v4536_v27 = vadd.f32 %v9147_v62, %v4498_v48  ;;  %v4537_v33 = vadd.f32 %v9147_v62, %v4499_v63  ;;  %v4538_v18 = vadd.f32 %v9147_v62, %v4500_v28  ;;  %v4539_v6 = vadd.f32 %v9147_v62, %v4501_v17 }
 0x6e0   :  { %v4540_v5 = vadd.f32 %v9147_v62, %v4502_v56  ;;  %v4541_v37 = vadd.f32 %v9147_v62, %v4503_v25  ;;  %v4542_v19 = vadd.f32 %v9147_v62, %v4504_v36  ;;  %v4543_v38 = vadd.f32 %v9147_v62, %v4505_v7 }
 0x6e1   :  { %v4568_v24 = vmax.f32 %v4536_v27, 0.0  ;;  %v4569_v45 = vmax.f32 %v4537_v33, 0.0  ;;  %v4570_v39 = vmax.f32 %v4538_v18, 0.0  ;;  %v4571_v2 = vmax.f32 %v4539_v6, 0.0 }
 0x6e2   :  { %v4572_v31 = vmax.f32 %v4540_v5, 0.0  ;;  %v4573_v32 = vmax.f32 %v4541_v37, 0.0  ;;  %v4574_v50 = vmax.f32 %v4542_v19, 0.0  ;;  %v4575_v4 = vmax.f32 %v4543_v38, 0.0 }
 0x6e3   :  { %v4615_v42 = vadd.f32 %v4569_v45, %v4568_v24  ;;  %v4480_v23 = vmul.f32 %v4472_v29, %v8968_v51  ;;  %v4481_v10 = vmul.f32 %v4472_v29, %v8971_v8  ;;  %v4482_v40 = vmul.f32 %v4472_v29, %v8983_v52 }
 0x6e4   :  { %v4483_v49 = vmul.f32 %v4472_v29, %v8988_v30  ;;  %v4484_v12 = vmul.f32 %v4472_v29, %v8997_v57  ;;  %v4485_v1 = vmul.f32 %v4472_v29, %v9003_v20  ;;  %v4486_v59 = vmul.f32 %v4472_v29, %v9012_v41 }
 0x6e5   :  { %v4616_v55 = vadd.f32 %v4615_v42, %v4570_v39  ;;  %v4487_v46 = vmul.f32 %v4472_v29, %v9016_v26  ;;  %v4488_v60 = vmul.f32 %v4472_v29, %v9025_v13  ;;  %v4489_v53 = vmul.f32 %v4472_v29, %v9030_v44 }
 0x6e6   :  { %v4490_v51 = vmul.f32 %v4472_v29, %v9039_v9  ;;  %v4491_v8 = vmul.f32 %v4472_v29, %v9045_v3  ;;  %v4492_v52 = vmul.f32 %v4472_v29, %v9054_v11  ;;  %v4493_v30 = vmul.f32 %v4472_v29, %v9058_v54 }
 0x6e7   :  { %v4617_v57 = vadd.f32 %v4616_v55, %v4571_v2  ;;  %v4494_v20 = vmul.f32 %v4472_v29, %v9067_v35  ;;  %v4495_v41 = vmul.f32 %v4472_v29, %v9072_v21  ;;  %v4496_v14 = vmul.f32 %v4472_v29, %v9081_v0 }
 0x6e8   :  { %v4497_v26 = vmul.f32 %v4472_v29, %v9087_v34  ;;  %v4512_v13 = vadd.f32 %v9147_v62, %v4474_v15  ;;  %v4513_v44 = vadd.f32 %v9147_v62, %v4475_v16  ;;  %v4514_v9 = vadd.f32 %v9147_v62, %v4476_v22 }
 0x6e9   :  { %v4618_v3 = vadd.f32 %v4617_v57, %v4572_v31  ;;  %v4515_v11 = vadd.f32 %v9147_v62, %v4477_v43  ;;  %v4516_v54 = vadd.f32 %v9147_v62, %v4478_v58  ;;  %v4517_v47 = vadd.f32 %v9147_v62, %v4479_v61 }
 0x6ea   :  { %v9188_v35 = vadd.f32 %v9147_v62, %v4480_v23  ;;  %v9191_v21 = vadd.f32 %v9147_v62, %v4481_v10  ;;  %v4520_v0 = vadd.f32 %v9147_v62, %v4482_v40  ;;  %v4521_v34 = vadd.f32 %v9147_v62, %v4483_v49 }
 0x6eb   :  { %v4619_v29 = vadd.f32 %v4618_v3, %v4573_v32  ;;  %v4522_v48 = vadd.f32 %v9147_v62, %v4484_v12  ;;  %v4523_v63 = vadd.f32 %v9147_v62, %v4485_v1  ;;  %v4524_v28 = vadd.f32 %v9147_v62, %v4486_v59 }
 0x6ec   :  { %v4525_v17 = vadd.f32 %v9147_v62, %v4487_v46  ;;  %v4526_v56 = vadd.f32 %v9147_v62, %v4488_v60  ;;  %v4527_v25 = vadd.f32 %v9147_v62, %v4489_v53  ;;  %v4528_v36 = vadd.f32 %v9147_v62, %v4490_v51 }
 0x6ed   :  { %v4620_v7 = vadd.f32 %v4619_v29, %v4574_v50  ;;  %v4529_v15 = vadd.f32 %v9147_v62, %v4491_v8  ;;  %v4530_v16 = vadd.f32 %v9147_v62, %v4492_v52  ;;  %v4531_v22 = vadd.f32 %v9147_v62, %v4493_v30 }
 0x6ee   :  { %v4532_v43 = vadd.f32 %v9147_v62, %v4494_v20  ;;  %v4533_v58 = vadd.f32 %v9147_v62, %v4495_v41  ;;  %v4534_v61 = vadd.f32 %v9147_v62, %v4496_v14  ;;  %v4535_v27 = vadd.f32 %v9147_v62, %v4497_v26 }
 0x6ef   :  { %v4621_v33 = vadd.f32 %v4620_v7, %v4575_v4  ;;  %v4544_v18 = vmax.f32 %v4512_v13, 0.0  ;;  %v4545_v6 = vmax.f32 %v4513_v44, 0.0  ;;  %v4552_v5 = vmax.f32 %v4520_v0, 0.0 }
 0x6f0   :  { %v4553_v37 = vmax.f32 %v4521_v34, 0.0  ;;  %v4560_v19 = vmax.f32 %v4528_v36, 0.0  ;;  %v4561_v38 = vmax.f32 %v4529_v15, 0.0  ;;  %v4546_v45 = vmax.f32 %v4514_v9, 0.0 }
 0x6f1   :  { %v4622_v24 = vrot.slane %v4621_v33, 4  ;;  %v4554_v39 = vmax.f32 %v4522_v48, 0.0  ;;  %v4562_v2 = vmax.f32 %v4530_v16, 0.0  ;;  %v4576_v31 = vadd.f32 %v4545_v6, %v4544_v18 }
 0x6f2   :  { %v4589_v32 = vadd.f32 %v4553_v37, %v4552_v5  ;;  %v4602_v50 = vadd.f32 %v4561_v38, %v4560_v19  ;;  %v4547_v42 = vmax.f32 %v4515_v11, 0.0  ;;  %v4555_v23 = vmax.f32 %v4523_v63, 0.0 }
 0x6f3   :  { %v4563_v10 = vmax.f32 %v4531_v22, 0.0  ;;  %v4577_v40 = vadd.f32 %v4576_v31, %v4546_v45  ;;  %v4623_v4 = vadd.f32 %v4622_v24, %v4621_v33  ;;  %v4548_v12 = vmax.f32 %v4516_v54, 0.0 }
 0x6f4   :  { %v4590_v49 = vadd.f32 %v4589_v32, %v4554_v39  ;;  %v4603_v62 = vadd.f32 %v4602_v50, %v4562_v2  ;;  %v4556_v1 = vmax.f32 %v4524_v28, 0.0  ;;  %v4564_v59 = vmax.f32 %v4532_v43, 0.0 }
 0x6f5   :  { %v4578_v55 = vadd.f32 %v4577_v40, %v4547_v42  ;;  %v4549_v53 = vmax.f32 %v4517_v47, 0.0  ;;  %v4557_v51 = vmax.f32 %v4525_v17, 0.0  ;;  %v4565_v8 = vmax.f32 %v4533_v58, 0.0 }
 0x6f6   :  { %v4591_v46 = vadd.f32 %v4590_v49, %v4555_v23  ;;  %v4604_v60 = vadd.f32 %v4603_v62, %v4563_v10  ;;  %v4624_v20 = vrot.slane %v4623_v4, 2  ;;  %v4550_v41 = vmax.f32 %v9188_v35, 0.0 }
 0x6f7   :  { %v4579_v52 = vadd.f32 %v4578_v55, %v4548_v12  ;;  %v4558_v14 = vmax.f32 %v4526_v56, 0.0  ;;  %v4566_v26 = vmax.f32 %v4534_v61, 0.0  ;;  %v4551_v3 = vmax.f32 %v9191_v21, 0.0 }
 0x6f8   :  { %v4592_v30 = vadd.f32 %v4591_v46, %v4556_v1  ;;  %v4605_v57 = vadd.f32 %v4604_v60, %v4564_v59  ;;  %v4559_v11 = vmax.f32 %v4527_v25, 0.0  ;;  %v4567_v54 = vmax.f32 %v4535_v27, 0.0  ;;  %v5001_v1 = vld [vmem:[%s9239_s11] ss:$0 sm:$0xff]  ;;  %s5854_s11 = smov [#allocation7]  }
 0x6f9   :  { %v4580_v13 = vadd.f32 %v4579_v52, %v4549_v53  ;;  %v4625_v29 = vadd.f32 %v4624_v20, %v4623_v4  ;;  %s4783_s24 = sshll.u32 %s5854_s11, 4  ;;  %s4784_s24 = int_to_ptr.vmem [resolvable:$true] %s4783_s24 }
 0x6fa   :  { %v4593_v44 = vadd.f32 %v4592_v30, %v4557_v51  ;;  %v4606_v9 = vadd.f32 %v4605_v57, %v4565_v8  ;;  %s5815_s25 = scalar_lea.vmem %s4784_s24, 64  ;;  %p5820_p3 = scmp.lt.s32.totalorder %s4784_s24, %s4784_s24 }
 0x6fb   :  { %v4581_v0 = vadd.f32 %v4580_v13, %v4550_v41  ;;  %v4626_v35 = vrot.slane %v4625_v29, 1  ;;  %p5816_p2 = scmp.ne.s32.totalorder %s4784_s24, %s5815_s25  ;;  %p5821_p4 = scmp.lt.s32.totalorder %s5815_s25, %s5815_s25 }
 0x6fc   :  { %v4594_v34 = vadd.f32 %v4593_v44, %v4558_v14  ;;  %v4607_v47 = vadd.f32 %v4606_v9, %v4566_v26 }
 0x6fd   :  { %v4582_v48 = vadd.f32 %v4581_v0, %v4551_v3  ;;  %v4627_v21 = vadd.f32 %v4626_v35, %v4625_v29  ;;  %p5822_p5 = por %p5821_p4, %p5820_p3 }
 0x6fe   :  { %v4595_v63 = vadd.f32 %v4594_v34, %v4559_v11  ;;  %v4608_v28 = vadd.f32 %v4607_v47, %v4567_v54 }
 0x6ff   :  { %v4583_v17 = vrot.slane %v4582_v48, 4  ;;  %v4632_v38 = vmul.f32 0.015625, %v4627_v21  ;;  %p5823_p6 = pnand %p5822_p5, %p5816_p2 }
 0x700   :  { %v4596_v36 = vrot.slane %v4595_v63, 4  ;;  %v4609_v7 = vrot.slane %v4608_v28, 4 }
 0x701   :  { %v4584_v56 = vadd.f32 %v4583_v17, %v4582_v48  ;;  %v4636_v50 = vpack.c.bf16 %v4632_v38, %v4632_v38 }
 0x702   :  { %v4597_v15 = vadd.f32 %v4596_v36, %v4595_v63  ;;  %v4610_v16 = vadd.f32 %v4609_v7, %v4608_v28 }
 0x703   :  { %v4585_v22 = vrot.slane %v4584_v56, 2  ;;  %v4667_v40 = vunpack.c.l.b16 %v4636_v50 }
 0x704   :  { %v4598_v43 = vrot.slane %v4597_v15, 2  ;;  %v4611_v58 = vrot.slane %v4610_v16, 2 }
 0x705   :  { %v4586_v25 = vadd.f32 %v4585_v22, %v4584_v56 }
 0x706   :  { %v4599_v61 = vadd.f32 %v4598_v43, %v4597_v15  ;;  %v4612_v27 = vadd.f32 %v4611_v58, %v4610_v16 }
 0x707   :  { %v4587_v33 = vrot.slane %v4586_v25, 1 }
 0x708   :  { %v4600_v18 = vrot.slane %v4599_v61, 1  ;;  %v4613_v6 = vrot.slane %v4612_v27, 1 }
 0x709   :  { %v4588_v5 = vadd.f32 %v4587_v33, %v4586_v25 }
 0x70a   :  { %v4601_v37 = vadd.f32 %v4600_v18, %v4599_v61  ;;  %v4614_v19 = vadd.f32 %v4613_v6, %v4612_v27 }
 0x70b   :  { %v4629_v24 = vmul.f32 0.015625, %v4588_v5 }
 0x70c   :  { %v4630_v45 = vmul.f32 0.015625, %v4601_v37  ;;  %v4631_v39 = vmul.f32 0.015625, %v4614_v19 }
 0x70d   :  { %v4633_v2 = vpack.c.bf16 %v4629_v24, %v4629_v24 }
 0x70e   :  { %v4634_v31 = vpack.c.bf16 %v4630_v45, %v4630_v45  ;;  %v4635_v32 = vpack.c.bf16 %v4631_v39, %v4631_v39 }
 0x70f   :  { %v4664_v42 = vunpack.c.l.b16 %v4633_v2 }
 0x710   :  { %v4665_v23 = vunpack.c.l.b16 %v4634_v31  ;;  %v4666_v10 = vunpack.c.l.b16 %v4635_v32 }
 0x712   :  { %v4669_v49 = vsel %vm4668_vm14, %v4665_v23, %v4664_v42 }
 0x713   :  { %v4671_v62 = vsel %vm4670_vm15, %v4666_v10, %v4669_v49 }
 0x714   :  { %v4673_v4 = vsel %vm4672_vm1, %v4667_v40, %v4671_v62 }
 0x715   :  { %v4674_v12 = vpack.c.b16 %v4673_v4, %v4673_v4 }
 0x717   :  { %5423 = vmatmul.mubr.bf16.vlgmr.msra.gmra.mrb[64].mxu1 %v4674_v12 }
 0x7ea   :  { %v4758_v59 = vpop.f32.mrb[64].mxu1 }
 0x7eb   :  { %v4759_v55 = vadd.f32 %v5001_v1, %v4758_v59  ;;  %v5424_v46 = vpop.f32.mrb[65].mxu1 }
 0x7ec   :  { %v4761_v60 = vpop.f32.mrb[66].mxu1 }
 0x7ed   :  { %v5425_v53 = vpop.f32.mrb[67].mxu1  ;;  %v4764_v51 = vsel %vm233_vm0, %v4759_v55, -inf }
 0x7ee   :  { %4765 = vmax.xlane.f32.xlu0 %v4764_v51 }
 0x87b   :  { %v4766_v8 = vpop.xlane.xlu0 %4765 }
 0x87c   :  { %v4767_v52 = vsub.f32 %v4759_v55, %v4766_v8 }
 0x87e   :  { %v4768_v30 = vmul.f32 1.442695, %v4767_v52 }
 0x880   :  { %5767 = vpow2.f32 %v4768_v30 }
 0x88a   :  { %v5768_v57 = vpop.eup %5767 }
 0x88b   :  { %v4770_v20 = vsel %vm233_vm0, %v5768_v57, 0.0 }
 0x88c   :  { %4771 = vadd.xlane.f32.xlu0 %v4770_v20 }
 0x919   :  { %v4772_v41 = vpop.xlane.xlu0 %4771 }
 0x91a   :  { %5769 = vlog2.f32 %v4772_v41 }
 0x924   :  { %v5770_v14 = vpop.eup %5769 }
 0x925   :  { %v4774_v26 = vmul.f32 0.6931472, %v5770_v14 }
 0x927   :  { %v4775_v13 = vsub.f32 %v4767_v52, %v4774_v26 }
 0x929   :  { %4776 = vst [vmem:[#allocation7] sm:$0xf] %v4775_v13 }
 0x92a   :  { %5826 = shalt.err (!%p5823_p6)
}
 0x92b   :  { %s5827_s3 = scalar_lea.hbm %s9240_s12, 64 }
 0x92c   :  { %p5828_p7 = scmp.ne.s32.totalorder %s9240_s12, %s5827_s3  ;;  %p5831_p8 = scmp.lt.u32.totalorder %s5827_s3, %s9240_s12 }
 0x92e   :  { %p5833_p9 = pnand %p5831_p8, %p5828_p7 }
 0x930   :  { %5836 = shalt.err (!%p5833_p9)
}
 0x931   :  { %4786 = dma.vmem_to_hbm [thread:$0]  %s4784_s24, 64, %s9240_s12, [#allocation4]  }
 0x932   :  { %5841 = dma.done.wait [#allocation4], 64  }
 0x933   :  { %5842 = vsyncadd [#allocation4], 4294967232 }
 0x934   :  { %4790 = vsyncpa [#allocation3], 1 }
 0x935   :  { %4791 = vsyncpa [#allocation6], 1 }
 0x936   :  { %4792 = vsyncpa [#allocation4], 1 }

</bundles_post_ra>
